<compile_context>
chip_gen: v7x
topology: tpu7x:2x2x1
jax: 0.10.0
libtpu: 0.0.40
codegen_flags: <defaults>
</compile_context>

<pallas_src>
import functools

import jax
import jax.numpy as jnp
from jax.experimental import pallas as pl
from jax.experimental.pallas import tpu as pltpu


# ------------------------------- helpers ----------------------------------- #

def _round_up(x, m):
    return (x + m - 1) // m * m


def _largest_divisor_tile(total, target, quantum):
    """Largest divisor of `total` that is <= target and a multiple of
    `quantum`; falls back to `total` (full-extent blocks are always legal)."""
    for t in range(min(target, total), 0, -1):
        if total % t == 0 and t % quantum == 0:
            return t
    return total


# ----------------------------- Pallas kernels ------------------------------ #

def _conv_stats_kernel(x_ref, w_ref, y_ref, stat_ref, a_ref,
                       *, kh, kw, dil, oh, ow):
    """Fused conv tile + BatchNorm partial statistics.

    x_ref:    (1, Hp, Wp, TCIN)     zero-padded bf16 NHWC input slab (one image)
    w_ref:    (1, KH*KW*TCIN, TN)   packed bf16 weights (taps folded into K)
    y_ref:    (1, OH*OW, TN)        f32 conv output block (accumulated over Cin)
    stat_ref: (1, 2, TN)            per-(image, Cout tile) [sum, sumsq] partials
    a_ref:    (OH*OW, KH*KW*TCIN)   bf16 VMEM scratch: packed MXU A operand
    """
    c = pl.program_id(2)                       # Cin reduction tile (innermost)

    @pl.when(c == 0)
    def _init():
        y_ref[...] = jnp.zeros_like(y_ref)
        stat_ref[...] = jnp.zeros_like(stat_ref)

    tcin = x_ref.shape[-1]

    # Stage the shifted taps once into the packed K operand (lane-aligned
    # column blocks, tcin is a multiple of 128), then one wide matmul with
    # K = KH*KW*TCIN instead of KH*KW small matmuls with K = TCIN.
    for ki in range(kh):
        for kj in range(kw):
            t = ki * kw + kj
            a = x_ref[0, ki * dil:ki * dil + oh, kj * dil:kj * dil + ow, :]
            a_ref[:, t * tcin:(t + 1) * tcin] = a.reshape(oh * ow, tcin)

    acc = jnp.dot(a_ref[...], w_ref[0], preferred_element_type=jnp.float32)
    y_ref[0] = y_ref[0] + acc
    # Linear part of the BN stats accumulates per Cin step (cheap, off the
    # last-step critical path); only sumsq needs the final y.
    stat_ref[0, 0:1, :] = stat_ref[0, 0:1, :] + jnp.sum(acc, axis=0,
                                                        keepdims=True)

    @pl.when(c == pl.num_programs(2) - 1)
    def _epilogue():
        y = y_ref[0]
        stat_ref[0, 1:2, :] = jnp.sum(y * y, axis=0, keepdims=True)


def _bn_apply_kernel(y_ref, scale_ref, shift_ref, o_ref, *, cout):
    """Normalize pass: one FMA per element, emits the unpadded NCHW tile."""
    yb = y_ref[0] * scale_ref[...] + shift_ref[...]          # (TS, CP) f32
    o_ref[0] = jnp.transpose(yb)[:cout, :]                   # (Cout, TS)


# ------------------------------- JAX glue ---------------------------------- #

def conv2d_bn_forward(x, weight, gamma, beta, *,
                      stride=1, padding=0, dilation=1, eps=1e-5):
    """Equivalent of Conv2dBn.forward (conv bias=False, BN training stats)."""
    n, cin, h, w = x.shape
    cout, wcin, kh, kw = weight.shape
    if stride != 1 or wcin != cin:
        # TODO(synk): stride > 1 / groups > 1 need a strided-gather input path
        # (manual DMA); only the stride=1, groups=1 case is fused here.
        raise NotImplementedError("fused path supports stride=1, groups=1")

    oh = (h + 2 * padding - dilation * (kh - 1) - 1) // stride + 1
    ow = (w + 2 * padding - dilation * (kw - 1) - 1) // stride + 1
    m = oh * ow                                     # rows per batch element
    kk = kh * kw

    cp = _round_up(cout, 128)                       # lane-dense Cout axis
    cinp = _round_up(cin, 128)                      # lane-dense Cin axis
    tn = _largest_divisor_tile(cp, 256, 128)        # Cout tile
    tcin = _largest_divisor_tile(cinp, 256, 128)    # Cin (reduction) tile
    nc = cinp // tcin

    # NCHW -> zero-padded bf16 NHWC (channels on the 128-lane axis).
    x_p = jnp.pad(x.astype(jnp.bfloat16).transpose(0, 2, 3, 1),
                  ((0, 0), (padding, padding), (padding, padding),
                   (0, cinp - cin)))
    hp, wp = h + 2 * padding, w + 2 * padding

    # OIHW -> (Cin-chunk, KH*KW*TCIN, Cout_pad): taps folded into the K axis,
    # grouped by Cin chunk so the kernel's w block is already MXU-ready.
    w_t = weight.astype(jnp.bfloat16).transpose(2, 3, 1, 0)    # (KH,KW,Cin,Cout)
    w_t = jnp.pad(w_t.reshape(kk, cin, cout),
                  ((0, 0), (0, cinp - cin), (0, cp - cout)))
    w_flat = (w_t.reshape(kk, nc, tcin, cp)
                  .transpose(1, 0, 2, 3)
                  .reshape(nc, kk * tcin, cp))

    conv_params = pltpu.CompilerParams(
        dimension_semantics=("parallel", "parallel", "arbitrary"),
        vmem_limit_bytes=64 * 1024 * 1024)

    # --- fused conv + BN partial statistics --------------------------------
    y, stats = pl.pallas_call(
        functools.partial(_conv_stats_kernel, kh=kh, kw=kw, dil=dilation,
                          oh=oh, ow=ow),
        out_shape=(jax.ShapeDtypeStruct((n, m, cp), jnp.float32),
                   jax.ShapeDtypeStruct((n, 2, cp), jnp.float32)),
        grid_spec=pltpu.PrefetchScalarGridSpec(
            num_scalar_prefetch=0,
            grid=(n, cp // tn, nc),
            in_specs=[
                pl.BlockSpec((1, hp, wp, tcin), lambda b, j, c: (b, 0, 0, c)),
                pl.BlockSpec((1, kk * tcin, tn), lambda b, j, c: (c, 0, j)),
            ],
            out_specs=[
                pl.BlockSpec((1, m, tn), lambda b, j, c: (b, 0, j)),
                pl.BlockSpec((1, 2, tn), lambda b, j, c: (b, 0, j)),
            ],
            scratch_shapes=[pltpu.VMEM((m, kk * tcin), jnp.bfloat16)],
        ),
        compiler_params=conv_params,
    )(x_p, w_flat)

    # --- per-channel scale/shift from the fused statistics (tiny, in JAX) ---
    cnt = jnp.float32(n * m)
    tot = jnp.sum(stats, axis=0)                    # (2, CP)
    mean = tot[0] / cnt
    # TODO(synk): single-pass E[y^2]-E[y]^2 can lose precision for very large
    # N*OH*OW or large means; switch to a two-pass centered sumsq if needed.
    var = jnp.maximum(tot[1] / cnt - mean * mean, 0.0)   # biased (training BN)
    inv = jax.lax.rsqrt(var + eps)
    gamma_p = jnp.pad(gamma.astype(jnp.float32), (0, cp - cout))
    beta_p = jnp.pad(beta.astype(jnp.float32), (0, cp - cout))
    scale = (gamma_p * inv).reshape(1, cp)
    shift = (beta_p - mean * gamma_p * inv).reshape(1, cp)
    # TODO(synk): running_mean / running_var momentum updates are stateful
    # nn.BatchNorm2d bookkeeping and do not affect the returned tensor.

    # --- tiled normalize pass: unpadded channels, NCHW emitted directly -----
    ts = _largest_divisor_tile(m, 2048, 128)
    ybn = pl.pallas_call(
        functools.partial(_bn_apply_kernel, cout=cout),
        out_shape=jax.ShapeDtypeStruct((n, cout, m), jnp.float32),
        grid_spec=pltpu.PrefetchScalarGridSpec(
            num_scalar_prefetch=0,
            grid=(n, m // ts),
            in_specs=[
                pl.BlockSpec((1, ts, cp), lambda b, s: (b, s, 0)),
                pl.BlockSpec((1, cp), lambda b, s: (0, 0)),
                pl.BlockSpec((1, cp), lambda b, s: (0, 0)),
            ],
            out_specs=pl.BlockSpec((1, cout, ts), lambda b, s: (b, 0, s)),
        ),
        compiler_params=pltpu.CompilerParams(
            dimension_semantics=("parallel", "parallel"),
            vmem_limit_bytes=64 * 1024 * 1024),
    )(y, scale, shift)

    return ybn.reshape(n, cout, oh, ow)             # already NCHW, free reshape


# --------------------------------- main ------------------------------------ #

if __name__ == "__main__":
    # Module config: Conv2dBn(in_channels=4, out_channels=8, kernel_size=3,
    #                         stride=1, padding=1, bias=False, bn=True)
    N, CIN, H, W = 2, 4, 16, 16
    COUT, KH, KW = 8, 3, 3
    STRIDE, PADDING, DILATION, EPS = 1, 1, 1, 1e-5

    key = jax.random.PRNGKey(0)
    kx, kw_, kg, kb = jax.random.split(key, 4)
    x = jax.random.normal(kx, (N, CIN, H, W), jnp.float32)
    weight = jax.random.normal(kw_, (COUT, CIN, KH, KW), jnp.float32) * 0.1
    gamma = 1.0 + 0.1 * jax.random.normal(kg, (COUT,), jnp.float32)   # BN weight
    beta = 0.1 * jax.random.normal(kb, (COUT,), jnp.float32)          # BN bias

    out = conv2d_bn_forward(x, weight, gamma, beta,
                            stride=STRIDE, padding=PADDING,
                            dilation=DILATION, eps=EPS)
    out = jax.block_until_ready(out)

    # Pure-JAX reference (nn.Conv2d bias=False + nn.BatchNorm2d training stats)
    # using the same bf16 operand quantization / f32 accumulation as the kernel.
    ref_conv = jax.lax.conv_general_dilated(
        x.astype(jnp.bfloat16), weight.astype(jnp.bfloat16),
        (STRIDE, STRIDE), [(PADDING, PADDING)] * 2,
        rhs_dilation=(DILATION, DILATION),
        dimension_numbers=("NCHW", "OIHW", "NCHW"),
        preferred_element_type=jnp.float32)
    rm = ref_conv.mean(axis=(0, 2, 3), keepdims=True)
    rv = ref_conv.var(axis=(0, 2, 3), keepdims=True)
    ref = (ref_conv - rm) / jnp.sqrt(rv + EPS) * gamma.reshape(1, -1, 1, 1) \
          + beta.reshape(1, -1, 1, 1)

    assert out.shape == (N, COUT, H, W), out.shape
    err = float(jnp.max(jnp.abs(out - ref)))
    assert jnp.allclose(out, ref, atol=5e-3, rtol=5e-3), err
    print("KERNEL_OK")
</pallas_src>

<mosaic_0001>
module attributes {stable_mosaic.version = 11 : i64} {
  func.func @_conv_stats_kernel(%arg0: i32, %arg1: i32, %arg2: i32, %arg3: memref<1x18x18x128xbf16, #tpu.memory_space<vmem>>, %arg4: memref<1x1152x128xbf16, #tpu.memory_space<vmem>>, %arg5: memref<1x256x128xf32, #tpu.memory_space<vmem>>, %arg6: memref<1x2x128xf32, #tpu.memory_space<vmem>>, %arg7: memref<256x1152xbf16, #tpu.memory_space<vmem>>) attributes {dimension_semantics = [#tpu.dimension_semantics<parallel>, #tpu.dimension_semantics<parallel>, #tpu.dimension_semantics<arbitrary>], iteration_bounds = array<i64: 2, 1, 1>, scalar_prefetch = 0 : i64, scratch_operands = 1 : i64, tpu.core_type = #tpu.core_type<tc>, window_params = [{transform_indices = @transform_0, window_bounds = array<i64: 1, 18, 18, 128>}, {transform_indices = @transform_1, window_bounds = array<i64: 1, 1152, 128>}, {transform_indices = @transform_2, window_bounds = array<i64: 1, 256, 128>}, {transform_indices = @transform_3, window_bounds = array<i64: 1, 2, 128>}]} {
    %c0_i32 = arith.constant 0 : i32
    %0 = arith.cmpi eq, %arg2, %c0_i32 : i32
    %1 = arith.extui %0 : i1 to i32
    %c0_i32_0 = arith.constant 0 : i32
    %2 = arith.cmpi ne, %1, %c0_i32_0 : i32
    scf.if %2 {
      %cst_64 = arith.constant 0.000000e+00 : f32
      %60 = vector.broadcast %cst_64 : f32 to vector<1x256x128xf32>
      %c0_65 = arith.constant 0 : index
      %c0_66 = arith.constant 0 : index
      %c0_67 = arith.constant 0 : index
      %61 = vector.load %arg5[%c0_65, %c0_66, %c0_67] : memref<1x256x128xf32, #tpu.memory_space<vmem>>, vector<1x256x128xf32>
      tpu.vector_store %arg5[%c0_65, %c0_66, %c0_67], %60 {strides = array<i32>} : memref<1x256x128xf32, #tpu.memory_space<vmem>>, vector<1x256x128xf32>,
      %cst_68 = arith.constant 0.000000e+00 : f32
      %62 = vector.broadcast %cst_68 : f32 to vector<1x2x128xf32>
      %c0_69 = arith.constant 0 : index
      %c0_70 = arith.constant 0 : index
      %c0_71 = arith.constant 0 : index
      %63 = vector.load %arg6[%c0_69, %c0_70, %c0_71] : memref<1x2x128xf32, #tpu.memory_space<vmem>>, vector<1x2x128xf32>
      tpu.vector_store %arg6[%c0_69, %c0_70, %c0_71], %62 {strides = array<i32>} : memref<1x2x128xf32, #tpu.memory_space<vmem>>, vector<1x2x128xf32>,
    } else {
    }
    %c0 = arith.constant 0 : index
    %c0_1 = arith.constant 0 : index
    %c0_2 = arith.constant 0 : index
    %c0_3 = arith.constant 0 : index
    %3 = vector.load %arg3[%c0, %c0_1, %c0_2, %c0_3] : memref<1x18x18x128xbf16, #tpu.memory_space<vmem>>, vector<1x16x16x128xbf16>
    %4 = vector.shape_cast %3 : vector<1x16x16x128xbf16> to vector<16x16x128xbf16>
    %5 = vector.shape_cast %4 : vector<16x16x128xbf16> to vector<256x128xbf16>
    %c0_4 = arith.constant 0 : index
    %c0_5 = arith.constant 0 : index
    %6 = vector.load %arg7[%c0_4, %c0_5] : memref<256x1152xbf16, #tpu.memory_space<vmem>>, vector<256x128xbf16>
    tpu.vector_store %arg7[%c0_4, %c0_5], %5 {strides = array<i32>} : memref<256x1152xbf16, #tpu.memory_space<vmem>>, vector<256x128xbf16>,
    %c0_6 = arith.constant 0 : index
    %c0_7 = arith.constant 0 : index
    %c1 = arith.constant 1 : index
    %c0_8 = arith.constant 0 : index
    %7 = vector.load %arg3[%c0_6, %c0_7, %c1, %c0_8] : memref<1x18x18x128xbf16, #tpu.memory_space<vmem>>, vector<1x16x16x128xbf16>
    %8 = vector.shape_cast %7 : vector<1x16x16x128xbf16> to vector<16x16x128xbf16>
    %9 = vector.shape_cast %8 : vector<16x16x128xbf16> to vector<256x128xbf16>
    %c0_9 = arith.constant 0 : index
    %c128 = arith.constant 128 : index
    %10 = vector.load %arg7[%c0_9, %c128] : memref<256x1152xbf16, #tpu.memory_space<vmem>>, vector<256x128xbf16>
    tpu.vector_store %arg7[%c0_9, %c128], %9 {strides = array<i32>} : memref<256x1152xbf16, #tpu.memory_space<vmem>>, vector<256x128xbf16>,
    %c0_10 = arith.constant 0 : index
    %c0_11 = arith.constant 0 : index
    %c2 = arith.constant 2 : index
    %c0_12 = arith.constant 0 : index
    %11 = vector.load %arg3[%c0_10, %c0_11, %c2, %c0_12] : memref<1x18x18x128xbf16, #tpu.memory_space<vmem>>, vector<1x16x16x128xbf16>
    %12 = vector.shape_cast %11 : vector<1x16x16x128xbf16> to vector<16x16x128xbf16>
    %13 = vector.shape_cast %12 : vector<16x16x128xbf16> to vector<256x128xbf16>
    %c0_13 = arith.constant 0 : index
    %c256 = arith.constant 256 : index
    %14 = vector.load %arg7[%c0_13, %c256] : memref<256x1152xbf16, #tpu.memory_space<vmem>>, vector<256x128xbf16>
    tpu.vector_store %arg7[%c0_13, %c256], %13 {strides = array<i32>} : memref<256x1152xbf16, #tpu.memory_space<vmem>>, vector<256x128xbf16>,
    %c0_14 = arith.constant 0 : index
    %c1_15 = arith.constant 1 : index
    %c0_16 = arith.constant 0 : index
    %c0_17 = arith.constant 0 : index
    %15 = vector.load %arg3[%c0_14, %c1_15, %c0_16, %c0_17] : memref<1x18x18x128xbf16, #tpu.memory_space<vmem>>, vector<1x16x16x128xbf16>
    %16 = vector.shape_cast %15 : vector<1x16x16x128xbf16> to vector<16x16x128xbf16>
    %17 = vector.shape_cast %16 : vector<16x16x128xbf16> to vector<256x128xbf16>
    %c0_18 = arith.constant 0 : index
    %c384 = arith.constant 384 : index
    %18 = vector.load %arg7[%c0_18, %c384] : memref<256x1152xbf16, #tpu.memory_space<vmem>>, vector<256x128xbf16>
    tpu.vector_store %arg7[%c0_18, %c384], %17 {strides = array<i32>} : memref<256x1152xbf16, #tpu.memory_space<vmem>>, vector<256x128xbf16>,
    %c0_19 = arith.constant 0 : index
    %c1_20 = arith.constant 1 : index
    %c1_21 = arith.constant 1 : index
    %c0_22 = arith.constant 0 : index
    %19 = vector.load %arg3[%c0_19, %c1_20, %c1_21, %c0_22] : memref<1x18x18x128xbf16, #tpu.memory_space<vmem>>, vector<1x16x16x128xbf16>
    %20 = vector.shape_cast %19 : vector<1x16x16x128xbf16> to vector<16x16x128xbf16>
    %21 = vector.shape_cast %20 : vector<16x16x128xbf16> to vector<256x128xbf16>
    %c0_23 = arith.constant 0 : index
    %c512 = arith.constant 512 : index
    %22 = vector.load %arg7[%c0_23, %c512] : memref<256x1152xbf16, #tpu.memory_space<vmem>>, vector<256x128xbf16>
    tpu.vector_store %arg7[%c0_23, %c512], %21 {strides = array<i32>} : memref<256x1152xbf16, #tpu.memory_space<vmem>>, vector<256x128xbf16>,
    %c0_24 = arith.constant 0 : index
    %c1_25 = arith.constant 1 : index
    %c2_26 = arith.constant 2 : index
    %c0_27 = arith.constant 0 : index
    %23 = vector.load %arg3[%c0_24, %c1_25, %c2_26, %c0_27] : memref<1x18x18x128xbf16, #tpu.memory_space<vmem>>, vector<1x16x16x128xbf16>
    %24 = vector.shape_cast %23 : vector<1x16x16x128xbf16> to vector<16x16x128xbf16>
    %25 = vector.shape_cast %24 : vector<16x16x128xbf16> to vector<256x128xbf16>
    %c0_28 = arith.constant 0 : index
    %c640 = arith.constant 640 : index
    %26 = vector.load %arg7[%c0_28, %c640] : memref<256x1152xbf16, #tpu.memory_space<vmem>>, vector<256x128xbf16>
    tpu.vector_store %arg7[%c0_28, %c640], %25 {strides = array<i32>} : memref<256x1152xbf16, #tpu.memory_space<vmem>>, vector<256x128xbf16>,
    %c0_29 = arith.constant 0 : index
    %c2_30 = arith.constant 2 : index
    %c0_31 = arith.constant 0 : index
    %c0_32 = arith.constant 0 : index
    %27 = vector.load %arg3[%c0_29, %c2_30, %c0_31, %c0_32] : memref<1x18x18x128xbf16, #tpu.memory_space<vmem>>, vector<1x16x16x128xbf16>
    %28 = vector.shape_cast %27 : vector<1x16x16x128xbf16> to vector<16x16x128xbf16>
    %29 = vector.shape_cast %28 : vector<16x16x128xbf16> to vector<256x128xbf16>
    %c0_33 = arith.constant 0 : index
    %c768 = arith.constant 768 : index
    %30 = vector.load %arg7[%c0_33, %c768] : memref<256x1152xbf16, #tpu.memory_space<vmem>>, vector<256x128xbf16>
    tpu.vector_store %arg7[%c0_33, %c768], %29 {strides = array<i32>} : memref<256x1152xbf16, #tpu.memory_space<vmem>>, vector<256x128xbf16>,
    %c0_34 = arith.constant 0 : index
    %c2_35 = arith.constant 2 : index
    %c1_36 = arith.constant 1 : index
    %c0_37 = arith.constant 0 : index
    %31 = vector.load %arg3[%c0_34, %c2_35, %c1_36, %c0_37] : memref<1x18x18x128xbf16, #tpu.memory_space<vmem>>, vector<1x16x16x128xbf16>
    %32 = vector.shape_cast %31 : vector<1x16x16x128xbf16> to vector<16x16x128xbf16>
    %33 = vector.shape_cast %32 : vector<16x16x128xbf16> to vector<256x128xbf16>
    %c0_38 = arith.constant 0 : index
    %c896 = arith.constant 896 : index
    %34 = vector.load %arg7[%c0_38, %c896] : memref<256x1152xbf16, #tpu.memory_space<vmem>>, vector<256x128xbf16>
    tpu.vector_store %arg7[%c0_38, %c896], %33 {strides = array<i32>} : memref<256x1152xbf16, #tpu.memory_space<vmem>>, vector<256x128xbf16>,
    %c0_39 = arith.constant 0 : index
    %c2_40 = arith.constant 2 : index
    %c2_41 = arith.constant 2 : index
    %c0_42 = arith.constant 0 : index
    %35 = vector.load %arg3[%c0_39, %c2_40, %c2_41, %c0_42] : memref<1x18x18x128xbf16, #tpu.memory_space<vmem>>, vector<1x16x16x128xbf16>
    %36 = vector.shape_cast %35 : vector<1x16x16x128xbf16> to vector<16x16x128xbf16>
    %37 = vector.shape_cast %36 : vector<16x16x128xbf16> to vector<256x128xbf16>
    %c0_43 = arith.constant 0 : index
    %c1024 = arith.constant 1024 : index
    %38 = vector.load %arg7[%c0_43, %c1024] : memref<256x1152xbf16, #tpu.memory_space<vmem>>, vector<256x128xbf16>
    tpu.vector_store %arg7[%c0_43, %c1024], %37 {strides = array<i32>} : memref<256x1152xbf16, #tpu.memory_space<vmem>>, vector<256x128xbf16>,
    %c0_44 = arith.constant 0 : index
    %c0_45 = arith.constant 0 : index
    %39 = vector.load %arg7[%c0_44, %c0_45] : memref<256x1152xbf16, #tpu.memory_space<vmem>>, vector<256x1152xbf16>
    %c0_46 = arith.constant 0 : index
    %c0_47 = arith.constant 0 : index
    %c0_48 = arith.constant 0 : index
    %40 = vector.load %arg4[%c0_46, %c0_47, %c0_48] : memref<1x1152x128xbf16, #tpu.memory_space<vmem>>, vector<1x1152x128xbf16>
    %41 = vector.shape_cast %40 : vector<1x1152x128xbf16> to vector<1152x128xbf16>
    %cst = arith.constant dense<0.000000e+00> : vector<256x128xf32>
    %42 = tpu.matmul %39, %41, %cst {dimension_numbers = #tpu.dot_dimension_numbers<[1], [0], [0], [1], [0, 0, 1, 1], [], []>} : vector<256x1152xbf16>, vector<1152x128xbf16>, vector<256x128xf32> -> vector<256x128xf32>
    %c0_49 = arith.constant 0 : index
    %c0_50 = arith.constant 0 : index
    %c0_51 = arith.constant 0 : index
    %43 = vector.load %arg5[%c0_49, %c0_50, %c0_51] : memref<1x256x128xf32, #tpu.memory_space<vmem>>, vector<1x256x128xf32>
    %44 = vector.shape_cast %43 : vector<1x256x128xf32> to vector<256x128xf32>
    %45 = arith.addf %44, %42 : vector<256x128xf32>
    %c0_52 = arith.constant 0 : index
    %c0_53 = arith.constant 0 : index
    %c0_54 = arith.constant 0 : index
    %46 = vector.load %arg5[%c0_52, %c0_53, %c0_54] : memref<1x256x128xf32, #tpu.memory_space<vmem>>, vector<1x256x128xf32>
    %47 = vector.shape_cast %46 : vector<1x256x128xf32> to vector<256x128xf32>
    %48 = vector.shape_cast %45 : vector<256x128xf32> to vector<1x256x128xf32>
    tpu.vector_store %arg5[%c0_52, %c0_53, %c0_54], %48 {strides = array<i32>} : memref<1x256x128xf32, #tpu.memory_space<vmem>>, vector<1x256x128xf32>,
    %c0_55 = arith.constant 0 : index
    %c0_56 = arith.constant 0 : index
    %c0_57 = arith.constant 0 : index
    %49 = vector.load %arg6[%c0_55, %c0_56, %c0_57] : memref<1x2x128xf32, #tpu.memory_space<vmem>>, vector<1x1x128xf32>
    %50 = vector.shape_cast %49 : vector<1x1x128xf32> to vector<1x128xf32>
    %cst_58 = arith.constant dense<0.000000e+00> : vector<128xf32>
    %51 = vector.multi_reduction <add>, %42, %cst_58 [0] : vector<256x128xf32> to vector<128xf32>
    %52 = vector.shape_cast %51 : vector<128xf32> to vector<1x128xf32>
    %53 = arith.addf %50, %52 : vector<1x128xf32>
    %c0_59 = arith.constant 0 : index
    %c0_60 = arith.constant 0 : index
    %c0_61 = arith.constant 0 : index
    %54 = vector.load %arg6[%c0_59, %c0_60, %c0_61] : memref<1x2x128xf32, #tpu.memory_space<vmem>>, vector<1x1x128xf32>
    %55 = vector.shape_cast %54 : vector<1x1x128xf32> to vector<1x128xf32>
    %56 = vector.shape_cast %53 : vector<1x128xf32> to vector<1x1x128xf32>
    tpu.vector_store %arg6[%c0_59, %c0_60, %c0_61], %56 {strides = array<i32>} : memref<1x2x128xf32, #tpu.memory_space<vmem>>, vector<1x1x128xf32>,
    %c0_i32_62 = arith.constant 0 : i32
    %57 = arith.cmpi eq, %arg2, %c0_i32_62 : i32
    %58 = arith.extui %57 : i1 to i32
    %c0_i32_63 = arith.constant 0 : i32
    %59 = arith.cmpi ne, %58, %c0_i32_63 : i32
    scf.if %59 {
      %c0_64 = arith.constant 0 : index
      %c0_65 = arith.constant 0 : index
      %c0_66 = arith.constant 0 : index
      %60 = vector.load %arg5[%c0_64, %c0_65, %c0_66] : memref<1x256x128xf32, #tpu.memory_space<vmem>>, vector<1x256x128xf32>
      %61 = vector.shape_cast %60 : vector<1x256x128xf32> to vector<256x128xf32>
      %62 = arith.mulf %61, %61 : vector<256x128xf32>
      %cst_67 = arith.constant dense<0.000000e+00> : vector<128xf32>
      %63 = vector.multi_reduction <add>, %62, %cst_67 [0] : vector<256x128xf32> to vector<128xf32>
      %64 = vector.shape_cast %63 : vector<128xf32> to vector<1x128xf32>
      %c0_68 = arith.constant 0 : index
      %c1_69 = arith.constant 1 : index
      %c0_70 = arith.constant 0 : index
      %65 = vector.load %arg6[%c0_68, %c1_69, %c0_70] : memref<1x2x128xf32, #tpu.memory_space<vmem>>, vector<1x1x128xf32>
      %66 = vector.shape_cast %65 : vector<1x1x128xf32> to vector<1x128xf32>
      %67 = vector.shape_cast %64 : vector<1x128xf32> to vector<1x1x128xf32>
      tpu.vector_store %arg6[%c0_68, %c1_69, %c0_70], %67 {strides = array<i32>} : memref<1x2x128xf32, #tpu.memory_space<vmem>>, vector<1x1x128xf32>,
    } else {
    }
    return
  }
  func.func @transform_0(%arg0: i32, %arg1: i32, %arg2: i32) -> (i32, i32, i32, i32) {
    %c0_i32 = arith.constant 0 : i32
    %c0_i32_0 = arith.constant 0 : i32
    %c0_i32_1 = arith.constant 0 : i32
    return %arg0, %c0_i32, %c0_i32_0, %arg2 : i32, i32, i32, i32
  }
  func.func @transform_1(%arg0: i32, %arg1: i32, %arg2: i32) -> (i32, i32, i32) {
    %c0_i32 = arith.constant 0 : i32
    %c0_i32_0 = arith.constant 0 : i32
    return %arg2, %c0_i32, %arg1 : i32, i32, i32
  }
  func.func @transform_2(%arg0: i32, %arg1: i32, %arg2: i32) -> (i32, i32, i32) {
    %c0_i32 = arith.constant 0 : i32
    %c0_i32_0 = arith.constant 0 : i32
    return %arg0, %c0_i32, %arg1 : i32, i32, i32
  }
  func.func @transform_3(%arg0: i32, %arg1: i32, %arg2: i32) -> (i32, i32, i32) {
    %c0_i32 = arith.constant 0 : i32
    %c0_i32_0 = arith.constant 0 : i32
    return %arg0, %c0_i32, %arg1 : i32, i32, i32
  }
}

</mosaic_0001>

<bundles_post_ra>
// kernel: tpu_custom_call.1
= control target key start
LH: loop header
LB: loop body
LE: loop exit
PB: predicated region body
PF: predicated region fallthrough
CT: control target
= control target key end

     0   :  { %9 = vsyncpa [#allocation4], 0  ;;  %s8204_s0 = inlined_call_operand.hbm [shape: bf16[2,18,18,128], index: 0, kind: input, shape index: {}]   ;;  %s8205_s1 = inlined_call_operand.hbm [shape: bf16[1,1152,128], index: 1, kind: input, shape index: {}]   ;;  %s8206_s2 = inlined_call_operand.hbm [shape: f32[2,256,128], index: 2, kind: output, shape index: {0}]   ;;  %s8207_s3 = inlined_call_operand.hbm [shape: f32[2,2,128], index: 3, kind: output, shape index: {1}]  }
   0x1   :  { %11 = vsyncpa [#allocation4 + $0x1], 0 }
   0x2   :  { %12 = vsyncpa [#allocation7], 0 }
   0x3   :  { %13 = vsyncpa [#allocation5], 0 }
   0x4   :  { %15 = vsyncpa [#allocation5 + $0x1], 0 }
   0x5   :  { %16 = vsyncpa [#allocation10], 0 }
   0x6   :  { %18 = vsyncpa [#allocation10 + $0x1], 0  ;;  %s6552_s12 = smov 0   ;;  %s6554_s13 = smov 0  }
   0x7   :  { %s6556_s14 = smov 0   ;;  %s6558_s15 = smov 0  }
   0x8   :  { %s6560_s16 = smov 0   ;;  %s6562_s17 = smov 0  }
   0x9 LB: > { %s5065_s18 = sadd.s32 4294967295, %s6521_s17   ;;  %s5066_s19 = sadd.s32 4294967294, %s6521_s17   ;;  %s6521_s17 = sphi %s6562_s17, %s24_s17   ;;  %s6517_s16 = sphi %s6560_s16, %s8266_s16   ;;  %s6513_s15 = sphi %s6558_s15, %s8265_s15   ;;  %s6509_s14 = sphi %s6556_s14, %s8264_s14   ;;  %s6505_s13 = sphi %s6554_s13, %s8263_s13   ;;  %s6501_s12 = sphi %s6552_s12, %s8262_s12  }
   0xa   : > { %p65_p0 = scmp.ne.s32.totalorder %s6505_s13, %s6501_s12  ;;  %p6586_p1 = scmp.eq.s32.totalorder %s5065_s18, 0 }
   0xb   : > { %p6590_p2 = scmp.eq.s32.totalorder %s5065_s18, 1  ;;  %p125_p3 = scmp.eq.s32.totalorder %s5066_s19, 1 }
   0xc   : > { %s8212_s20 = scalar_select %p6586_p1, 1, 0 }
   0xd   : > { %s8213_s21 = scalar_select %p6590_p2, 1, 0 }
   0xe   : > { %p6596_p4 = por %p6586_p1, %p65_p0  ;;  %p5067_p5 = scmp.ge.s32.totalorder %s6521_s17, 1 }
   0xf   : > { %p6601_p6 = por %p125_p3, %p65_p0  ;;  %p160_p7 = scmp.lt.s32.totalorder %s6521_s17, 3 }
  0x10   : > { %s8214_s22 = scalar_select %p6596_p4, 1, 0 }
  0x11   : > { %s8215_s23 = scalar_select %p6601_p6, 1, 0 }
  0x12   : > { %p6606_p8 = pnand %p5067_p5, %p160_p7  ;;  %s6523_s25 = smov [#allocation6]  }
  0x13   : > { %s176_s26 = sshll.u32 %s6523_s25, 4  ;;  %s43_s28 = sadd.s32 1, %s6517_s16  ;;  %s177_s26 = int_to_ptr.vmem [resolvable:$true] %s176_s26 }
  0x14   : > { %s8216_s24 = scalar_select %p6606_p8, 1, 0 }
  0x15   : > { %p6152_p9 = pneg %p6606_p8  ;;  %s6345_s4 = scalar_lea.hbm %s8205_s1, 9216 }
  0x16   : > { %p6346_p12 = scmp.ne.s32.totalorder %s8205_s1, %s6345_s4  ;;  %p6352_p5 = scmp.lt.u32.totalorder %s6345_s4, %s8205_s1 }
  0x17   : > { %p6615_p11 = pnand %p6152_p9, %p6586_p1 }
  0x19   : > { %p6347_p13 = pneg %p6615_p11 }
  0x1b   : > { %p6348_p0 = pnand %p6347_p13, %p6346_p12 }
  0x1d   : > { %p6349_p3 = pneg %p6348_p0 }
  0x1f   : > { %p6354_p7 = pnand %p6352_p5, %p6349_p3 }
  0x21   : > { %6357 = shalt.err (!%p6354_p7)
}
  0x22   : > { %s6358_s9 = scalar_lea.vmem %s177_s26, 9216  ;;  %p6366_p1 = scmp.lt.s32.totalorder %s177_s26, %s177_s26 }
  0x23   : > { %p6359_p9 = scmp.ne.s32.totalorder %s177_s26, %s6358_s9  ;;  %p6367_p4 = scmp.lt.s32.totalorder %s6358_s9, %s6358_s9 }
  0x25   : > { %p6361_p10 = pnand %p6359_p9, %p6347_p13  ;;  %p6368_p8 = por %p6367_p4, %p6366_p1 }
  0x27   : > { %p6362_p6 = pneg %p6361_p10 }
  0x29   : > { %p6369_p2 = pnand %p6368_p8, %p6362_p6 }
  0x2b   : > { %6372 = shalt.err (!%p6369_p2)
}
  0x2c   : > { %s6524_s10 = smov 64   ;;  %s6525_s11 = smov 4  }
  0x2d   : > { %6155 = dma.hbm_to_vmem [thread:$0]  (!%p6615_p11), %s8205_s1, 9216, %s177_s26, [#allocation7], %s6524_s10, %s6524_s10, %s6525_s11  }
  0x2e   : > { %p45_p1 = scmp.ge.s32.totalorder %s43_s28, 2  ;;  %s52_s25 = sadd.s32 1, %s6509_s14 }
  0x2f   : > { %p59_p2 = scmp.ne.s32.totalorder %s6509_s14, %s6505_s13  ;;  %p60_p4 = scmp.eq.s32.totalorder %s6521_s17, 0 }
  0x30   : > { %s8268_s28 = smov (%p45_p1, %s43_s28), 0  ;;  %p8218_p8 = scmp.ne.s32.totalorder %s8213_s21, 0 }
  0x31   : > { %p61_p6 = por %p60_p4, %p59_p2  ;;  %s47_s27 = ssub.s32 %s6517_s16, %s8268_s28 }
  0x32   : > { %p6647_p10 = por %p8218_p8, %p59_p2  ;;  %p6168_p12 = scmp.lt.s32.totalorder %s6521_s17, 2 }
  0x33   : > { %p50_p13 = scmp.eq.s32.totalorder %s47_s27, 0  ;;  %s190_s30 = sand.u32 1, %s6509_s14  }
  0x34   : > { %s6139_s4 = smul.u32 216, %s190_s30  ;;  %p6659_p11 = pnand %p6168_p12, %p61_p6 }
  0x35   : > { %s6656_s5 = scalar_select %p50_p13, %s6509_s14, %s52_s25  }
  0x36   : > { %s6140_s26 = smul.u32 3456, %s6517_s16  ;;  %s194_s6 = scalar_lea.vmem [#allocation3], %s6139_s4 }
  0x37   : > { %s202_s7 = sshll.u32 %s194_s6, 4  ;;  %s6670_s19 = scalar_lea.sflag [#allocation4], %s190_s30  ;;  %s6668_s7 = int_to_ptr.vmem [resolvable:$true] %s202_s7 }
  0x38   : > { %s6666_s18 = scalar_lea.hbm %s8204_s0, %s6140_s26  ;;  %p6375_p3 = pneg %p6659_p11 }
  0x39   : > { %s6373_s25 = scalar_lea.hbm %s6666_s18, 3456  ;;  %s6378_s26 = scalar_lea.hbm %s8204_s0, 6912 }
  0x3a   : > { %p6374_p0 = scmp.ne.s32.totalorder %s6666_s18, %s6373_s25  ;;  %p6379_p9 = scmp.lt.u32.totalorder %s6666_s18, %s8204_s0 }
  0x3b   : > { %p6380_p1 = scmp.lt.u32.totalorder %s6378_s26, %s6373_s25  ;;  %p6382_p4 = scmp.lt.u32.totalorder %s6373_s25, %s6666_s18 }
  0x3c   : > { %p6376_p5 = pnand %p6375_p3, %p6374_p0 }
  0x3d   : > { %p6381_p2 = por %p6380_p1, %p6379_p9 }
  0x3e   : > { %p6377_p7 = pneg %p6376_p5 }
  0x3f   : > { %p6383_p6 = por %p6382_p4, %p6381_p2 }
  0x41   : > { %p6384_p8 = pnand %p6383_p6, %p6377_p7 }
  0x43   : > { %6387 = shalt.err (!%p6384_p8)
}
  0x44   : > { %s6388_s30 = scalar_lea.vmem %s6668_s7, 3456  ;;  %s6526_s21 = smov [#allocation3]  }
  0x45   : > { %p6389_p12 = scmp.ne.s32.totalorder %s6668_s7, %s6388_s30  ;;  %s6393_s27 = sshll.u32 %s6526_s21, 4  ;;  %s6394_s27 = int_to_ptr.vmem [resolvable:$false] %s6393_s27 }
  0x46   : > { %s6395_s4 = scalar_lea.vmem %s6394_s27, 6912  ;;  %p6396_p5 = scmp.lt.s32.totalorder %s6668_s7, %s6394_s27 }
  0x47   : > { %p6391_p13 = pnand %p6389_p12, %p6375_p3  ;;  %p6397_p9 = scmp.lt.s32.totalorder %s6395_s4, %s6388_s30 }
  0x49   : > { %p6392_p0 = pneg %p6391_p13  ;;  %p6398_p1 = por %p6397_p9, %p6396_p5 }
  0x4b   : > { %p6399_p2 = pnand %p6398_p1, %p6392_p0 }
  0x4d   : > { %6402 = shalt.err (!%p6399_p2)
}
  0x4e   : > { %6159 = dma.hbm_to_vmem [thread:$0]  (!%p6659_p11), %s6666_s18, 3456, %s6668_s7, %s6670_s19, %s6524_s10, %s6524_s10, %s6525_s11  }
  0x4f   : > { %p8221_p3 = scmp.ne.s32.totalorder %s8216_s24, 0 }
  0x51   : > { %214 = sbr.rel (%p8221_p3) target bundleno = 702 (0x2be), region = 28 }
  0x58   : > { %s6704_s25 = sand.u32 1, %s6505_s13   ;;  %p8222_p7 = scmp.ne.s32.totalorder %s8214_s22, 0 }
  0x59   : > { %s6141_s26 = smul.u32 216, %s6704_s25  ;;  %s217_s6 = scalar_lea.sflag [#allocation4], %s6704_s25 }
  0x5b   : > { %s6708_s9 = scalar_lea.vmem [#allocation3], %s6141_s26 }
  0x5c   : > { %6484 = dma.done.wait (%p8222_p7), %s217_s6, 3456  }
  0x5d   : > { %6486 = vsyncadd (%p8222_p7), %s217_s6, 4294963840  ;;  %p8223_p11 = scmp.ne.s32.totalorder %s8212_s20, 0 }
  0x5f   : > { %6488 = dma.done.wait (%p8223_p11), [#allocation7], 9216  }
  0x60   : > { %6490 = vsyncadd (%p8223_p11), [#allocation7], 4294958080  ;;  %v6225_v0 = vld [vmem:[#allocation6 + $0x40] sm:$0xff]   ;;  %v6227_v2 = vld [vmem:[#allocation6 + $0x48] sm:$0xff]   ;;  %vm482_vm0 = vsmask.f32 3328 }
  0x61   : > { %v6226_v1 = vld [vmem:[#allocation6] sm:$0xff]   ;;  %5603 = vmatprep.subr.bf16.mxu0 %v6225_v0  ;;  %6123 = vmatprep.subr.bf16.mxu1 %v6225_v0  ;;  %v6228_v3 = vld [vmem:[#allocation6 + $0x8] sm:$0xff]   ;;  %v6229_v4 = vld [vmem:[#allocation6 + $0x50] sm:$0xff]   ;;  %vm483_vm1 = vsmask.f32 7440  ;;  %vm1045_vm3 = vcmask 1042432  }
  0x62   : > { %5604 = vmatpush3.bf16.msra.mxu0 %v6226_v1  ;;  %6131 = vmatpush3.bf16.msra.mxu1 %v6226_v1  ;;  %v6230_v5 = vld [vmem:[#allocation6 + $0x10] sm:$0xff]   ;;  %v6231_v6 = vld [vmem:[#allocation6 + $0x58] sm:$0xff]   ;;  %v6233_v8 = vld [vmem:[#allocation6 + $0x60] sm:$0xff]   ;;  %vm1046_vm4 = vcmask 1046532   ;;  %s5074_s20 = sshll.u32 %s6704_s25, 1  ;;  %s5073_s24 = sshll.u32 %s6704_s25, 8 }
  0x63   : > { %5605 = vmatprep.subr.bf16.mxu0 %v6227_v2  ;;  %6124 = vmatprep.subr.bf16.mxu1 %v6227_v2  ;;  %v6232_v7 = vld [vmem:[#allocation6 + $0x18] sm:$0xff]   ;;  %v6234_v9 = vld [vmem:[#allocation6 + $0x20] sm:$0xff]   ;;  %v6235_v10 = vld [vmem:[#allocation6 + $0x68] sm:$0xff]   ;;  %s7960_s22 = scalar_lea.vmem [#allocation9], %s5074_s20  ;;  %s8028_s10 = scalar_lea.vmem [#allocation8], %s5073_s24 }
  0x64   : > { %v434_v11 = vld [vmem:[%s6708_s9] sm:$0xf]  ;;  %v435_v12 = vld [vmem:[%s6708_s9 + $0x4] sm:$0xf]  ;;  %v436_v13 = vld [vmem:[%s6708_s9 + $0x8] sm:$0x1] }
  0x65   : > { %v6236_v14 = vld [vmem:[#allocation6 + $0x28] sm:$0xff]   ;;  %v486_v15 = vshrl.u32 %v434_v11, 16  ;;  %v489_v16 = vshll.u32 %v434_v11, 16  ;;  %v495_v17 = vshll.u32 %v435_v12, 16  ;;  %v499_v18 = vshrl.u32 %v435_v12, 16  ;;  %v6237_v20 = vld [vmem:[#allocation6 + $0x70] sm:$0xff]   ;;  %vm6726_vm2 = vmor %vm482_vm0, %vm483_vm1 }
  0x66   : > { %5606 = vmatpush3.bf16.msra.mxu0 %v6228_v3  ;;  %6132 = vmatpush3.bf16.msra.mxu1 %v6228_v3  ;;  %v470_v19 = vld [vmem:[%s6708_s9 + $0x90] sm:$0xf]  ;;  %v505_v21 = vshll.u32 %v436_v13, 16  ;;  %v471_v22 = vld [vmem:[%s6708_s9 + $0x94] sm:$0xf]  ;;  %v6238_v40 = vld [vmem:[#allocation6 + $0x30] sm:$0xff]  }
  0x67   : > { %5607 = vmatprep.subr.bf16.mxu0 %v6229_v4  ;;  %6125 = vmatprep.subr.bf16.mxu1 %v6229_v4  ;;  %v472_v23 = vld [vmem:[%s6708_s9 + $0x98] sm:$0x1]  ;;  %v774_v24 = vshrl.u32 %v470_v19, 16  ;;  %v488_v25 = vrot.slane %v486_v15, 4  ;;  %v491_v26 = vrot.slane %v489_v16, 5  ;;  %v497_v27 = vrot.slane %v495_v17, 5  ;;  %vm6795_vm5 = vmor %vm1045_vm3, %vm1046_vm4 }
  0x68   : > { %v501_v28 = vrot.slane %v499_v18, 4  ;;  %v507_v29 = vrot.slane %v505_v21, 5  ;;  %v777_v31 = vshll.u32 %v470_v19, 16  ;;  %v783_v32 = vshll.u32 %v471_v22, 16  ;;  %v6239_v44 = vld [vmem:[#allocation6 + $0x78] sm:$0xff]   ;;  %v6243_v54 = vld [vmem:[#allocation6 + $0xc0] sm:$0xff]  }
  0x69   : > { %v776_v30 = vrot.slane %v774_v24, 4  ;;  %v492_v33 = vor.u32 %v491_v26, %v488_v25  ;;  %v787_v35 = vshrl.u32 %v471_v22, 16  ;;  %v793_v36 = vshll.u32 %v472_v23, 16  ;;  %v6240_v50 = vld [vmem:[#allocation6 + $0x38] sm:$0xff]   ;;  %v6241_v56 = vld [vmem:[%s6708_s9] sm:$0xff]   ;;  %v6244_v58 = vld [vmem:[#allocation6 + $0x140] sm:$0xff]  }
  0x6a   : > { %5608 = vmatpush3.bf16.msra.mxu0 %v6230_v5  ;;  %6133 = vmatpush3.bf16.msra.mxu1 %v6230_v5  ;;  %v502_v34 = vor.u32 %v501_v28, %v497_v27  ;;  %v779_v38 = vrot.slane %v777_v31, 5  ;;  %v785_v39 = vrot.slane %v783_v32, 5  ;;  %v6242_v57 = vld [vmem:[%s6708_s9 + $0x90] sm:$0xff]   ;;  %v437_v62 = vld [vmem:[%s6708_s9 + $0xc] sm:$0xf]  ;;  %v6247_v1 = vld [vmem:[#allocation6 + $0xc8] sm:$0xff]  }
  0x6b   : > { %5609 = vmatprep.subr.bf16.mxu0 %v6231_v6  ;;  %6126 = vmatprep.subr.bf16.mxu1 %v6231_v6  ;;  %v493_v41 = vrot.slane %v492_v33, 4  ;;  %v789_v43 = vrot.slane %v787_v35, 4  ;;  %v795_v49 = vrot.slane %v793_v36, 5  ;;  %v6245_v60 = vld [vmem:[#allocation6 + $0x80] sm:$0xff]   ;;  %v510_v3 = vshrl.u32 %v437_v62, 16  ;;  %v6248_v19 = vld [vmem:[#allocation6 + $0x88] sm:$0xff]  }
  0x6c   : > { %v503_v42 = vrot.slane %v502_v34, 4  ;;  %v780_v45 = vor.u32 %v779_v38, %v776_v30  ;;  %v6246_v61 = vld [vmem:[#allocation6 + $0x100] sm:$0xff]   ;;  %v513_v4 = vshll.u32 %v437_v62, 16  ;;  %v475_v13 = vld [vmem:[%s6708_s9 + $0xa4] sm:$0x1]  ;;  %s5602_s11 = sshll.u32 %s6513_s15, 12 }
  0x6d   : > { %v498_v46 = vsel %vm6726_vm2, %v493_v41, %v497_v27  ;;  %v790_v48 = vor.u32 %v789_v43, %v785_v39  ;;  %v438_v63 = vld [vmem:[%s6708_s9 + $0x10] sm:$0xf]  ;;  %v439_v2 = vld [vmem:[%s6708_s9 + $0x14] sm:$0x1]  ;;  %v817_v23 = vshll.u32 %v475_v13, 16  ;;  %v6251_v30 = vld [vmem:[#allocation6 + $0xd0] sm:$0xff]   ;;  %s8113_s19 = scalar_lea.hbm %s8206_s2, %s5602_s11 }
  0x6e   : > { %5610 = vmatpush3.bf16.msra.mxu0 %v6232_v7  ;;  %6134 = vmatpush3.bf16.msra.mxu1 %v6232_v7  ;;  %v508_v47 = vsel %vm6726_vm2, %v503_v42, %v507_v29  ;;  %v781_v52 = vrot.slane %v780_v45, 4  ;;  %v519_v5 = vshll.u32 %v438_v63, 16  ;;  %v523_v6 = vshrl.u32 %v438_v63, 16  ;;  %v6249_v33 = vld [vmem:[%s6708_s9 + $0xc] sm:$0xff]   ;;  %v6254_v43 = vld [vmem:[#allocation6 + $0x148] sm:$0xff]   ;;  %s4916_s7 = sshll.u32 %s8028_s10, 4  ;;  %s8115_s7 = int_to_ptr.vmem [resolvable:$true] %s4916_s7 }
  0x6f   : > { %5611 = vmatprep.subr.bf16.mxu0 %v6233_v8  ;;  %6127 = vmatprep.subr.bf16.mxu1 %v6233_v8  ;;  %v5091_v51 = vcombine.low %v498_v46, %v508_v47  ;;  %v791_v53 = vrot.slane %v790_v48, 4  ;;  %v529_v7 = vshll.u32 %v439_v2, 16  ;;  %v473_v8 = vld [vmem:[%s6708_s9 + $0x9c] sm:$0xf]  ;;  %v515_v11 = vrot.slane %v513_v4, 5  ;;  %v6252_v34 = vld [vmem:[#allocation6 + $0x90] sm:$0xff]  }
  0x70   : > { %v786_v55 = vsel %vm6726_vm2, %v781_v52, %v785_v39  ;;  %v521_v12 = vrot.slane %v519_v5, 5  ;;  %v525_v15 = vrot.slane %v523_v6, 4  ;;  %v801_v17 = vshll.u32 %v473_v8, 16  ;;  %v6250_v45 = vld [vmem:[%s6708_s9 + $0x9c] sm:$0xff]   ;;  %v440_v48 = vld [vmem:[%s6708_s9 + $0x18] sm:$0xf] }
  0x71   : > { %3882 = vmatprep.mubr.bf16.mxu0 %v5091_v51  ;;  %v796_v59 = vsel %vm6726_vm2, %v791_v53, %v795_v49  ;;  %v531_v16 = vrot.slane %v529_v7, 5  ;;  %v819_v29 = vrot.slane %v817_v23, 5  ;;  %v6256_v47 = vld [vmem:[#allocation6 + $0x108] sm:$0xff]   ;;  %v6255_v51 = vld [vmem:[#allocation6 + $0x98] sm:$0xff]   ;;  %v534_v53 = vshrl.u32 %v440_v48, 16  ;;  %s4897_s30 = scalar_lea.sflag [#allocation5], %s6704_s25 }
  0x72   : > { %5612 = vmatpush3.bf16.msra.mxu0 %v6234_v9  ;;  %6135 = vmatpush3.bf16.msra.mxu1 %v6234_v9  ;;  %v5103_v0 = vcombine.low %v786_v55, %v796_v59  ;;  %v474_v9 = vld [vmem:[%s6708_s9 + $0xa0] sm:$0xf]  ;;  %v526_v24 = vor.u32 %v525_v15, %v521_v12  ;;  %v803_v25 = vrot.slane %v801_v17, 5  ;;  %v441_v49 = vld [vmem:[%s6708_s9 + $0x1c] sm:$0xf]  ;;  %s6403_s21 = scalar_lea.vmem %s8115_s7, 4096 }
  0x73   : > { %5613 = vmatprep.subr.bf16.mxu0 %v6235_v10  ;;  %6128 = vmatprep.subr.bf16.mxu1 %v6235_v10  ;;  %v512_v10 = vrot.slane %v510_v3, 4  ;;  %v807_v18 = vshll.u32 %v474_v9, 16  ;;  %v811_v22 = vshrl.u32 %v474_v9, 16  ;;  %v442_v52 = vld [vmem:[%s6708_s9 + $0x20] sm:$0x1]  ;;  %v543_v55 = vshll.u32 %v441_v49, 16  ;;  %p6404_p4 = scmp.ne.s32.totalorder %s8115_s7, %s6403_s21 }
  0x74   : > { %3978 = vmatprep.mubr.bf16.mxu1 %v5103_v0  ;;  %v527_v31 = vrot.slane %v526_v24, 4  ;;  %v477_v59 = vld [vmem:[%s6708_s9 + $0xac] sm:$0xf]  ;;  %v478_v63 = vld [vmem:[%s6708_s9 + $0xb0] sm:$0x1]  ;;  %v6261_v24 = vld [vmem:[#allocation6 + $0xe8] sm:$0xff]  }
  0x75   : > { %v809_v26 = vrot.slane %v807_v18, 5  ;;  %v813_v28 = vrot.slane %v811_v22, 4  ;;  %v545_v62 = vrot.slane %v543_v55, 5  ;;  %v831_v4 = vshll.u32 %v477_v59, 16  ;;  %v6259_v15 = vld [vmem:[#allocation6 + $0xe0] sm:$0xff]   ;;  %v6265_v55 = vld [vmem:[#allocation6 + $0xf0] sm:$0xff]   ;;  %p6405_p6 = pnand %p6404_p4, %p6647_p10 }
  0x76   : > { %5614 = vmatpush3.bf16.msra.mxu0 %v6236_v14  ;;  %6136 = vmatpush3.bf16.msra.mxu1 %v6236_v14  ;;  %v798_v14 = vshrl.u32 %v473_v8, 16  ;;  %v532_v38 = vsel %vm6726_vm2, %v527_v31, %v531_v16  ;;  %v835_v7 = vshrl.u32 %v477_v59, 16  ;;  %v841_v8 = vshll.u32 %v478_v63, 16  ;;  %v6257_v18 = vld [vmem:[%s6708_s9 + $0x18] sm:$0xff]   ;;  %v6258_v31 = vld [vmem:[%s6708_s9 + $0xa8] sm:$0xff]   ;;  %s6528_s27 = smov [#allocation8]  }
  0x77   : > { %5615 = vmatprep.subr.bf16.mxu0 %v6237_v20  ;;  %6129 = vmatprep.subr.bf16.mxu1 %v6237_v20  ;;  %v516_v20 = vor.u32 %v515_v11, %v512_v10  ;;  %v814_v36 = vor.u32 %v813_v28, %v809_v26  ;;  %v833_v11 = vrot.slane %v831_v4, 5  ;;  %v443_v28 = vld [vmem:[%s6708_s9 + $0x24] sm:$0xf]  ;;  %p6406_p8 = pneg %p6405_p6  ;;  %s6407_s4 = sshll.u32 %s6528_s27, 4  ;;  %s6408_s4 = int_to_ptr.vmem [resolvable:$false] %s6407_s4 }
  0x78   : > { %v800_v21 = vrot.slane %v798_v14, 4  ;;  %v837_v13 = vrot.slane %v835_v7, 4  ;;  %v843_v14 = vrot.slane %v841_v8, 5  ;;  %v6267_v7 = vld [vmem:[#allocation6 + $0xb0] sm:$0xff]   ;;  %s6409_s26 = scalar_lea.vmem %s6408_s4, 8192  ;;  %p6410_p12 = scmp.lt.s32.totalorder %s8115_s7, %s6408_s4 }
  0x79   : > { %v517_v27 = vrot.slane %v516_v20, 4  ;;  %v815_v42 = vrot.slane %v814_v36, 4  ;;  %p6411_p13 = scmp.lt.s32.totalorder %s6409_s26, %s6403_s21 }
  0x7a   : > { %5616 = vmatpush3.bf16.msra.mxu0 %v6238_v40  ;;  %6137 = vmatpush3.bf16.msra.mxu1 %v6238_v40  ;;  %v804_v32 = vor.u32 %v803_v25, %v800_v21  ;;  %v6253_v40 = vld [vmem:[#allocation6 + $0xd8] sm:$0xff]   ;;  %v838_v21 = vor.u32 %v837_v13, %v833_v11 }
  0x7b   : > { %5617 = vmatprep.subr.bf16.mxu0 %v6239_v44  ;;  %6130 = vmatprep.subr.bf16.mxu1 %v6239_v44  ;;  %v522_v35 = vsel %vm6726_vm2, %v517_v27, %v521_v12  ;;  %v820_v46 = vsel %vm6726_vm2, %v815_v42, %v819_v29  ;;  %v6262_v27 = vld [vmem:[#allocation6 + $0xa8] sm:$0xff]   ;;  %v444_v29 = vld [vmem:[%s6708_s9 + $0x28] sm:$0xf]  ;;  %p6412_p0 = por %p6411_p13, %p6410_p12 }
  0x7c   : > { %v805_v39 = vrot.slane %v804_v32, 4  ;;  %v5092_v41 = vcombine.low %v522_v35, %v532_v38  ;;  %v445_v32 = vld [vmem:[%s6708_s9 + $0x2c] sm:$0x1]  ;;  %v567_v35 = vshll.u32 %v444_v29, 16  ;;  %v571_v38 = vshrl.u32 %v444_v29, 16 }
  0x7d   : > { %v6269_v13 = vld [vmem:[#allocation6 + $0xf8] sm:$0xff]   ;;  %p6413_p5 = pnand %p6412_p0, %p6406_p8 }
  0x7e   : > { %5618 = vmatpush3.bf16.msra.mxu0 %v6240_v50  ;;  %6138 = vmatpush3.bf16.msra.mxu1 %v6240_v50  ;;  %v810_v44 = vsel %vm6726_vm2, %v805_v39, %v809_v26  ;;  %v839_v26 = vrot.slane %v838_v21, 4  ;;  %v577_v39 = vshll.u32 %v445_v32, 16 }
  0x7f   : > { %5715 = vmatprep.subr.bf16.mxu1 %v6243_v54  ;;  %5827 = vmatprep.subr.bf16.mxu0 %v6244_v58  ;;  %v5104_v50 = vcombine.low %v810_v44, %v820_v46  ;;  %v537_v54 = vshll.u32 %v440_v48, 16  ;;  %v476_v58 = vld [vmem:[%s6708_s9 + $0xa8] sm:$0xf]  ;;  %v481_v46 = vld [vmem:[%s6708_s9 + $0xbc] sm:$0x1] }
  0x80   : > { %v822_v0 = vshrl.u32 %v476_v58, 16  ;;  %v825_v3 = vshll.u32 %v476_v58, 16  ;;  %v844_v36 = vsel %vm6726_vm2, %v839_v26, %v843_v14  ;;  %v579_v48 = vrot.slane %v577_v39, 5 }
  0x81   : > { %3883 = vmatmul.mubr.bf16.vlgmr.msra.gmra.mrb[0].mxu0 %v6241_v56  ;;  %3979 = vmatmul.mubr.bf16.vlgmr.msra.gmra.mrb[0].mxu1 %v6242_v57  ;;  %v547_v56 = vshrl.u32 %v441_v49, 16  ;;  %v553_v57 = vshll.u32 %v442_v52, 16 }
  0x82   : > { %5716 = vmatpush3.bf16.msra.mxu1 %v6245_v60  ;;  %5828 = vmatpush3.bf16.msra.mxu0 %v6246_v61  ;;  %v536_v60 = vrot.slane %v534_v53, 4  ;;  %v539_v61 = vrot.slane %v537_v54, 5  ;;  %v824_v6 = vrot.slane %v822_v0, 4  ;;  %v827_v10 = vrot.slane %v825_v3, 5 }
  0x83   : > { %5717 = vmatprep.subr.bf16.mxu1 %v6247_v1  ;;  %3890 = vmatprep.mubr.bf16.mxu0 %v5092_v41  ;;  %v549_v1 = vrot.slane %v547_v56, 4  ;;  %v555_v2 = vrot.slane %v553_v57, 5  ;;  %v480_v41 = vld [vmem:[%s6708_s9 + $0xb8] sm:$0xf]  ;;  %v865_v54 = vshll.u32 %v481_v46, 16 }
  0x84   : > { %5829 = vmatprep.subr.bf16.mxu0 %v6254_v43  ;;  %3986 = vmatprep.mubr.bf16.mxu1 %v5104_v50  ;;  %v540_v5 = vor.u32 %v539_v61, %v536_v60  ;;  %v828_v17 = vor.u32 %v827_v10, %v824_v6  ;;  %v855_v52 = vshll.u32 %v480_v41, 16  ;;  %v859_v53 = vshrl.u32 %v480_v41, 16  ;;  %v6264_v10 = vld [vmem:[%s6708_s9 + $0xb4] sm:$0xff]  }
  0x85   : > { %v550_v9 = vor.u32 %v549_v1, %v545_v62  ;;  %v6263_v1 = vld [vmem:[%s6708_s9 + $0x24] sm:$0xff]  }
  0x86   : > { %5718 = vmatpush3.bf16.msra.mxu1 %v6248_v19  ;;  %5830 = vmatpush3.bf16.msra.mxu0 %v6256_v47  ;;  %v541_v12 = vrot.slane %v540_v5, 4  ;;  %v6260_v19 = vld [vmem:[#allocation6 + $0xa0] sm:$0xff]   ;;  %v829_v23 = vrot.slane %v828_v17, 4  ;;  %v573_v47 = vrot.slane %v571_v38, 4  ;;  %v857_v60 = vrot.slane %v855_v52, 5  ;;  %v6276_v52 = vld [vmem:[#allocation6 + $0x118] sm:$0xff]  }
  0x87   : > { %5719 = vmatprep.subr.bf16.mxu1 %v6251_v30  ;;  %v551_v16 = vrot.slane %v550_v9, 4  ;;  %v861_v61 = vrot.slane %v859_v53, 4  ;;  %v447_v17 = vld [vmem:[%s6708_s9 + $0x34] sm:$0xf]  ;;  %v449_v53 = vld [vmem:[%s6708_s9 + $0x3c] sm:$0xf] }
  0x88   : > { %v546_v20 = vsel %vm6726_vm2, %v541_v12, %v545_v62  ;;  %v834_v30 = vsel %vm6726_vm2, %v829_v23, %v833_v11  ;;  %v867_v62 = vrot.slane %v865_v54, 5  ;;  %v6268_v11 = vld [vmem:[#allocation6 + $0x110] sm:$0xff]   ;;  %v6273_v38 = vld [vmem:[#allocation6 + $0x1c0] sm:$0xff]  }
  0x89   : > { %3891 = vmatmul.mubr.bf16.gmra.mrb[4].mxu0 %v6249_v33  ;;  %3987 = vmatmul.mubr.bf16.gmra.mrb[4].mxu1 %v6250_v45  ;;  %v556_v22 = vsel %vm6726_vm2, %v551_v16, %v555_v2  ;;  %v558_v33 = vshrl.u32 %v443_v28, 16  ;;  %v5105_v42 = vcombine.low %v834_v30, %v844_v36  ;;  %v569_v45 = vrot.slane %v567_v35, 5  ;;  %v6266_v2 = vld [vmem:[#allocation6 + $0x150] sm:$0xff]   ;;  %v446_v16 = vld [vmem:[%s6708_s9 + $0x30] sm:$0xf] }
  0x8a   : > { %5720 = vmatpush3.bf16.msra.mxu1 %v6252_v34  ;;  %v5093_v25 = vcombine.low %v546_v20, %v556_v22  ;;  %v561_v34 = vshll.u32 %v443_v28, 16  ;;  %v862_v4 = vor.u32 %v861_v61, %v857_v60  ;;  %5831 = vmatprep.subr.bf16.mxu0 %v6266_v2  ;;  %v582_v20 = vshrl.u32 %v446_v16, 16  ;;  %v6271_v23 = vld [vmem:[%s6708_s9 + $0xc] sm:$0xff]   ;;  %v951_v35 = vld [vmem:[%s6708_s9 + $0x8] sm:$0x1] }
  0x8b   : > { %5721 = vmatprep.subr.bf16.mxu1 %v6253_v40  ;;  %v479_v40 = vld [vmem:[%s6708_s9 + $0xb4] sm:$0xf]  ;;  %v560_v43 = vrot.slane %v558_v33, 4  ;;  %3994 = vmatprep.mubr.bf16.mxu1 %v5105_v42  ;;  %v574_v56 = vor.u32 %v573_v47, %v569_v45  ;;  %v585_v21 = vshll.u32 %v446_v16, 16  ;;  %v591_v22 = vshll.u32 %v447_v17, 16 }
  0x8c   : > { %3898 = vmatprep.mubr.bf16.mxu0 %v5093_v25  ;;  %v563_v44 = vrot.slane %v561_v34, 5  ;;  %v846_v49 = vshrl.u32 %v479_v40, 16  ;;  %v849_v50 = vshll.u32 %v479_v40, 16  ;;  %v863_v9 = vrot.slane %v862_v4, 4  ;;  %5832 = vmatpush3.bf16.msra.mxu0 %v6268_v11  ;;  %v950_v34 = vld [vmem:[%s6708_s9 + $0x4] sm:$0xf] }
  0x8d   : > { %v575_v63 = vrot.slane %v574_v56, 4  ;;  %v584_v26 = vrot.slane %v582_v20, 4  ;;  %v593_v28 = vrot.slane %v591_v22, 5  ;;  %v1050_v40 = vrot.slane %v950_v34, 5  ;;  %v6274_v47 = vld [vmem:[#allocation6 + $0x180] sm:$0xff]  }
  0x8e   : > { %5722 = vmatpush3.bf16.msra.mxu1 %v6255_v51  ;;  %v564_v51 = vor.u32 %v563_v44, %v560_v43  ;;  %v848_v57 = vrot.slane %v846_v49, 4  ;;  %v851_v58 = vrot.slane %v849_v50, 5  ;;  %v868_v14 = vsel %vm6726_vm2, %v863_v9, %v867_v62  ;;  %v6272_v44 = vld [vmem:[%s6708_s9 + $0x30] sm:$0xff]   ;;  %v450_v54 = vld [vmem:[%s6708_s9 + $0x40] sm:$0xf] }
  0x8f   : > { %5723 = vmatprep.subr.bf16.mxu1 %v6259_v15  ;;  %v580_v5 = vsel %vm6726_vm2, %v575_v63, %v579_v48  ;;  %v6270_v15 = vld [vmem:[#allocation6 + $0xb8] sm:$0xff]   ;;  %v1053_v41 = vrot.slane %v951_v35, 5  ;;  %v1052_v46 = vrot.slane %v1050_v40, 4  ;;  %v619_v61 = vshrl.u32 %v450_v54, 16  ;;  %v6277_v63 = vld [vmem:[%s6708_s9 + $0x18] sm:$0xff]  }
  0x90   : > { %v565_v59 = vrot.slane %v564_v51, 4  ;;  %v852_v0 = vor.u32 %v851_v58, %v848_v57  ;;  %v6275_v49 = vld [vmem:[#allocation6 + $0x158] sm:$0xff]   ;;  %v451_v57 = vld [vmem:[%s6708_s9 + $0x44] sm:$0x1]  ;;  %v606_v58 = vshrl.u32 %v449_v53, 16 }
  0x91   : > { %3899 = vmatmul.mubr.bf16.gmra.mrb[8].mxu0 %v6257_v18  ;;  %3995 = vmatmul.mubr.bf16.gmra.mrb[8].mxu1 %v6258_v31  ;;  %v949_v31 = vld [vmem:[%s6708_s9] sm:$0xe]  ;;  %v1054_v51 = vsel %vm6795_vm5, %v1052_v46, %v1053_v41  ;;  %v625_v62 = vshll.u32 %v451_v57, 16  ;;  %v952_v4 = vld [vmem:[%s6708_s9 + $0xc] sm:$0xe] }
  0x92   : > { %5724 = vmatpush3.bf16.msra.mxu1 %v6260_v19  ;;  %v570_v3 = vsel %vm6726_vm2, %v565_v59, %v569_v45  ;;  %v853_v6 = vrot.slane %v852_v0, 4  ;;  %v448_v19 = vld [vmem:[%s6708_s9 + $0x38] sm:$0x1]  ;;  %v5107_v36 = vrot.slane %v949_v31, 9  ;;  %5833 = vmatprep.subr.bf16.mxu0 %v6275_v49  ;;  %v609_v59 = vshll.u32 %v449_v53, 16 }
  0x93   : > { %5725 = vmatprep.subr.bf16.mxu1 %v6261_v24  ;;  %v5094_v8 = vcombine.low %v570_v3, %v580_v5  ;;  %v595_v24 = vshrl.u32 %v447_v17, 16  ;;  %v601_v25 = vshll.u32 %v448_v19, 16  ;;  %5834 = vmatpush3.bf16.msra.mxu0 %v6276_v52  ;;  %v608_v0 = vrot.slane %v606_v58, 4  ;;  %v454_v16 = vld [vmem:[%s6708_s9 + $0x50] sm:$0x1]  ;;  %v6284_v58 = vld [vmem:[#allocation6 + $0x188] sm:$0xff]  }
  0x94   : > { %v858_v12 = vsel %vm6726_vm2, %v853_v6, %v857_v60  ;;  %v1051_v45 = vsel %vm6795_vm5, %v5107_v36, %v1050_v40  ;;  %v615_v60 = vshll.u32 %v450_v54, 16  ;;  %v621_v3 = vrot.slane %v619_v61, 4  ;;  %v955_v40 = vld [vmem:[%s6708_s9 + $0x18] sm:$0xe]  ;;  %v956_v41 = vld [vmem:[%s6708_s9 + $0x1c] sm:$0xf] }
  0x95   : > { %3906 = vmatprep.mubr.bf16.mxu0 %v5094_v8  ;;  %v5106_v18 = vcombine.low %v858_v12, %v868_v14  ;;  %v597_v29 = vrot.slane %v595_v24, 4  ;;  %v603_v30 = vrot.slane %v601_v25, 5  ;;  %v5123_v56 = vcombine.low %v1051_v45, %v1054_v51  ;;  %v954_v8 = vld [vmem:[%s6708_s9 + $0x14] sm:$0x1]  ;;  %v453_v14 = vld [vmem:[%s6708_s9 + $0x4c] sm:$0xf] }
  0x96   : > { %5726 = vmatpush3.bf16.msra.mxu1 %v6262_v27  ;;  %v587_v27 = vrot.slane %v585_v21, 5  ;;  %v617_v2 = vrot.slane %v615_v60, 5  ;;  %v627_v6 = vrot.slane %v625_v62, 5  ;;  %v5108_v9 = vrot.slane %v952_v4, 9  ;;  %v6278_v21 = vld [vmem:[%s6708_s9 + $0x3c] sm:$0xff]   ;;  %v6279_v25 = vld [vmem:[%s6708_s9 + $0x24] sm:$0xff]  }
  0x97   : > { %5727 = vmatprep.subr.bf16.mxu1 %v6265_v55  ;;  %4002 = vmatprep.mubr.bf16.mxu1 %v5106_v18  ;;  %v598_v39 = vor.u32 %v597_v29, %v593_v28  ;;  %v1060_v12 = vrot.slane %v954_v8, 5  ;;  %v639_v19 = vshll.u32 %v453_v14, 16  ;;  %v643_v24 = vshrl.u32 %v453_v14, 16  ;;  %v6283_v54 = vld [vmem:[#allocation6 + $0x120] sm:$0xff]   ;;  %v960_v14 = vld [vmem:[%s6708_s9 + $0x2c] sm:$0x1] }
  0x98   : > { %v588_v33 = vor.u32 %v587_v27, %v584_v26  ;;  %v649_v35 = vshll.u32 %v454_v16, 16  ;;  %v5109_v45 = vrot.slane %v955_v40, 9  ;;  %v1064_v46 = vrot.slane %v956_v41, 5  ;;  %v456_v62 = vld [vmem:[%s6708_s9 + $0x58] sm:$0xf] }
  0x99   : > { %3907 = vmatmul.mubr.bf16.gmra.mrb[12].mxu0 %v6263_v1  ;;  %4003 = vmatmul.mubr.bf16.gmra.mrb[12].mxu1 %v6264_v10  ;;  %v599_v43 = vrot.slane %v598_v39, 4  ;;  %v611_v1 = vrot.slane %v609_v59, 5  ;;  %v622_v10 = vor.u32 %v621_v3, %v617_v2  ;;  %v641_v29 = vrot.slane %v639_v19, 5  ;;  %v455_v59 = vld [vmem:[%s6708_s9 + $0x54] sm:$0xf]  ;;  %v6287_v19 = vld [vmem:[#allocation6 + $0x168] sm:$0xff]  }
  0x9a   : > { %5728 = vmatpush3.bf16.msra.mxu1 %v6267_v7  ;;  %4043 = vmatprep.mubr.bf16.mxu1 %v6271_v23  ;;  %v589_v42 = vrot.slane %v588_v33, 4  ;;  %v953_v7 = vld [vmem:[%s6708_s9 + $0x10] sm:$0xf]  ;;  %v645_v34 = vrot.slane %v643_v24, 4  ;;  %v1065_v51 = vsel %vm6795_vm5, %v5109_v45, %v1064_v46  ;;  %v1066_v52 = vrot.slane %v1064_v46, 4  ;;  %v6291_v46 = vld [vmem:[#allocation6 + $0x1d0] sm:$0xff]  }
  0x9b   : > { %5729 = vmatprep.subr.bf16.mxu1 %v6269_v13  ;;  %v604_v50 = vsel %vm6726_vm2, %v599_v43, %v603_v30  ;;  %v612_v5 = vor.u32 %v611_v1, %v608_v0  ;;  %v1057_v11 = vrot.slane %v953_v7, 5  ;;  %v452_v13 = vld [vmem:[%s6708_s9 + $0x48] sm:$0xf]  ;;  %v623_v20 = vrot.slane %v622_v10, 4  ;;  %v6281_v30 = vld [vmem:[#allocation6 + $0x160] sm:$0xff]  }
  0x9c   : > { %v594_v48 = vsel %vm6726_vm2, %v589_v42, %v593_v28  ;;  %v630_v17 = vshrl.u32 %v452_v13, 16  ;;  %v633_v18 = vshll.u32 %v452_v13, 16  ;;  %v957_v42 = vld [vmem:[%s6708_s9 + $0x20] sm:$0x1]  ;;  %5835 = vmatprep.subr.bf16.mxu0 %v6281_v30  ;;  %v646_v43 = vor.u32 %v645_v34, %v641_v29  ;;  %v959_v13 = vld [vmem:[%s6708_s9 + $0x28] sm:$0xf] }
  0x9d   : > { %v5095_v55 = vcombine.low %v594_v48, %v604_v50  ;;  %v1058_v22 = vsel %vm6795_vm5, %v5108_v9, %v1057_v11  ;;  %v1059_v23 = vrot.slane %v1057_v11, 4  ;;  %v628_v31 = vsel %vm6726_vm2, %v623_v20, %v627_v6  ;;  %5836 = vmatpush3.bf16.msra.mxu0 %v6283_v54 }
  0x9e   : > { %5730 = vmatpush3.bf16.msra.mxu1 %v6270_v15  ;;  %v613_v15 = vrot.slane %v612_v5, 4  ;;  %v632_v27 = vrot.slane %v630_v17, 4  ;;  %v635_v28 = vrot.slane %v633_v18, 5  ;;  %v1067_v49 = vrot.slane %v957_v42, 5  ;;  %v6285_v5 = vld [vmem:[%s6708_s9 + $0x30] sm:$0xff]   ;;  %5837 = vmatprep.subr.bf16.mxu0 %v6287_v19  ;;  %v6289_v42 = vld [vmem:[%s6708_s9 + $0x3c] sm:$0xff]  }
  0x9f   : > { %5939 = vmatprep.subr.bf16.mxu1 %v6273_v38  ;;  %3914 = vmatprep.mubr.bf16.mxu0 %v5095_v55  ;;  %v1061_v33 = vsel %vm6795_vm5, %v1059_v23, %v1060_v12  ;;  %v647_v50 = vrot.slane %v646_v43, 4  ;;  %v654_v0 = vshrl.u32 %v455_v59, 16  ;;  %v657_v1 = vshll.u32 %v455_v59, 16  ;;  %v958_v12 = vld [vmem:[%s6708_s9 + $0x24] sm:$0xe]  ;;  %v6286_v23 = vld [vmem:[%s6708_s9 + $0x54] sm:$0xff]  }
  0xa0   : > { %v618_v26 = vsel %vm6726_vm2, %v613_v15, %v617_v2  ;;  %v5124_v38 = vcombine.low %v1058_v22, %v1061_v33  ;;  %v636_v39 = vor.u32 %v635_v28, %v632_v27  ;;  %v1068_v57 = vsel %vm6795_vm5, %v1066_v52, %v1067_v49  ;;  %v459_v28 = vld [vmem:[%s6708_s9 + $0x64] sm:$0xf]  ;;  %v962_v49 = vld [vmem:[%s6708_s9 + $0x34] sm:$0xf]  ;;  %v965_v19 = vld [vmem:[%s6708_s9 + $0x40] sm:$0xf] }
  0xa1   : > { %4044 = vmatmul.mubr.bf16.vlgmr.msra.gmra.mrb[16].mxu1 %v5123_v56  ;;  %3915 = vmatmul.mubr.bf16.gmra.mrb[16].mxu0 %v6272_v44  ;;  %v5096_v36 = vcombine.low %v618_v26, %v628_v31  ;;  %v651_v44 = vrot.slane %v649_v35, 5  ;;  %v6280_v56 = vld [vmem:[%s6708_s9 + $0x48] sm:$0xff]   ;;  %v5125_v61 = vcombine.low %v1065_v51, %v1068_v57  ;;  %v663_v2 = vshll.u32 %v456_v62, 16  ;;  %v458_v26 = vld [vmem:[%s6708_s9 + $0x60] sm:$0xf] }
  0xa2   : > { %5940 = vmatpush3.bf16.msra.mxu1 %v6274_v47  ;;  %4051 = vmatprep.mubr.bf16.mxu1 %v6277_v63  ;;  %v6282_v47 = vld [vmem:[#allocation6 + $0x1c8] sm:$0xff]   ;;  %v637_v48 = vrot.slane %v636_v39, 4  ;;  %v667_v3 = vshrl.u32 %v456_v62, 16  ;;  %v656_v6 = vrot.slane %v654_v0, 4  ;;  %v659_v7 = vrot.slane %v657_v1, 5 }
  0xa3   : > { %3922 = vmatprep.mubr.bf16.mxu0 %v5096_v36  ;;  %5941 = vmatprep.subr.bf16.mxu1 %v6282_v47  ;;  %v652_v55 = vsel %vm6726_vm2, %v647_v50, %v651_v44  ;;  %v457_v63 = vld [vmem:[%s6708_s9 + $0x5c] sm:$0x1]  ;;  %v665_v8 = vrot.slane %v663_v2, 5  ;;  %v5110_v16 = vrot.slane %v958_v12, 9  ;;  %v1071_v17 = vrot.slane %v959_v13, 5  ;;  %v6290_v59 = vld [vmem:[%s6708_s9 + $0x60] sm:$0xff]  }
  0xa4   : > { %v642_v53 = vsel %vm6726_vm2, %v637_v48, %v641_v29  ;;  %v673_v4 = vshll.u32 %v457_v63, 16  ;;  %v669_v9 = vrot.slane %v667_v3, 4  ;;  %v660_v11 = vor.u32 %v659_v7, %v656_v6  ;;  %v460_v29 = vld [vmem:[%s6708_s9 + $0x68] sm:$0x1]  ;;  %v961_v48 = vld [vmem:[%s6708_s9 + $0x30] sm:$0xe] }
  0xa5   : > { %v5097_v60 = vcombine.low %v642_v53, %v652_v55  ;;  %v1074_v18 = vrot.slane %v960_v14, 5  ;;  %v1072_v24 = vsel %vm6795_vm5, %v5110_v16, %v1071_v17  ;;  %v678_v30 = vshrl.u32 %v458_v26, 16  ;;  %v963_v50 = vld [vmem:[%s6708_s9 + $0x38] sm:$0x1]  ;;  %v6292_v55 = vld [vmem:[#allocation6 + $0x190] sm:$0xff]  }
  0xa6   : > { %5942 = vmatpush3.bf16.msra.mxu1 %v6284_v58  ;;  %v675_v10 = vrot.slane %v673_v4, 5  ;;  %v670_v15 = vor.u32 %v669_v9, %v665_v8  ;;  %v661_v20 = vrot.slane %v660_v11, 4  ;;  %v681_v31 = vshll.u32 %v458_v26, 16  ;;  %v461_v62 = vld [vmem:[%s6708_s9 + $0x6c] sm:$0xf] }
  0xa7   : > { %v687_v35 = vshll.u32 %v459_v28, 16  ;;  %v691_v36 = vshrl.u32 %v459_v28, 16  ;;  %v680_v40 = vrot.slane %v678_v30, 4  ;;  %v697_v45 = vshll.u32 %v460_v29, 16  ;;  %5943 = vmatprep.subr.bf16.mxu1 %v6291_v46  ;;  %v462_v0 = vld [vmem:[%s6708_s9 + $0x70] sm:$0xf] }
  0xa8   : > { %v671_v22 = vrot.slane %v670_v15, 4  ;;  %v666_v27 = vsel %vm6726_vm2, %v661_v20, %v665_v8  ;;  %v683_v41 = vrot.slane %v681_v31, 5  ;;  %v5111_v53 = vrot.slane %v961_v48, 9  ;;  %v463_v1 = vld [vmem:[%s6708_s9 + $0x74] sm:$0x1]  ;;  %v6293_v12 = vld [vmem:[%s6708_s9 + $0x48] sm:$0xff]  }
  0xa9   : > { %4052 = vmatmul.mubr.bf16.gmra.mrb[20].mxu1 %v5124_v38  ;;  %3923 = vmatmul.mubr.bf16.gmra.mrb[20].mxu0 %v6278_v21  ;;  %v6288_v21 = vld [vmem:[#allocation6 + $0x128] sm:$0xff]   ;;  %v689_v43 = vrot.slane %v687_v35, 5  ;;  %v693_v44 = vrot.slane %v691_v36, 4  ;;  %v699_v52 = vrot.slane %v697_v45, 5  ;;  %v1078_v54 = vrot.slane %v962_v49, 5  ;;  %v6295_v16 = vld [vmem:[#allocation6 + $0x170] sm:$0xff]  }
  0xaa   : > { %4059 = vmatprep.mubr.bf16.mxu1 %v6279_v25  ;;  %3930 = vmatprep.mubr.bf16.mxu0 %v5097_v60  ;;  %v1073_v25 = vrot.slane %v1071_v17, 4  ;;  %v676_v33 = vsel %vm6726_vm2, %v671_v22, %v675_v10  ;;  %v684_v47 = vor.u32 %v683_v41, %v680_v40  ;;  %v1081_v57 = vrot.slane %v963_v50, 5  ;;  %v966_v20 = vld [vmem:[%s6708_s9 + $0x44] sm:$0x1]  ;;  %v6294_v29 = vld [vmem:[%s6708_s9 + $0x6c] sm:$0xff]   ;;  %v6297_v48 = vld [vmem:[%s6708_s9 + $0x54] sm:$0xff]  }
  0xab   : > { %5838 = vmatpush3.bf16.msra.mxu0 %v6288_v21  ;;  %v5098_v38 = vcombine.low %v666_v27, %v676_v33  ;;  %v694_v51 = vor.u32 %v693_v44, %v689_v43  ;;  %v1079_v60 = vsel %vm6795_vm5, %v5111_v53, %v1078_v54  ;;  %5944 = vmatpush3.bf16.msra.mxu1 %v6292_v55  ;;  %v702_v2 = vshrl.u32 %v461_v62, 16  ;;  %v464_v33 = vld [vmem:[%s6708_s9 + $0x78] sm:$0xf]  ;;  %v465_v35 = vld [vmem:[%s6708_s9 + $0x7c] sm:$0xf] }
  0xac   : > { %v1075_v34 = vsel %vm6795_vm5, %v1073_v25, %v1074_v18  ;;  %v705_v3 = vshll.u32 %v461_v62, 16  ;;  %v711_v6 = vshll.u32 %v462_v0, 16  ;;  %v715_v7 = vshrl.u32 %v462_v0, 16  ;;  %v964_v18 = vld [vmem:[%s6708_s9 + $0x3c] sm:$0xe]  ;;  %v6296_v25 = vld [vmem:[#allocation6 + $0x130] sm:$0xff]   ;;  %5839 = vmatprep.subr.bf16.mxu0 %v6295_v16 }
  0xad   : > { %v5126_v39 = vcombine.low %v1072_v24, %v1075_v34  ;;  %v695_v58 = vrot.slane %v694_v51, 4  ;;  %v704_v10 = vrot.slane %v702_v2, 4  ;;  %v721_v15 = vshll.u32 %v463_v1, 16  ;;  %v466_v36 = vld [vmem:[%s6708_s9 + $0x80] sm:$0x1]  ;;  %v6298_v1 = vld [vmem:[%s6708_s9 + $0x78] sm:$0xff]  }
  0xae   : > { %v707_v11 = vrot.slane %v705_v3, 5  ;;  %v713_v13 = vrot.slane %v711_v6, 5  ;;  %v717_v14 = vrot.slane %v715_v7, 4  ;;  %v1085_v24 = vrot.slane %v965_v19, 5  ;;  %v968_v55 = vld [vmem:[%s6708_s9 + $0x4c] sm:$0xf] }
  0xaf   : > { %v700_v4 = vsel %vm6726_vm2, %v695_v58, %v699_v52  ;;  %v723_v22 = vrot.slane %v721_v15, 5  ;;  %v1088_v27 = vrot.slane %v966_v20, 5  ;;  %5840 = vmatpush3.bf16.msra.mxu0 %v6296_v25  ;;  %v745_v51 = vshll.u32 %v466_v36, 16  ;;  %v6299_v52 = vld [vmem:[#allocation6 + $0x1d8] sm:$0xff]   ;;  %v6303_v19 = vld [vmem:[%s6708_s9 + $0x60] sm:$0xff]   ;;  %v6306_v36 = vld [vmem:[#allocation6 + $0x1e0] sm:$0xff]  }
  0xb0   : > { %v708_v17 = vor.u32 %v707_v11, %v704_v10  ;;  %v718_v21 = vor.u32 %v717_v14, %v713_v13  ;;  %v1087_v31 = vrot.slane %v1085_v24, 4  ;;  %5945 = vmatprep.subr.bf16.mxu1 %v6299_v52 }
  0xb1   : > { %4060 = vmatmul.mubr.bf16.gmra.mrb[24].mxu1 %v5125_v61  ;;  %3931 = vmatmul.mubr.bf16.gmra.mrb[24].mxu0 %v6280_v56  ;;  %v685_v56 = vrot.slane %v684_v47, 4  ;;  %v1080_v61 = vrot.slane %v1078_v54, 4  ;;  %v967_v54 = vld [vmem:[%s6708_s9 + $0x48] sm:$0xe]  ;;  %v747_v58 = vrot.slane %v745_v51, 5 }
  0xb2   : > { %4067 = vmatprep.mubr.bf16.mxu1 %v6285_v5  ;;  %3938 = vmatprep.mubr.bf16.mxu0 %v5098_v38  ;;  %v709_v26 = vrot.slane %v708_v17, 4  ;;  %v719_v28 = vrot.slane %v718_v21, 4  ;;  %v726_v38 = vshrl.u32 %v464_v33, 16  ;;  %v1089_v41 = vsel %vm6795_vm5, %v1087_v31, %v1088_v27  ;;  %v971_v27 = vld [vmem:[%s6708_s9 + $0x58] sm:$0xf] }
  0xb3   : > { %v690_v63 = vsel %vm6726_vm2, %v685_v56, %v689_v43  ;;  %v1082_v5 = vsel %vm6795_vm5, %v1080_v61, %v1081_v57  ;;  %v739_v43 = vshrl.u32 %v465_v35, 16  ;;  %v969_v56 = vld [vmem:[%s6708_s9 + $0x50] sm:$0x1]  ;;  %v1099_v31 = vrot.slane %v971_v27, 5 }
  0xb4   : > { %v5099_v8 = vcombine.low %v690_v63, %v700_v4  ;;  %v5127_v9 = vcombine.low %v1079_v60, %v1082_v5  ;;  %v714_v34 = vsel %vm6726_vm2, %v709_v26, %v713_v13  ;;  %v724_v40 = vsel %vm6726_vm2, %v719_v28, %v723_v22  ;;  %v6300_v61 = vld [vmem:[#allocation6 + $0x198] sm:$0xff]   ;;  %v972_v28 = vld [vmem:[%s6708_s9 + $0x5c] sm:$0x1] }
  0xb5   : > { %v5100_v44 = vcombine.low %v714_v34, %v724_v40  ;;  %v728_v46 = vrot.slane %v726_v38, 4  ;;  %v741_v50 = vrot.slane %v739_v43, 4  ;;  %v1092_v60 = vrot.slane %v968_v55, 5  ;;  %5946 = vmatpush3.bf16.msra.mxu1 %v6300_v61  ;;  %v6301_v5 = vld [vmem:[#allocation6 + $0x178] sm:$0xff]  }
  0xb6   : > { %v1095_v63 = vrot.slane %v969_v56, 5  ;;  %5841 = vmatprep.subr.bf16.mxu0 %v6301_v5  ;;  %v469_v13 = vld [vmem:[%s6708_s9 + $0x8c] sm:$0x1]  ;;  %v970_v26 = vld [vmem:[%s6708_s9 + $0x54] sm:$0xe]  ;;  %5947 = vmatprep.subr.bf16.mxu1 %v6306_v36 }
  0xb7   : > { %v1094_v3 = vrot.slane %v1092_v60, 4  ;;  %v5252_v43 = vld [vmem:[%s6708_s9 + $0x10] sm:$0xf]  ;;  %v5187_v61 = vld [vmem:[%s6708_s9 + $0xc] sm:$0xf] }
  0xb8   : > { %v6308_v56 = vld [vmem:[#allocation6 + $0x1a0] sm:$0xff]  }
  0xb9   : > { %4068 = vmatmul.mubr.bf16.gmra.mrb[28].mxu1 %v5126_v39  ;;  %3939 = vmatmul.mubr.bf16.gmra.mrb[28].mxu0 %v6286_v23  ;;  %v5112_v23 = vrot.slane %v964_v18, 9  ;;  %v729_v39 = vshll.u32 %v464_v33, 16  ;;  %v1096_v7 = vsel %vm6795_vm5, %v1094_v3, %v1095_v63  ;;  %v769_v18 = vshll.u32 %v469_v13, 16 }
  0xba   : > { %4075 = vmatprep.mubr.bf16.mxu1 %v6289_v42  ;;  %3946 = vmatprep.mubr.bf16.mxu0 %v5099_v8  ;;  %v735_v42 = vshll.u32 %v465_v35, 16  ;;  %v6302_v8 = vld [vmem:[#allocation6 + $0x138] sm:$0xff]   ;;  %v1102_v33 = vrot.slane %v972_v28, 5  ;;  %v1437_v3 = vshll.u32 %v5187_v61, 16 }
  0xbb   : > { %v1086_v30 = vsel %vm6795_vm5, %v5112_v23, %v1085_v24  ;;  %v731_v47 = vrot.slane %v729_v39, 5  ;;  %5842 = vmatpush3.bf16.msra.mxu0 %v6302_v8  ;;  %v771_v24 = vrot.slane %v769_v18, 5  ;;  %v5251_v35 = vld [vmem:[%s6708_s9 + $0xc] sm:$0xe]  ;;  %v6304_v39 = vld [vmem:[%s6708_s9 + $0x84] sm:$0xff]   ;;  %5948 = vmatpush3.bf16.msra.mxu1 %v6308_v56 }
  0xbc   : > { %v5128_v45 = vcombine.low %v1086_v30, %v1089_v41  ;;  %v737_v49 = vrot.slane %v735_v42, 5  ;;  %v5114_v30 = vrot.slane %v970_v26, 9  ;;  %v1101_v41 = vrot.slane %v1099_v31, 4  ;;  %v6305_v42 = vld [vmem:[%s6708_s9 + $0x6c] sm:$0xff]   ;;  %v6312_v56 = vld [vmem:[#allocation6 + $0x208] sm:$0xff]  }
  0xbd   : > { %v732_v53 = vor.u32 %v731_v47, %v728_v46  ;;  %v5299_v46 = vrot.slane %v5251_v35, 9  ;;  %v1995_v47 = vrot.slane %v5252_v43, 5  ;;  %v976_v26 = vld [vmem:[%s6708_s9 + $0x6c] sm:$0xe]  ;;  %v978_v35 = vld [vmem:[%s6708_s9 + $0x74] sm:$0x1] }
  0xbe   : > { %v742_v57 = vor.u32 %v741_v50, %v737_v49  ;;  %v1100_v40 = vsel %vm6795_vm5, %v5114_v30, %v1099_v31  ;;  %v6923_v50 = vld [vmem:[#allocation6 + $0x200] sm:$0xff]   ;;  %v1103_v52 = vsel %vm6795_vm5, %v1101_v41, %v1102_v33  ;;  %v5116_v31 = vrot.slane %v976_v26, 9  ;;  %v5192_v43 = vld [vmem:[%s6708_s9 + $0x20] sm:$0x1] }
  0xbf   : > { %v733_v62 = vrot.slane %v732_v53, 4  ;;  %v974_v53 = vld [vmem:[%s6708_s9 + $0x64] sm:$0xf]  ;;  %6075 = vmatprep.subr.bf16.mxu0 %v6923_v50  ;;  %v977_v30 = vld [vmem:[%s6708_s9 + $0x70] sm:$0xf]  ;;  %v1116_v41 = vrot.slane %v978_v35, 5 }
  0xc0   : > { %v743_v0 = vrot.slane %v742_v57, 4  ;;  %v1106_v63 = vrot.slane %v974_v53, 5  ;;  %v1113_v36 = vrot.slane %v977_v30, 5 }
  0xc1   : > { %4076 = vmatmul.mubr.bf16.gmra.mrb[32].mxu1 %v5127_v9  ;;  %3947 = vmatmul.mubr.bf16.gmra.mrb[32].mxu0 %v6290_v59  ;;  %v5113_v59 = vrot.slane %v967_v54, 9  ;;  %v738_v4 = vsel %vm6726_vm2, %v733_v62, %v737_v49  ;;  %v467_v9 = vld [vmem:[%s6708_s9 + $0x84] sm:$0xf]  ;;  %v973_v49 = vld [vmem:[%s6708_s9 + $0x60] sm:$0xe] }
  0xc2   : > { %4083 = vmatprep.mubr.bf16.mxu1 %v6293_v12  ;;  %3954 = vmatprep.mubr.bf16.mxu0 %v5100_v44  ;;  %v748_v6 = vsel %vm6726_vm2, %v743_v0, %v747_v58  ;;  %v468_v12 = vld [vmem:[%s6708_s9 + $0x88] sm:$0xf]  ;;  %v750_v14 = vshrl.u32 %v467_v9, 16  ;;  %v753_v15 = vshll.u32 %v467_v9, 16  ;;  %v5253_v44 = vld [vmem:[%s6708_s9 + $0x14] sm:$0x1]  ;;  %v5130_v58 = vcombine.low %v1100_v40, %v1103_v52 }
  0xc3   : > { %v1093_v2 = vsel %vm6795_vm5, %v5113_v59, %v1092_v60  ;;  %v5101_v10 = vcombine.low %v738_v4, %v748_v6  ;;  %v759_v16 = vshll.u32 %v468_v12, 16  ;;  %v763_v17 = vshrl.u32 %v468_v12, 16  ;;  %v975_v54 = vld [vmem:[%s6708_s9 + $0x68] sm:$0x1]  ;;  %v5188_v62 = vld [vmem:[%s6708_s9 + $0x10] sm:$0xf] }
  0xc4   : > { %v5129_v11 = vcombine.low %v1093_v2, %v1096_v7  ;;  %v752_v20 = vrot.slane %v750_v14, 4  ;;  %v755_v21 = vrot.slane %v753_v15, 5  ;;  %v5115_v55 = vrot.slane %v973_v49, 9  ;;  %v6311_v49 = vld [vmem:[#allocation6 + $0x1e8] sm:$0xff]  }
  0xc5   : > { %v761_v22 = vrot.slane %v759_v16, 5  ;;  %v765_v23 = vrot.slane %v763_v17, 4  ;;  %v1996_v59 = vsel %vm6795_vm5, %v5299_v46, %v1995_v47  ;;  %v1997_v60 = vrot.slane %v1995_v47, 4  ;;  %v6309_v17 = vld [vmem:[%s6708_s9 + $0x78] sm:$0xff]   ;;  %5949 = vmatprep.subr.bf16.mxu1 %v6311_v49 }
  0xc6   : > { %v756_v25 = vor.u32 %v755_v21, %v752_v20  ;;  %v1109_v0 = vrot.slane %v975_v54, 5  ;;  %v1434_v2 = vshrl.u32 %v5187_v61, 16  ;;  %v1443_v5 = vshll.u32 %v5188_v62, 16  ;;  %v5254_v21 = vld [vmem:[%s6708_s9 + $0x18] sm:$0xe] }
  0xc7   : > { %v1447_v6 = vshrl.u32 %v5188_v62, 16  ;;  %v1107_v9 = vsel %vm6795_vm5, %v5115_v55, %v1106_v63  ;;  %v1439_v12 = vrot.slane %v1437_v3, 5  ;;  %v1114_v47 = vsel %vm6795_vm5, %v5116_v31, %v1113_v36  ;;  %v5257_v55 = vld [vmem:[%s6708_s9 + $0x24] sm:$0xe]  ;;  %v5258_v61 = vld [vmem:[%s6708_s9 + $0x28] sm:$0xf] }
  0xc8   : > { %v757_v34 = vrot.slane %v756_v25, 4  ;;  %v1445_v13 = vrot.slane %v1443_v5, 5  ;;  %v5259_v62 = vld [vmem:[%s6708_s9 + $0x2c] sm:$0x1]  ;;  %v979_v3 = vld [vmem:[%s6708_s9 + $0x78] sm:$0xe] }
  0xc9   : > { %4084 = vmatmul.mubr.bf16.gmra.mrb[36].mxu1 %v5128_v45  ;;  %3955 = vmatmul.mubr.bf16.gmra.mrb[36].mxu0 %v6294_v29  ;;  %v766_v29 = vor.u32 %v765_v23, %v761_v22  ;;  %v1449_v14 = vrot.slane %v1447_v6, 4  ;;  %v5256_v23 = vld [vmem:[%s6708_s9 + $0x20] sm:$0x1] }
  0xca   : > { %4091 = vmatprep.mubr.bf16.mxu1 %v6297_v48  ;;  %3962 = vmatprep.mubr.bf16.mxu0 %v5101_v10  ;;  %v762_v45 = vsel %vm6726_vm2, %v757_v34, %v761_v22  ;;  %v1998_v48 = vrot.slane %v5253_v44, 5  ;;  %v1108_v10 = vrot.slane %v1106_v63, 4  ;;  %v5255_v22 = vld [vmem:[%s6708_s9 + $0x1c] sm:$0xf]  ;;  %v6316_v31 = vld [vmem:[#allocation6 + $0x1f0] sm:$0xff]  }
  0xcb   : > { %v767_v38 = vrot.slane %v766_v29, 4  ;;  %v1450_v20 = vor.u32 %v1449_v14, %v1445_v13  ;;  %v2002_v25 = vrot.slane %v5255_v22, 5  ;;  %v2005_v29 = vrot.slane %v5256_v23, 5 }
  0xcc   : > { %v1999_v4 = vsel %vm6795_vm5, %v1997_v60, %v1998_v48  ;;  %v1110_v16 = vsel %vm6795_vm5, %v1108_v10, %v1109_v0  ;;  %v1115_v48 = vrot.slane %v1113_v36, 4  ;;  %v6310_v60 = vld [vmem:[%s6708_s9 + $0x84] sm:$0xff]  }
  0xcd   : > { %v772_v51 = vsel %vm6726_vm2, %v767_v38, %v771_v24  ;;  %v5315_v8 = vcombine.low %v1996_v59, %v1999_v4  ;;  %v5131_v18 = vcombine.low %v1107_v9, %v1110_v16  ;;  %v5300_v24 = vrot.slane %v5254_v21, 9  ;;  %v5190_v38 = vld [vmem:[%s6708_s9 + $0x18] sm:$0xf]  ;;  %v980_v9 = vld [vmem:[%s6708_s9 + $0x7c] sm:$0xf] }
  0xce   : > { %v5102_v57 = vcombine.low %v762_v45, %v772_v51  ;;  %v1451_v28 = vrot.slane %v1450_v20, 4  ;;  %v2004_v34 = vrot.slane %v2002_v25, 4  ;;  %v1458_v44 = vshrl.u32 %v5190_v38, 16  ;;  %v6313_v4 = vld [vmem:[#allocation6 + $0x1a8] sm:$0xff]  }
  0xcf   : > { %v2003_v33 = vsel %vm6795_vm5, %v5300_v24, %v2002_v25  ;;  %v1461_v53 = vshll.u32 %v5190_v38, 16  ;;  %v1477_v59 = vshll.u32 %v5192_v43, 16  ;;  %5950 = vmatpush3.bf16.msra.mxu1 %v6313_v4  ;;  %v6314_v38 = vld [vmem:[%s6708_s9 + $0x90] sm:$0xff]   ;;  %v6317_v4 = vld [vmem:[#allocation6 + $0x210] sm:$0xff]  }
  0xd0   : > { %v2006_v46 = vsel %vm6795_vm5, %v2004_v34, %v2005_v29  ;;  %v1460_v52 = vrot.slane %v1458_v44, 4  ;;  %5951 = vmatprep.subr.bf16.mxu1 %v6316_v31  ;;  %v5260_v44 = vld [vmem:[%s6708_s9 + $0x30] sm:$0xe]  ;;  %v987_v31 = vld [vmem:[%s6708_s9 + $0x98] sm:$0x1] }
  0xd1   : > { %4092 = vmatmul.mubr.bf16.gmra.mrb[40].mxu1 %v5129_v11  ;;  %3963 = vmatmul.mubr.bf16.gmra.mrb[40].mxu0 %v6298_v1  ;;  %v5189_v1 = vld [vmem:[%s6708_s9 + $0x14] sm:$0x1]  ;;  %v1436_v11 = vrot.slane %v1434_v2, 4  ;;  %v5316_v51 = vcombine.low %v2003_v33, %v2006_v46  ;;  %v1463_v0 = vrot.slane %v1461_v53, 5  ;;  %v5301_v2 = vrot.slane %v5257_v55, 9 }
  0xd2   : > { %4099 = vmatprep.mubr.bf16.mxu1 %v6303_v19  ;;  %3970 = vmatprep.mubr.bf16.mxu0 %v5102_v57  ;;  %v1453_v7 = vshll.u32 %v5189_v1, 16  ;;  %v1117_v57 = vsel %vm6795_vm5, %v1115_v48, %v1116_v41  ;;  %v1479_v6 = vrot.slane %v1477_v59, 5  ;;  %v5262_v46 = vld [vmem:[%s6708_s9 + $0x38] sm:$0x1]  ;;  %v5302_v49 = vrot.slane %v5260_v44, 9 }
  0xd3   : > { %v1440_v19 = vor.u32 %v1439_v12, %v1436_v11  ;;  %v5132_v63 = vcombine.low %v1114_v47, %v1117_v57  ;;  %v1464_v10 = vor.u32 %v1463_v0, %v1460_v52  ;;  %v981_v11 = vld [vmem:[%s6708_s9 + $0x80] sm:$0x1]  ;;  %v5117_v12 = vrot.slane %v979_v3, 9  ;;  %v982_v52 = vld [vmem:[%s6708_s9 + $0x84] sm:$0xe] }
  0xd4   : > { %v1455_v15 = vrot.slane %v1453_v7, 5  ;;  %v2009_v7 = vrot.slane %v5258_v61, 5  ;;  %v983_v55 = vld [vmem:[%s6708_s9 + $0x88] sm:$0xf]  ;;  %v5196_v61 = vld [vmem:[%s6708_s9 + $0x30] sm:$0xf] }
  0xd5   : > { %v1441_v27 = vrot.slane %v1440_v19, 4  ;;  %v5195_v19 = vld [vmem:[%s6708_s9 + $0x2c] sm:$0x1]  ;;  %v1465_v20 = vrot.slane %v1464_v10, 4  ;;  %v1127_v0 = vrot.slane %v983_v55, 5  ;;  %v1506_v3 = vshrl.u32 %v5196_v61, 16 }
  0xd6   : > { %v1456_v40 = vsel %vm6726_vm2, %v1451_v28, %v1455_v15  ;;  %v2010_v15 = vsel %vm6795_vm5, %v5301_v2, %v2009_v7  ;;  %v2011_v16 = vrot.slane %v2009_v7, 4  ;;  %v5198_v2 = vld [vmem:[%s6708_s9 + $0x38] sm:$0x1]  ;;  %v1509_v7 = vshll.u32 %v5196_v61, 16  ;;  %v5201_v44 = vld [vmem:[%s6708_s9 + $0x44] sm:$0x1] }
  0xd9   : > { %4100 = vmatmul.mubr.bf16.gmra.mrb[44].mxu1 %v5130_v58  ;;  %3971 = vmatmul.mubr.bf16.gmra.mrb[44].mxu0 %v6304_v39  ;;  %v1446_v39 = vsel %vm6726_vm2, %v1441_v27, %v1445_v13  ;;  %v5193_v13 = vld [vmem:[%s6708_s9 + $0x24] sm:$0xf] }
  0xda   : > { %4107 = vmatprep.mubr.bf16.mxu1 %v6305_v42  ;;  %4204 = vmatprep.mubr.bf16.mxu0 %v5315_v8  ;;  %v5191_v42 = vld [vmem:[%s6708_s9 + $0x1c] sm:$0xf]  ;;  %v5235_v45 = vcombine.low %v1446_v39, %v1456_v40  ;;  %v2012_v8 = vrot.slane %v5259_v62, 5  ;;  %v1482_v23 = vshrl.u32 %v5193_v13, 16  ;;  %v1485_v26 = vshll.u32 %v5193_v13, 16 }
  0xdb   : > { %v1467_v54 = vshll.u32 %v5191_v42, 16  ;;  %v1471_v58 = vshrl.u32 %v5191_v42, 16  ;;  %v1501_v42 = vshll.u32 %v5195_v19, 16  ;;  %v5197_v62 = vld [vmem:[%s6708_s9 + $0x34] sm:$0xf] }
  0xdc   : > { %v2013_v25 = vsel %vm6795_vm5, %v2011_v16, %v2012_v8  ;;  %v1484_v30 = vrot.slane %v1482_v23, 4  ;;  %v1487_v35 = vrot.slane %v1485_v26, 5  ;;  %v1515_v8 = vshll.u32 %v5197_v62, 16  ;;  %v5263_v13 = vld [vmem:[%s6708_s9 + $0x3c] sm:$0xe] }
  0xdd   : > { %v1469_v1 = vrot.slane %v1467_v54, 5  ;;  %v1473_v5 = vrot.slane %v1471_v58, 4  ;;  %v5317_v34 = vcombine.low %v2010_v15, %v2013_v25  ;;  %v1503_v48 = vrot.slane %v1501_v42, 5  ;;  %v5264_v19 = vld [vmem:[%s6708_s9 + $0x40] sm:$0xf] }
  0xde   : > { %v1488_v43 = vor.u32 %v1487_v35, %v1484_v30  ;;  %v2019_v54 = vrot.slane %v5262_v46, 5  ;;  %v1511_v15 = vrot.slane %v1509_v7, 5  ;;  %v1517_v16 = vrot.slane %v1515_v8, 5  ;;  %v5265_v23 = vld [vmem:[%s6708_s9 + $0x44] sm:$0x1] }
  0xdf   : > { %v1474_v14 = vor.u32 %v1473_v5, %v1469_v1  ;;  %v1470_v28 = vsel %vm6726_vm2, %v1465_v20, %v1469_v1  ;;  %v985_v25 = vld [vmem:[%s6708_s9 + $0x90] sm:$0xe]  ;;  %v986_v30 = vld [vmem:[%s6708_s9 + $0x94] sm:$0xf] }
  0xe0   : > { %v1489_v53 = vrot.slane %v1488_v43, 4  ;;  %v5119_v35 = vrot.slane %v985_v25, 9  ;;  %v5200_v43 = vld [vmem:[%s6708_s9 + $0x40] sm:$0xf]  ;;  %v5203_v25 = vld [vmem:[%s6708_s9 + $0x4c] sm:$0xf] }
  0xe1   : > { %4108 = vmatmul.mubr.bf16.gmra.mrb[48].mxu1 %v5131_v18  ;;  %4205 = vmatmul.mubr.bf16.vlgmr.msra.gmra.mrb[48].mxu0 %v5235_v45  ;;  %v5194_v18 = vld [vmem:[%s6708_s9 + $0x28] sm:$0xf]  ;;  %v1475_v24 = vrot.slane %v1474_v14, 4  ;;  %v5261_v45 = vld [vmem:[%s6708_s9 + $0x34] sm:$0xf] }
  0xe2   : > { %4115 = vmatprep.mubr.bf16.mxu1 %v6309_v17  ;;  %6076 = vmatpush3.bf16.msra.mxu0 %v6923_v50  ;;  %v1120_v50 = vrot.slane %v980_v9, 5  ;;  %v1123_v17 = vrot.slane %v981_v11, 5  ;;  %v1491_v27 = vshll.u32 %v5194_v18, 16  ;;  %v1495_v41 = vshrl.u32 %v5194_v18, 16  ;;  %v6318_v9 = vld [vmem:[#allocation6 + $0x1b0] sm:$0xff]  }
  0xe3   : > { %4212 = vmatprep.mubr.bf16.mxu0 %v5316_v51  ;;  %6077 = vmatprep.subr.bf16.mxu0 %v6312_v56  ;;  %v1480_v33 = vsel %vm6726_vm2, %v1475_v24, %v1479_v6  ;;  %v2016_v51 = vrot.slane %v5261_v45, 5  ;;  %v6315_v18 = vld [vmem:[%s6708_s9 + $0x9c] sm:$0xff]   ;;  %v5303_v24 = vrot.slane %v5263_v13, 9 }
  0xe4   : > { %v1121_v21 = vsel %vm6795_vm5, %v5117_v12, %v1120_v50  ;;  %v1122_v22 = vrot.slane %v1120_v50, 4  ;;  %v1493_v36 = vrot.slane %v1491_v27, 5  ;;  %v5236_v39 = vcombine.low %v1470_v28, %v1480_v33  ;;  %5952 = vmatpush3.bf16.msra.mxu1 %v6318_v9 }
  0xe5   : > { %v1497_v47 = vrot.slane %v1495_v41, 4  ;;  %v2017_v58 = vsel %vm6795_vm5, %v5302_v49, %v2016_v51  ;;  %v2018_v59 = vrot.slane %v2016_v51, 4  ;;  %v1129_v12 = vrot.slane %v1127_v0, 4 }
  0xe6   : > { %6078 = vmatpush3.bf16.msra.mxu0 %v6312_v56  ;;  %v1124_v29 = vsel %vm6795_vm5, %v1122_v22, %v1123_v17  ;;  %v984_v56 = vld [vmem:[%s6708_s9 + $0x8c] sm:$0x1]  ;;  %v1508_v50 = vrot.slane %v1506_v3, 4  ;;  %v1519_v17 = vshrl.u32 %v5197_v62, 16  ;;  %v1525_v22 = vshll.u32 %v5198_v2, 16 }
  0xe7   : > { %v5133_v40 = vcombine.low %v1121_v21, %v1124_v29  ;;  %v1498_v57 = vor.u32 %v1497_v47, %v1493_v36  ;;  %v1130_v1 = vrot.slane %v984_v56, 5  ;;  %v2020_v6 = vsel %vm6795_vm5, %v2018_v59, %v2019_v54  ;;  %6079 = vmatprep.subr.bf16.mxu0 %v6317_v4  ;;  %v5266_v2 = vld [vmem:[%s6708_s9 + $0x48] sm:$0xe] }
  0xe8   : > { %v5318_v10 = vcombine.low %v2017_v58, %v2020_v6  ;;  %v1512_v27 = vor.u32 %v1511_v15, %v1508_v50  ;;  %v1521_v28 = vrot.slane %v1519_v17, 4  ;;  %v2023_v29 = vrot.slane %v5264_v19, 5  ;;  %v6319_v58 = vld [vmem:[%s6708_s9 + $0xa8] sm:$0xff]   ;;  %v5268_v6 = vld [vmem:[%s6708_s9 + $0x50] sm:$0x1] }
  0xe9   : > { %4116 = vmatmul.mubr.bf16.gmra.mrb[52].mxu1 %v5132_v63  ;;  %4213 = vmatmul.mubr.bf16.gmra.mrb[52].mxu0 %v5236_v39  ;;  %v1494_v63 = vsel %vm6726_vm2, %v1489_v53, %v1493_v36  ;;  %v1499_v5 = vrot.slane %v1498_v57, 4  ;;  %v1131_v21 = vsel %vm6795_vm5, %v1129_v12, %v1130_v1  ;;  %v1527_v33 = vrot.slane %v1525_v22, 5  ;;  %v6321_v12 = vld [vmem:[#allocation6 + $0x1f8] sm:$0xff]   ;;  %v990_v15 = vld [vmem:[%s6708_s9 + $0xa4] sm:$0x1] }
  0xea   : > { %4123 = vmatprep.mubr.bf16.mxu1 %v6310_v60  ;;  %4220 = vmatprep.mubr.bf16.mxu0 %v5317_v34  ;;  %v5118_v60 = vrot.slane %v982_v52, 9  ;;  %v2026_v34 = vrot.slane %v5265_v23, 5  ;;  %v1134_v36 = vrot.slane %v986_v30, 5  ;;  %v1513_v39 = vrot.slane %v1512_v27, 4  ;;  %v6322_v22 = vld [vmem:[#allocation6 + $0x218] sm:$0xff]  }
  0xeb   : > { %v1504_v14 = vsel %vm6726_vm2, %v1499_v5, %v1503_v48  ;;  %6080 = vmatpush3.bf16.msra.mxu0 %v6317_v4  ;;  %v2024_v41 = vsel %vm6795_vm5, %v5303_v24, %v2023_v29  ;;  %v2025_v42 = vrot.slane %v2023_v29, 4  ;;  %v1137_v47 = vrot.slane %v987_v31, 5  ;;  %v5267_v5 = vld [vmem:[%s6708_s9 + $0x4c] sm:$0xf]  ;;  %5953 = vmatprep.subr.bf16.mxu1 %v6321_v12 }
  0xec   : > { %v1128_v11 = vsel %vm6795_vm5, %v5118_v60, %v1127_v0  ;;  %v5237_v20 = vcombine.low %v1494_v63, %v1504_v14  ;;  %v1135_v45 = vsel %vm6795_vm5, %v5119_v35, %v1134_v36  ;;  %v1136_v46 = vrot.slane %v1134_v36, 4  ;;  %v989_v14 = vld [vmem:[%s6708_s9 + $0xa0] sm:$0xf]  ;;  %6081 = vmatprep.subr.bf16.mxu0 %v6322_v22 }
  0xed   : > { %v5134_v26 = vcombine.low %v1128_v11, %v1131_v21  ;;  %v1518_v49 = vsel %vm6726_vm2, %v1513_v39, %v1517_v16  ;;  %v2027_v52 = vsel %vm6795_vm5, %v2025_v42, %v2026_v34  ;;  %v1539_v57 = vshll.u32 %v5200_v43, 16  ;;  %v988_v11 = vld [vmem:[%s6708_s9 + $0x9c] sm:$0xe]  ;;  %v5202_v21 = vld [vmem:[%s6708_s9 + $0x48] sm:$0xf] }
  0xee   : > { %v5319_v54 = vcombine.low %v2024_v41, %v2027_v52  ;;  %v1138_v55 = vsel %vm6795_vm5, %v1136_v46, %v1137_v47  ;;  %v1543_v62 = vshrl.u32 %v5200_v43, 16  ;;  %v1549_v1 = vshll.u32 %v5201_v44, 16  ;;  %v5269_v39 = vld [vmem:[%s6708_s9 + $0x54] sm:$0xe]  ;;  %v991_v46 = vld [vmem:[%s6708_s9 + $0xa8] sm:$0xe] }
  0xef   : > { %v5135_v60 = vcombine.low %v1135_v45, %v1138_v55  ;;  %v1541_v0 = vrot.slane %v1539_v57, 5  ;;  %v5304_v7 = vrot.slane %v5266_v2, 9  ;;  %v2030_v9 = vrot.slane %v5267_v5, 5  ;;  %6082 = vmatpush3.bf16.msra.mxu0 %v6322_v22  ;;  %v5271_v45 = vld [vmem:[%s6708_s9 + $0x5c] sm:$0x1] }
  0xf0   : > { %v1545_v4 = vrot.slane %v1543_v62, 4  ;;  %v1551_v8 = vrot.slane %v1549_v1, 5  ;;  %v1141_v19 = vrot.slane %v989_v14, 5  ;;  %v1554_v27 = vshrl.u32 %v5202_v21, 16  ;;  %v992_v52 = vld [vmem:[%s6708_s9 + $0xac] sm:$0xf] }
  0xf1   : > { %4124 = vmatmul.mubr.bf16.gmra.mrb[56].mxu1 %v5133_v40  ;;  %4221 = vmatmul.mubr.bf16.gmra.mrb[56].mxu0 %v5237_v20  ;;  %v1522_v40 = vor.u32 %v1521_v28, %v1517_v16  ;;  %v5120_v16 = vrot.slane %v988_v11, 9  ;;  %v2031_v17 = vsel %vm6795_vm5, %v5304_v7, %v2030_v9  ;;  %v1144_v20 = vrot.slane %v990_v15, 5  ;;  %v5207_v5 = vld [vmem:[%s6708_s9 + $0x5c] sm:$0x1] }
  0xf2   : > { %4131 = vmatprep.mubr.bf16.mxu1 %v6314_v38  ;;  %v5199_v38 = vld [vmem:[%s6708_s9 + $0x3c] sm:$0xf]  ;;  %4228 = vmatprep.mubr.bf16.mxu0 %v5318_v10  ;;  %v2033_v10 = vrot.slane %v5268_v6, 5  ;;  %v1546_v13 = vor.u32 %v1545_v4, %v1541_v0  ;;  %v1143_v30 = vrot.slane %v1141_v19, 4  ;;  %v1557_v31 = vshll.u32 %v5202_v21, 16 }
  0xf3   : > { %v1530_v48 = vshrl.u32 %v5199_v38, 16  ;;  %v1523_v51 = vrot.slane %v1522_v40, 4  ;;  %v1533_v53 = vshll.u32 %v5199_v38, 16  ;;  %v1142_v29 = vsel %vm6795_vm5, %v5120_v16, %v1141_v19  ;;  %v5270_v40 = vld [vmem:[%s6708_s9 + $0x58] sm:$0xf] }
  0xf4   : > { %v1547_v24 = vrot.slane %v1546_v13, 4  ;;  %v1556_v36 = vrot.slane %v1554_v27, 4  ;;  %v1563_v38 = vshll.u32 %v5203_v25, 16  ;;  %v1145_v42 = vsel %vm6795_vm5, %v1143_v30, %v1144_v20  ;;  %v5206_v4 = vld [vmem:[%s6708_s9 + $0x58] sm:$0xf]  ;;  %v6324_v13 = vld [vmem:[%s6708_s9 + $0xc0] sm:$0xff]  }
  0xf5   : > { %v1532_v56 = vrot.slane %v1530_v48, 4  ;;  %v1528_v59 = vsel %vm6726_vm2, %v1523_v51, %v1527_v33  ;;  %v1535_v61 = vrot.slane %v1533_v53, 5  ;;  %v6320_v33 = vld [vmem:[%s6708_s9 + $0xb4] sm:$0xff]   ;;  %v1559_v43 = vrot.slane %v1557_v31, 5 }
  0xf6   : > { %v5238_v63 = vcombine.low %v1518_v49, %v1528_v59  ;;  %v1552_v34 = vsel %vm6726_vm2, %v1547_v24, %v1551_v8  ;;  %v1567_v44 = vshrl.u32 %v5203_v25, 16  ;;  %v5136_v47 = vcombine.low %v1142_v29, %v1145_v42  ;;  %v6323_v53 = vld [vmem:[#allocation6 + $0x1b8] sm:$0xff]   ;;  %v5272_v25 = vld [vmem:[%s6708_s9 + $0x60] sm:$0xe] }
  0xf7   : > { %v1536_v3 = vor.u32 %v1535_v61, %v1532_v56  ;;  %v1565_v48 = vrot.slane %v1563_v38, 5  ;;  %v5305_v51 = vrot.slane %v5269_v39, 9  ;;  %v2037_v56 = vrot.slane %v5270_v40, 5  ;;  %5954 = vmatpush3.bf16.msra.mxu1 %v6323_v53  ;;  %v5274_v29 = vld [vmem:[%s6708_s9 + $0x68] sm:$0x1] }
  0xf8   : > { %v1569_v55 = vrot.slane %v1567_v44, 4  ;;  %v2040_v57 = vrot.slane %v5271_v45, 5  ;;  %v1148_v61 = vrot.slane %v992_v52, 5  ;;  %v1591_v21 = vshrl.u32 %v5206_v4, 16  ;;  %v995_v39 = vld [vmem:[%s6708_s9 + $0xb8] sm:$0xf] }
  0xf9   : > { %4132 = vmatmul.mubr.bf16.gmra.mrb[60].mxu1 %v5134_v26  ;;  %4229 = vmatmul.mubr.bf16.gmra.mrb[60].mxu0 %v5238_v63  ;;  %v1537_v50 = vrot.slane %v1536_v3, 4  ;;  %v5204_v26 = vld [vmem:[%s6708_s9 + $0x50] sm:$0x1]  ;;  %v5205_v63 = vld [vmem:[%s6708_s9 + $0x54] sm:$0xf]  ;;  %v2038_v2 = vsel %vm6795_vm5, %v5305_v51, %v2037_v56  ;;  %v2039_v3 = vrot.slane %v2037_v56, 4 }
  0xfa   : > { %4139 = vmatprep.mubr.bf16.mxu1 %v6315_v18  ;;  %4236 = vmatprep.mubr.bf16.mxu0 %v5319_v54  ;;  %v2032_v18 = vrot.slane %v2030_v9, 4  ;;  %v1573_v49 = vshll.u32 %v5204_v26, 16  ;;  %v1560_v54 = vor.u32 %v1559_v43, %v1556_v36  ;;  %v1570_v1 = vor.u32 %v1569_v55, %v1565_v48  ;;  %v6326_v26 = vld [vmem:[#allocation6 + $0x220] sm:$0xff]   ;;  %v5210_v51 = vld [vmem:[%s6708_s9 + $0x68] sm:$0x1] }
  0xfb   : > { %v1542_v23 = vsel %vm6726_vm2, %v1537_v50, %v1541_v0  ;;  %v1150_v7 = vrot.slane %v1148_v61, 4  ;;  %v1578_v8 = vshrl.u32 %v5205_v63, 16  ;;  %v1581_v9 = vshll.u32 %v5205_v63, 16  ;;  %v996_v40 = vld [vmem:[%s6708_s9 + $0xbc] sm:$0x1]  ;;  %6083 = vmatprep.subr.bf16.mxu0 %v6326_v26 }
  0xfc   : > { %v2034_v28 = vsel %vm6795_vm5, %v2032_v18, %v2033_v10  ;;  %v5239_v41 = vcombine.low %v1542_v23, %v1552_v34  ;;  %v1575_v59 = vrot.slane %v1573_v49, 5  ;;  %v1561_v0 = vrot.slane %v1560_v54, 4  ;;  %6084 = vmatpush3.bf16.msra.mxu0 %v6326_v26 }
  0xfd   : > { %v5320_v35 = vcombine.low %v2031_v17, %v2034_v28  ;;  %v1571_v11 = vrot.slane %v1570_v1, 4  ;;  %v2041_v12 = vsel %vm6795_vm5, %v2039_v3, %v2040_v57  ;;  %v1587_v50 = vshll.u32 %v5206_v4, 16  ;;  %v5273_v28 = vld [vmem:[%s6708_s9 + $0x64] sm:$0xf]  ;;  %v5379_v1 = vld [vmem:[%s6708_s9 + $0x18] sm:$0xf] }
  0xfe   : > { %v1566_v10 = vsel %vm6726_vm2, %v1561_v0, %v1565_v48  ;;  %v5321_v14 = vcombine.low %v2038_v2, %v2041_v12  ;;  %v1580_v16 = vrot.slane %v1578_v8, 4  ;;  %v1583_v17 = vrot.slane %v1581_v9, 5  ;;  %v5277_v0 = vld [vmem:[%s6708_s9 + $0x74] sm:$0x1] }
  0xff   : > { %v1576_v18 = vsel %vm6726_vm2, %v1571_v11, %v1575_v59  ;;  %v1589_v20 = vrot.slane %v1587_v50, 5  ;;  %v1597_v24 = vshll.u32 %v5207_v5, 16  ;;  %v1593_v27 = vrot.slane %v1591_v21, 4  ;;  %v5276_v59 = vld [vmem:[%s6708_s9 + $0x70] sm:$0xf] }
 0x100   : > { %v5240_v22 = vcombine.low %v1566_v10, %v1576_v18  ;;  %v1584_v23 = vor.u32 %v1583_v17, %v1580_v16  ;;  %v5306_v30 = vrot.slane %v5272_v25, 9  ;;  %v2047_v34 = vrot.slane %v5274_v29, 5  ;;  %v5381_v11 = vld [vmem:[%s6708_s9 + $0x20] sm:$0x1] }
 0x101   : > { %4140 = vmatmul.mubr.bf16.gmra.mrb[64].mxu1 %v5135_v60  ;;  %4237 = vmatmul.mubr.bf16.gmra.mrb[64].mxu0 %v5239_v41  ;;  %v5121_v60 = vrot.slane %v991_v46, 9  ;;  %v1594_v36 = vor.u32 %v1593_v27, %v1589_v20  ;;  %v1599_v38 = vrot.slane %v1597_v24, 5  ;;  %v1155_v45 = vrot.slane %v995_v39, 5  ;;  %v5208_v46 = vld [vmem:[%s6708_s9 + $0x60] sm:$0xf] }
 0x102   : > { %4147 = vmatprep.mubr.bf16.mxu1 %v6319_v58  ;;  %v993_v58 = vld [vmem:[%s6708_s9 + $0xb0] sm:$0x1]  ;;  %4244 = vmatprep.mubr.bf16.mxu0 %v5320_v35  ;;  %v1585_v31 = vrot.slane %v1584_v23, 4  ;;  %v994_v35 = vld [vmem:[%s6708_s9 + $0xb4] sm:$0xe]  ;;  %v1158_v49 = vrot.slane %v996_v40, 5 }
 0x103   : > { %v1151_v62 = vrot.slane %v993_v58, 5  ;;  %v1149_v6 = vsel %vm6795_vm5, %v5121_v60, %v1148_v61  ;;  %v5122_v41 = vrot.slane %v994_v35, 9  ;;  %v1595_v48 = vrot.slane %v1594_v36, 4  ;;  %v5275_v58 = vld [vmem:[%s6708_s9 + $0x6c] sm:$0xe] }
 0x104   : > { %v1590_v42 = vsel %vm6726_vm2, %v1585_v31, %v1589_v20  ;;  %v1602_v52 = vshrl.u32 %v5208_v46, 16  ;;  %v1605_v53 = vshll.u32 %v5208_v46, 16  ;;  %v1157_v56 = vrot.slane %v1155_v45, 4  ;;  %v5212_v20 = vld [vmem:[%s6708_s9 + $0x70] sm:$0xf] }
 0x105   : > { %v1152_v15 = vsel %vm6795_vm5, %v1150_v7, %v1151_v62  ;;  %v1156_v55 = vsel %vm6795_vm5, %v5122_v41, %v1155_v45  ;;  %v1600_v60 = vsel %vm6726_vm2, %v1595_v48, %v1599_v38  ;;  %v1621_v9 = vshll.u32 %v5210_v51, 16  ;;  %v5213_v39 = vld [vmem:[%s6708_s9 + $0x74] sm:$0x1]  ;;  %v5278_v41 = vld [vmem:[%s6708_s9 + $0x78] sm:$0xe] }
 0x106   : > { %v5137_v19 = vcombine.low %v1149_v6, %v1152_v15  ;;  %v1604_v62 = vrot.slane %v1602_v52, 4  ;;  %v1607_v63 = vrot.slane %v1605_v53, 5  ;;  %v5241_v2 = vcombine.low %v1590_v42, %v1600_v60  ;;  %v5380_v6 = vld [vmem:[%s6708_s9 + $0x1c] sm:$0xf]  ;;  %v5211_v15 = vld [vmem:[%s6708_s9 + $0x6c] sm:$0xf] }
 0x107   : > { %v1159_v3 = vsel %vm6795_vm5, %v1157_v56, %v1158_v49  ;;  %v5307_v10 = vrot.slane %v5275_v58, 9  ;;  %v2051_v50 = vrot.slane %v5276_v59, 5  ;;  %v1623_v17 = vrot.slane %v1621_v9, 5  ;;  %v5279_v46 = vld [vmem:[%s6708_s9 + $0x7c] sm:$0xf] }
 0x108   : > { %v5138_v7 = vcombine.low %v1156_v55, %v1159_v3  ;;  %v1608_v8 = vor.u32 %v1607_v63, %v1604_v62  ;;  %v2382_v18 = vshll.u32 %v5379_v1, 16  ;;  %v2398_v31 = vshll.u32 %v5381_v11, 16  ;;  %v5280_v52 = vld [vmem:[%s6708_s9 + $0x80] sm:$0x1]  ;;  %v5382_v53 = vld [vmem:[%s6708_s9 + $0x24] sm:$0xf] }
 0x109   : > { %4148 = vmatmul.mubr.bf16.gmra.mrb[68].mxu1 %v5136_v47  ;;  %4245 = vmatmul.mubr.bf16.gmra.mrb[68].mxu0 %v5240_v22  ;;  %v5209_v47 = vld [vmem:[%s6708_s9 + $0x64] sm:$0xf]  ;;  %v2052_v22 = vsel %vm6795_vm5, %v5307_v10, %v2051_v50  ;;  %v2053_v23 = vrot.slane %v2051_v50, 4  ;;  %v1629_v40 = vshll.u32 %v5211_v15, 16  ;;  %v1635_v45 = vshll.u32 %v5212_v20, 16 }
 0x10a   : > { %4155 = vmatprep.mubr.bf16.mxu1 %v6320_v33  ;;  %v2044_v33 = vrot.slane %v5273_v28, 5  ;;  %4252 = vmatprep.mubr.bf16.mxu0 %v5321_v14  ;;  %v1611_v57 = vshll.u32 %v5209_v47, 16  ;;  %v1615_v5 = vshrl.u32 %v5209_v47, 16  ;;  %v2379_v14 = vshrl.u32 %v5379_v1, 16  ;;  %v5383_v63 = vld [vmem:[%s6708_s9 + $0x28] sm:$0xf] }
 0x10b   : > { %v1609_v16 = vrot.slane %v1608_v8, 4  ;;  %v2384_v26 = vrot.slane %v2382_v18, 5  ;;  %v2392_v28 = vshrl.u32 %v5380_v6, 16  ;;  %v1631_v51 = vrot.slane %v1629_v40, 5  ;;  %v5384_v8 = vld [vmem:[%s6708_s9 + $0x2c] sm:$0x1] }
 0x10c   : > { %v2045_v43 = vsel %vm6795_vm5, %v5306_v30, %v2044_v33  ;;  %v2046_v44 = vrot.slane %v2044_v33, 4  ;;  %v1613_v4 = vrot.slane %v1611_v57, 5  ;;  %v1617_v12 = vrot.slane %v1615_v5, 4  ;;  %v5214_v50 = vld [vmem:[%s6708_s9 + $0x78] sm:$0xf] }
 0x10d   : > { %v2381_v24 = vrot.slane %v2379_v14, 4  ;;  %v1626_v33 = vshrl.u32 %v5211_v15, 16  ;;  %v2394_v38 = vrot.slane %v2392_v28, 4  ;;  %v1639_v55 = vshrl.u32 %v5212_v20, 16  ;;  %v5385_v40 = vld [vmem:[%s6708_s9 + $0x30] sm:$0xf] }
 0x10e   : > { %v2048_v54 = vsel %vm6795_vm5, %v2046_v44, %v2047_v34  ;;  %v1618_v21 = vor.u32 %v1617_v12, %v1613_v4  ;;  %v1614_v25 = vsel %vm6726_vm2, %v1609_v16, %v1613_v4  ;;  %v6329_v34 = vld [vmem:[#allocation6 + $0x228] sm:$0xff]   ;;  %v1645_v56 = vshll.u32 %v5213_v39, 16 }
 0x10f   : > { %v5322_v61 = vcombine.low %v2045_v43, %v2048_v54  ;;  %v2385_v36 = vor.u32 %v2384_v26, %v2381_v24  ;;  %v2400_v43 = vrot.slane %v2398_v31, 5  ;;  %v1628_v44 = vrot.slane %v1626_v33, 4  ;;  %6085 = vmatprep.subr.bf16.mxu0 %v6329_v34  ;;  %v5282_v33 = vld [vmem:[%s6708_s9 + $0x88] sm:$0xf] }
 0x110   : > { %v1619_v29 = vrot.slane %v1618_v21, 4  ;;  %6086 = vmatpush3.bf16.msra.mxu0 %v6329_v34  ;;  %v1637_v54 = vrot.slane %v1635_v45, 5  ;;  %v5308_v57 = vrot.slane %v5278_v41, 9  ;;  %v2058_v62 = vrot.slane %v5279_v46, 5  ;;  %v5283_v34 = vld [vmem:[%s6708_s9 + $0x8c] sm:$0x1] }
 0x111   : > { %4156 = vmatmul.mubr.bf16.gmra.mrb[72].mxu1 %v5137_v19  ;;  %4253 = vmatmul.mubr.bf16.gmra.mrb[72].mxu0 %v5241_v2  ;;  %v2388_v19 = vshll.u32 %v5380_v6, 16  ;;  %v2386_v48 = vrot.slane %v2385_v36, 4  ;;  %v1632_v60 = vor.u32 %v1631_v51, %v1628_v44  ;;  %v1647_v1 = vrot.slane %v1645_v56, 5 }
 0x112   : > { %4163 = vmatprep.mubr.bf16.mxu1 %v6324_v13  ;;  %v2054_v13 = vrot.slane %v5277_v0, 5  ;;  %4260 = vmatprep.mubr.bf16.mxu0 %v5322_v61  ;;  %v1624_v42 = vsel %vm6726_vm2, %v1619_v29, %v1623_v17  ;;  %v6325_v61 = vld [vmem:[%s6708_s9 + $0x18] sm:$0xff]   ;;  %v1641_v0 = vrot.slane %v1639_v55, 4  ;;  %v2061_v2 = vrot.slane %v5280_v52, 5  ;;  %v5386_v55 = vld [vmem:[%s6708_s9 + $0x34] sm:$0xf] }
 0x113   : > { %v2390_v27 = vrot.slane %v2388_v19, 5  ;;  %v5242_v47 = vcombine.low %v1614_v25, %v1624_v42  ;;  %v2403_v3 = vshrl.u32 %v5382_v53, 16  ;;  %v1633_v5 = vrot.slane %v1632_v60, 4  ;;  %v5215_v17 = vld [vmem:[%s6708_s9 + $0x7c] sm:$0xf] }
 0x114   : > { %v2055_v30 = vsel %vm6795_vm5, %v2053_v23, %v2054_v13  ;;  %v2059_v6 = vsel %vm6795_vm5, %v5308_v57, %v2058_v62  ;;  %v1642_v10 = vor.u32 %v1641_v0, %v1637_v54  ;;  %v2406_v12 = vshll.u32 %v5382_v53, 16 }
 0x115   : > { %v5323_v35 = vcombine.low %v2052_v22, %v2055_v30  ;;  %v2395_v49 = vor.u32 %v2394_v38, %v2390_v27  ;;  %v2391_v58 = vsel %vm6726_vm2, %v2386_v48, %v2390_v27  ;;  %v2405_v11 = vrot.slane %v2403_v3, 4  ;;  %v5216_v22 = vld [vmem:[%s6708_s9 + $0x80] sm:$0x1]  ;;  %v5281_v27 = vld [vmem:[%s6708_s9 + $0x84] sm:$0xe] }
 0x116   : > { %v1638_v13 = vsel %vm6726_vm2, %v1633_v5, %v1637_v54  ;;  %v2412_v15 = vshll.u32 %v5383_v63, 16  ;;  %v2416_v16 = vshrl.u32 %v5383_v63, 16  ;;  %v1643_v18 = vrot.slane %v1642_v10, 4  ;;  %v5387_v63 = vld [vmem:[%s6708_s9 + $0x38] sm:$0x1] }
 0x117   : > { %v2396_v59 = vrot.slane %v2395_v49, 4  ;;  %v2408_v20 = vrot.slane %v2406_v12, 5  ;;  %v2422_v21 = vshll.u32 %v5384_v8, 16  ;;  %v1650_v25 = vshrl.u32 %v5214_v50, 16  ;;  %v6332_v49 = vld [vmem:[#allocation6 + $0x230] sm:$0xff]  }
 0x118   : > { %v2414_v23 = vrot.slane %v2412_v15, 5  ;;  %v2418_v24 = vrot.slane %v2416_v16, 4  ;;  %v1653_v26 = vshll.u32 %v5214_v50, 16  ;;  %v1648_v28 = vsel %vm6726_vm2, %v1643_v18, %v1647_v1  ;;  %6087 = vmatprep.subr.bf16.mxu0 %v6332_v49  ;;  %v5219_v12 = vld [vmem:[%s6708_s9 + $0x8c] sm:$0x1] }
 0x119   : > { %4164 = vmatmul.mubr.bf16.gmra.mrb[76].mxu1 %v5138_v7  ;;  %4261 = vmatmul.mubr.bf16.gmra.mrb[76].mxu0 %v5242_v47  ;;  %v2401_v4 = vsel %vm6726_vm2, %v2396_v59, %v2400_v43  ;;  %v2060_v7 = vrot.slane %v2058_v62, 4  ;;  %v2409_v29 = vor.u32 %v2408_v20, %v2405_v11  ;;  %v2424_v30 = vrot.slane %v2422_v21, 5  ;;  %v5284_v50 = vld [vmem:[%s6708_s9 + $0x90] sm:$0xe] }
 0x11a   : > { %4268 = vmatprep.mubr.bf16.mxu0 %v5323_v35  ;;  %v5427_v9 = vcombine.low %v2391_v58, %v2401_v4  ;;  %v1659_v31 = vshll.u32 %v5215_v17, 16  ;;  %v5243_v35 = vcombine.low %v1638_v13, %v1648_v28  ;;  %v2419_v36 = vor.u32 %v2418_v24, %v2414_v23  ;;  %v6327_v58 = vld [vmem:[%s6708_s9 + $0x24] sm:$0xff]   ;;  %6088 = vmatpush3.bf16.msra.mxu0 %v6332_v49  ;;  %v5220_v49 = vld [vmem:[%s6708_s9 + $0x90] sm:$0xf] }
 0x11b   : > { %v2062_v14 = vsel %vm6795_vm5, %v2060_v7, %v2061_v2  ;;  %v1652_v38 = vrot.slane %v1650_v25, 4  ;;  %v1655_v39 = vrot.slane %v1653_v26, 5  ;;  %v2410_v41 = vrot.slane %v2409_v29, 4  ;;  %v5217_v2 = vld [vmem:[%s6708_s9 + $0x84] sm:$0xf] }
 0x11c   : > { %4365 = vmatprep.mubr.bf16.mxu1 %v5427_v9  ;;  %v5324_v19 = vcombine.low %v2059_v6, %v2062_v14  ;;  %v1661_v42 = vrot.slane %v1659_v31, 5  ;;  %v1663_v43 = vshrl.u32 %v5215_v17, 16  ;;  %v1669_v44 = vshll.u32 %v5216_v22, 16  ;;  %v5218_v7 = vld [vmem:[%s6708_s9 + $0x88] sm:$0xf] }
 0x11d   : > { %v2420_v45 = vrot.slane %v2419_v36, 4  ;;  %v1656_v46 = vor.u32 %v1655_v39, %v1652_v38  ;;  %v5309_v47 = vrot.slane %v5281_v27, 9  ;;  %v2065_v48 = vrot.slane %v5282_v33, 5  ;;  %v5285_v17 = vld [vmem:[%s6708_s9 + $0x94] sm:$0xf] }
 0x11e   : > { %v2415_v51 = vsel %vm6726_vm2, %v2410_v41, %v2414_v23  ;;  %v1665_v52 = vrot.slane %v1663_v43, 4  ;;  %v1671_v53 = vrot.slane %v1669_v44, 5  ;;  %v2068_v54 = vrot.slane %v5283_v34, 5  ;;  %v5286_v26 = vld [vmem:[%s6708_s9 + $0x98] sm:$0x1]  ;;  %v6328_v41 = vld [vmem:[%s6708_s9 + $0x30] sm:$0xff]  }
 0x11f   : > { %v2425_v56 = vsel %vm6726_vm2, %v2420_v45, %v2424_v30  ;;  %v1657_v57 = vrot.slane %v1656_v46, 4  ;;  %v2066_v59 = vsel %vm6795_vm5, %v5309_v47, %v2065_v48  ;;  %v2067_v60 = vrot.slane %v2065_v48, 4  ;;  %v5388_v36 = vld [vmem:[%s6708_s9 + $0x3c] sm:$0xf]  ;;  %v5389_v43 = vld [vmem:[%s6708_s9 + $0x40] sm:$0xf] }
 0x120   : > { %v1666_v62 = vor.u32 %v1665_v52, %v1661_v42  ;;  %v2427_v0 = vshrl.u32 %v5385_v40, 16  ;;  %v2430_v1 = vshll.u32 %v5385_v40, 16  ;;  %v2436_v5 = vshll.u32 %v5386_v55, 16  ;;  %v5390_v48 = vld [vmem:[%s6708_s9 + $0x44] sm:$0x1] }
 0x121   : > { %4366 = vmatmul.mubr.bf16.vlgmr.msra.gmra.mrb[80].mxu1 %v6325_v61  ;;  %4269 = vmatmul.mubr.bf16.gmra.mrb[80].mxu0 %v5243_v35  ;;  %v5428_v61 = vcombine.low %v2415_v51, %v2425_v56  ;;  %v1662_v3 = vsel %vm6726_vm2, %v1657_v57, %v1661_v42  ;;  %v2069_v4 = vsel %vm6795_vm5, %v2067_v60, %v2068_v54  ;;  %v2440_v6 = vshrl.u32 %v5386_v55, 16  ;;  %v5221_v55 = vld [vmem:[%s6708_s9 + $0x94] sm:$0xf] }
 0x122   : > { %4276 = vmatprep.mubr.bf16.mxu0 %v5324_v19  ;;  %v1667_v8 = vrot.slane %v1666_v62, 4  ;;  %v5325_v9 = vcombine.low %v2066_v59, %v2069_v4  ;;  %v2429_v10 = vrot.slane %v2427_v0, 4  ;;  %v2432_v11 = vrot.slane %v2430_v1, 5  ;;  %v6335_v60 = vld [vmem:[#allocation6 + $0x238] sm:$0xff]  }
 0x123   : > { %4373 = vmatprep.mubr.bf16.mxu1 %v5428_v61  ;;  %v2438_v13 = vrot.slane %v2436_v5, 5  ;;  %v2442_v14 = vrot.slane %v2440_v6, 4  ;;  %v2446_v15 = vshll.u32 %v5387_v63, 16  ;;  %v1674_v16 = vshrl.u32 %v5217_v2, 16  ;;  %v5222_v5 = vld [vmem:[%s6708_s9 + $0x98] sm:$0x1]  ;;  %6089 = vmatprep.subr.bf16.mxu0 %v6335_v60 }
 0x124   : > { %v1672_v18 = vsel %vm6726_vm2, %v1667_v8, %v1671_v53  ;;  %v2433_v19 = vor.u32 %v2432_v11, %v2429_v10  ;;  %v1677_v20 = vshll.u32 %v5217_v2, 16  ;;  %v1683_v21 = vshll.u32 %v5218_v7, 16  ;;  %v5287_v10 = vld [vmem:[%s6708_s9 + $0x9c] sm:$0xe]  ;;  %6090 = vmatpush3.bf16.msra.mxu0 %v6335_v60 }
 0x125   : > { %v5244_v22 = vcombine.low %v1662_v3, %v1672_v18  ;;  %v2443_v23 = vor.u32 %v2442_v14, %v2438_v13  ;;  %v2448_v24 = vrot.slane %v2446_v15, 5  ;;  %v1676_v25 = vrot.slane %v1674_v16, 4  ;;  %v5288_v14 = vld [vmem:[%s6708_s9 + $0xa0] sm:$0xf]  ;;  %v5289_v15 = vld [vmem:[%s6708_s9 + $0xa4] sm:$0x1] }
 0x126   : > { %v2434_v27 = vrot.slane %v2433_v19, 4  ;;  %v1679_v28 = vrot.slane %v1677_v20, 5  ;;  %v1685_v29 = vrot.slane %v1683_v21, 5  ;;  %v1687_v30 = vshrl.u32 %v5218_v7, 16  ;;  %v5391_v20 = vld [vmem:[%s6708_s9 + $0x48] sm:$0xf] }
 0x127   : > { %v2444_v31 = vrot.slane %v2443_v23, 4  ;;  %v1693_v33 = vshll.u32 %v5219_v12, 16  ;;  %v5310_v34 = vrot.slane %v5284_v50, 9  ;;  %v2072_v35 = vrot.slane %v5285_v17, 5 }
 0x128   : > { %v2439_v38 = vsel %vm6726_vm2, %v2434_v27, %v2438_v13  ;;  %v1680_v39 = vor.u32 %v1679_v28, %v1676_v25  ;;  %v1689_v40 = vrot.slane %v1687_v30, 4  ;;  %v2075_v42 = vrot.slane %v5286_v26, 5  ;;  %v6330_v27 = vld [vmem:[%s6708_s9 + $0x3c] sm:$0xff]   ;;  %v5392_v30 = vld [vmem:[%s6708_s9 + $0x4c] sm:$0xf] }
 0x129   : > { %4374 = vmatmul.mubr.bf16.gmra.mrb[84].mxu1 %v6327_v58  ;;  %4277 = vmatmul.mubr.bf16.gmra.mrb[84].mxu0 %v5244_v22  ;;  %v2449_v44 = vsel %vm6726_vm2, %v2444_v31, %v2448_v24  ;;  %v1695_v45 = vrot.slane %v1693_v33, 5  ;;  %v2073_v46 = vsel %vm6795_vm5, %v5310_v34, %v2072_v35  ;;  %v2074_v47 = vrot.slane %v2072_v35, 4  ;;  %v5393_v35 = vld [vmem:[%s6708_s9 + $0x50] sm:$0x1] }
 0x12a   : > { %4284 = vmatprep.mubr.bf16.mxu0 %v5325_v9  ;;  %v5429_v51 = vcombine.low %v2439_v38, %v2449_v44  ;;  %v1681_v52 = vrot.slane %v1680_v39, 4  ;;  %v1690_v53 = vor.u32 %v1689_v40, %v1685_v29  ;;  %v2451_v54 = vshrl.u32 %v5388_v36, 16  ;;  %v5223_v38 = vld [vmem:[%s6708_s9 + $0x9c] sm:$0xf] }
 0x12b   : > { %v2076_v56 = vsel %vm6795_vm5, %v2074_v47, %v2075_v42  ;;  %v2454_v57 = vshll.u32 %v5388_v36, 16  ;;  %v2460_v58 = vshll.u32 %v5389_v43, 16  ;;  %v2464_v59 = vshrl.u32 %v5389_v43, 16 }
 0x12c   : > { %4381 = vmatprep.mubr.bf16.mxu1 %v5429_v51  ;;  %v1686_v61 = vsel %vm6726_vm2, %v1681_v52, %v1685_v29  ;;  %v1691_v62 = vrot.slane %v1690_v53, 4  ;;  %v5326_v63 = vcombine.low %v2073_v46, %v2076_v56  ;;  %v2453_v0 = vrot.slane %v2451_v54, 4  ;;  %v5224_v53 = vld [vmem:[%s6708_s9 + $0xa0] sm:$0xf] }
 0x12d   : > { %v2456_v1 = vrot.slane %v2454_v57, 5  ;;  %v2462_v2 = vrot.slane %v2460_v58, 5  ;;  %v2466_v3 = vrot.slane %v2464_v59, 4  ;;  %v2470_v4 = vshll.u32 %v5390_v48, 16  ;;  %v5225_v58 = vld [vmem:[%s6708_s9 + $0xa4] sm:$0x1] }
 0x12e   : > { %v1696_v6 = vsel %vm6726_vm2, %v1691_v62, %v1695_v45  ;;  %v1698_v7 = vshrl.u32 %v5220_v49, 16  ;;  %v1701_v8 = vshll.u32 %v5220_v49, 16  ;;  %v1707_v9 = vshll.u32 %v5221_v55, 16 }
 0x12f   : > { %v5245_v11 = vcombine.low %v1686_v61, %v1696_v6  ;;  %v2457_v12 = vor.u32 %v2456_v1, %v2453_v0  ;;  %v2467_v50 = vor.u32 %v2466_v3, %v2462_v2  ;;  %v2472_v13 = vrot.slane %v2470_v4, 5  ;;  %v5290_v1 = vld [vmem:[%s6708_s9 + $0xa8] sm:$0xe] }
 0x130   : > { %v1700_v16 = vrot.slane %v1698_v7, 4  ;;  %v1703_v17 = vrot.slane %v1701_v8, 5  ;;  %v1709_v18 = vrot.slane %v1707_v9, 5  ;;  %v1711_v19 = vshrl.u32 %v5221_v55, 16  ;;  %v5292_v7 = vld [vmem:[%s6708_s9 + $0xb0] sm:$0x1] }
 0x131   : > { %4382 = vmatmul.mubr.bf16.gmra.mrb[88].mxu1 %v6328_v41  ;;  %4285 = vmatmul.mubr.bf16.gmra.mrb[88].mxu0 %v5245_v11  ;;  %v2458_v21 = vrot.slane %v2457_v12, 4  ;;  %v2468_v22 = vrot.slane %v2467_v50, 4  ;;  %v1717_v23 = vshll.u32 %v5222_v5, 16  ;;  %v5311_v24 = vrot.slane %v5287_v10, 9  ;;  %v5394_v12 = vld [vmem:[%s6708_s9 + $0x54] sm:$0xf] }
 0x132   : > { %4292 = vmatprep.mubr.bf16.mxu0 %v5326_v63  ;;  %v1704_v25 = vor.u32 %v1703_v17, %v1700_v16  ;;  %v1713_v26 = vrot.slane %v1711_v19, 4  ;;  %v2079_v28 = vrot.slane %v5288_v14, 5  ;;  %v2082_v29 = vrot.slane %v5289_v15, 5  ;;  %v5395_v17 = vld [vmem:[%s6708_s9 + $0x58] sm:$0xf] }
 0x133   : > { %v2463_v31 = vsel %vm6726_vm2, %v2458_v21, %v2462_v2  ;;  %v2473_v33 = vsel %vm6726_vm2, %v2468_v22, %v2472_v13  ;;  %v1719_v34 = vrot.slane %v1717_v23, 5  ;;  %v2475_v36 = vshrl.u32 %v5391_v20, 16  ;;  %v5291_v2 = vld [vmem:[%s6708_s9 + $0xac] sm:$0xf] }
 0x134   : > { %v5430_v39 = vcombine.low %v2463_v31, %v2473_v33  ;;  %v1705_v40 = vrot.slane %v1704_v25, 4  ;;  %v1714_v41 = vor.u32 %v1713_v26, %v1709_v18  ;;  %v2080_v42 = vsel %vm6795_vm5, %v5311_v24, %v2079_v28  ;;  %v6331_v22 = vld [vmem:[%s6708_s9 + $0x48] sm:$0xff]  }
 0x135   : > { %v2081_v44 = vrot.slane %v2079_v28, 4  ;;  %v2477_v45 = vrot.slane %v2475_v36, 4  ;;  %v2478_v46 = vshll.u32 %v5391_v20, 16  ;;  %v2484_v47 = vshll.u32 %v5392_v30, 16 }
 0x136   : > { %4389 = vmatprep.mubr.bf16.mxu1 %v5430_v39  ;;  %v1710_v48 = vsel %vm6726_vm2, %v1705_v40, %v1709_v18  ;;  %v1715_v49 = vrot.slane %v1714_v41, 4  ;;  %v2488_v51 = vshrl.u32 %v5392_v30, 16  ;;  %v2494_v52 = vshll.u32 %v5393_v35, 16  ;;  %v5226_v41 = vld [vmem:[%s6708_s9 + $0xa8] sm:$0xf] }
 0x137   : > { %v2083_v55 = vsel %vm6795_vm5, %v2081_v44, %v2082_v29  ;;  %v2480_v56 = vrot.slane %v2478_v46, 5  ;;  %v2486_v57 = vrot.slane %v2484_v47, 5  ;;  %v1722_v59 = vshrl.u32 %v5223_v38, 16 }
 0x138   : > { %v1720_v61 = vsel %vm6726_vm2, %v1715_v49, %v1719_v34  ;;  %v5327_v62 = vcombine.low %v2080_v42, %v2083_v55  ;;  %v2490_v63 = vrot.slane %v2488_v51, 4  ;;  %v2496_v0 = vrot.slane %v2494_v52, 5 }
 0x139   : > { %4390 = vmatmul.mubr.bf16.gmra.mrb[92].mxu1 %v6330_v27  ;;  %v5246_v3 = vcombine.low %v1710_v48, %v1720_v61  ;;  %v2481_v4 = vor.u32 %v2480_v56, %v2477_v45  ;;  %v1724_v5 = vrot.slane %v1722_v59, 4  ;;  %v1725_v6 = vshll.u32 %v5223_v38, 16  ;;  %v5396_v27 = vld [vmem:[%s6708_s9 + $0x5c] sm:$0x1]  ;;  %v5227_v48 = vld [vmem:[%s6708_s9 + $0xac] sm:$0xf] }
 0x13a   : > { %v2491_v8 = vor.u32 %v2490_v63, %v2486_v57  ;;  %v1731_v9 = vshll.u32 %v5224_v53, 16  ;;  %v1735_v10 = vshrl.u32 %v5224_v53, 16  ;;  %v1741_v11 = vshll.u32 %v5225_v58, 16  ;;  %v5228_v56 = vld [vmem:[%s6708_s9 + $0xb0] sm:$0x1] }
 0x13b   : > { %4293 = vmatmul.mubr.bf16.gmra.mrb[92].mxu0 %v5246_v3  ;;  %v2482_v13 = vrot.slane %v2481_v4, 4  ;;  %v1727_v14 = vrot.slane %v1725_v6, 5  ;;  %v5312_v15 = vrot.slane %v5290_v1, 9  ;;  %v2086_v16 = vrot.slane %v5291_v2, 5  ;;  %v5294_v4 = vld [vmem:[%s6708_s9 + $0xb8] sm:$0xf] }
 0x13c   : > { %4300 = vmatprep.mubr.bf16.mxu0 %v5327_v62  ;;  %v2492_v18 = vrot.slane %v2491_v8, 4  ;;  %v1733_v19 = vrot.slane %v1731_v9, 5  ;;  %v1737_v20 = vrot.slane %v1735_v10, 4  ;;  %v1743_v21 = vrot.slane %v1741_v11, 5  ;;  %v5293_v62 = vld [vmem:[%s6708_s9 + $0xb4] sm:$0xe] }
 0x13d   : > { %v2487_v23 = vsel %vm6726_vm2, %v2482_v13, %v2486_v57  ;;  %v1728_v24 = vor.u32 %v1727_v14, %v1724_v5  ;;  %v2087_v25 = vsel %vm6795_vm5, %v5312_v15, %v2086_v16  ;;  %v2088_v26 = vrot.slane %v2086_v16, 4  ;;  %v5295_v5 = vld [vmem:[%s6708_s9 + $0xbc] sm:$0x1]  ;;  %v5397_v10 = vld [vmem:[%s6708_s9 + $0x60] sm:$0xf] }
 0x13e   : > { %v2497_v29 = vsel %vm6726_vm2, %v2492_v18, %v2496_v0  ;;  %v1738_v30 = vor.u32 %v1737_v20, %v1733_v19  ;;  %v2089_v31 = vrot.slane %v5292_v7, 5  ;;  %v2499_v33 = vshrl.u32 %v5394_v12, 16  ;;  %v5398_v16 = vld [vmem:[%s6708_s9 + $0x64] sm:$0xf] }
 0x13f   : > { %v5431_v36 = vcombine.low %v2487_v23, %v2497_v29  ;;  %v1729_v38 = vrot.slane %v1728_v24, 4  ;;  %v2502_v39 = vshll.u32 %v5394_v12, 16  ;;  %v2508_v40 = vshll.u32 %v5395_v17, 16 }
 0x140   : > { %v1739_v44 = vrot.slane %v1738_v30, 4  ;;  %v2090_v45 = vsel %vm6795_vm5, %v2088_v26, %v2089_v31  ;;  %v2501_v46 = vrot.slane %v2499_v33, 4  ;;  %v2512_v47 = vshrl.u32 %v5395_v17, 16  ;;  %v6333_v30 = vld [vmem:[%s6708_s9 + $0x54] sm:$0xff]  }
 0x141   : > { %4397 = vmatprep.mubr.bf16.mxu1 %v5431_v36  ;;  %v1734_v51 = vsel %vm6726_vm2, %v1729_v38, %v1733_v19  ;;  %v5328_v52 = vcombine.low %v2087_v25, %v2090_v45  ;;  %v2504_v53 = vrot.slane %v2502_v39, 5  ;;  %v2510_v55 = vrot.slane %v2508_v40, 5 }
 0x142   : > { %v1744_v57 = vsel %vm6726_vm2, %v1739_v44, %v1743_v21  ;;  %4398 = vmatmul.mubr.bf16.gmra.mrb[96].mxu1 %v6331_v22  ;;  %v2514_v58 = vrot.slane %v2512_v47, 4  ;;  %v2518_v59 = vshll.u32 %v5396_v27, 16  ;;  %v1746_v61 = vshrl.u32 %v5226_v41, 16 }
 0x143   : > { %v5247_v0 = vcombine.low %v1734_v51, %v1744_v57  ;;  %v2505_v1 = vor.u32 %v2504_v53, %v2501_v46  ;;  %v1749_v2 = vshll.u32 %v5226_v41, 16  ;;  %v1755_v3 = vshll.u32 %v5227_v48, 16  ;;  %v5399_v41 = vld [vmem:[%s6708_s9 + $0x68] sm:$0x1]  ;;  %v5229_v53 = vld [vmem:[%s6708_s9 + $0xb4] sm:$0xf] }
 0x144   : > { %v2515_v6 = vor.u32 %v2514_v58, %v2510_v55  ;;  %v2520_v7 = vrot.slane %v2518_v59, 5  ;;  %v1748_v8 = vrot.slane %v1746_v61, 4  ;;  %v1759_v9 = vshrl.u32 %v5227_v48, 16  ;;  %v5230_v61 = vld [vmem:[%s6708_s9 + $0xb8] sm:$0xf] }
 0x145   : > { %4301 = vmatmul.mubr.bf16.gmra.mrb[96].mxu0 %v5247_v0  ;;  %v2506_v12 = vrot.slane %v2505_v1, 4  ;;  %v1751_v13 = vrot.slane %v1749_v2, 5  ;;  %v1757_v14 = vrot.slane %v1755_v3, 5  ;;  %v1765_v15 = vshll.u32 %v5228_v56, 16  ;;  %v5231_v3 = vld [vmem:[%s6708_s9 + $0xbc] sm:$0x1] }
 0x146   : > { %4308 = vmatprep.mubr.bf16.mxu0 %v5328_v52  ;;  %v2516_v17 = vrot.slane %v2515_v6, 4  ;;  %v1761_v18 = vrot.slane %v1759_v9, 4  ;;  %v5313_v19 = vrot.slane %v5293_v62, 9  ;;  %v2093_v20 = vrot.slane %v5294_v4, 5 }
 0x147   : > { %v2511_v21 = vsel %vm6726_vm2, %v2506_v12, %v2510_v55  ;;  %v1752_v22 = vor.u32 %v1751_v13, %v1748_v8  ;;  %v1767_v23 = vrot.slane %v1765_v15, 5  ;;  %v2096_v24 = vrot.slane %v5295_v5, 5 }
 0x148   : > { %v2521_v27 = vsel %vm6726_vm2, %v2516_v17, %v2520_v7  ;;  %v1762_v29 = vor.u32 %v1761_v18, %v1757_v14  ;;  %v2094_v31 = vsel %vm6795_vm5, %v5313_v19, %v2093_v20  ;;  %v2095_v33 = vrot.slane %v2093_v20, 4  ;;  %v5297_v20 = vld [vmem:[%s6708_s9 + $0xc4] sm:$0xf] }
 0x149   : > { %v5432_v39 = vcombine.low %v2511_v21, %v2521_v27  ;;  %v1753_v40 = vrot.slane %v1752_v22, 4  ;;  %v2523_v44 = vshrl.u32 %v5397_v10, 16  ;;  %v2526_v45 = vshll.u32 %v5397_v10, 16  ;;  %v5298_v27 = vld [vmem:[%s6708_s9 + $0xc8] sm:$0x1] }
 0x14a   : > { %v1763_v47 = vrot.slane %v1762_v29, 4  ;;  %v2097_v48 = vsel %vm6795_vm5, %v2095_v33, %v2096_v24  ;;  %v2532_v51 = vshll.u32 %v5398_v16, 16  ;;  %v2536_v52 = vshrl.u32 %v5398_v16, 16 }
 0x14b   : > { %4405 = vmatprep.mubr.bf16.mxu1 %v5432_v39  ;;  %v1758_v56 = vsel %vm6726_vm2, %v1753_v40, %v1757_v14  ;;  %v5329_v57 = vcombine.low %v2094_v31, %v2097_v48  ;;  %v2525_v58 = vrot.slane %v2523_v44, 4  ;;  %v2528_v59 = vrot.slane %v2526_v45, 5  ;;  %v5296_v14 = vld [vmem:[%s6708_s9 + $0xc0] sm:$0xe]  ;;  %v5400_v40 = vld [vmem:[%s6708_s9 + $0x6c] sm:$0xf] }
 0x14c   : > { %v1768_v62 = vsel %vm6726_vm2, %v1763_v47, %v1767_v23  ;;  %4406 = vmatmul.mubr.bf16.gmra.mrb[100].mxu1 %v6333_v30  ;;  %v2534_v0 = vrot.slane %v2532_v51, 5  ;;  %v2538_v1 = vrot.slane %v2536_v52, 4  ;;  %v2542_v2 = vshll.u32 %v5399_v41, 16  ;;  %v6334_v45 = vld [vmem:[%s6708_s9 + $0x60] sm:$0xff]  }
 0x14d   : > { %v5248_v5 = vcombine.low %v1758_v56, %v1768_v62  ;;  %v2529_v6 = vor.u32 %v2528_v59, %v2525_v58  ;;  %v1770_v7 = vshrl.u32 %v5229_v53, 16  ;;  %v1773_v8 = vshll.u32 %v5229_v53, 16  ;;  %v5402_v58 = vld [vmem:[%s6708_s9 + $0x74] sm:$0x1] }
 0x14e   : > { %v2539_v9 = vor.u32 %v2538_v1, %v2534_v0  ;;  %v2544_v10 = vrot.slane %v2542_v2, 5  ;;  %v1779_v12 = vshll.u32 %v5230_v61, 16  ;;  %v1783_v13 = vshrl.u32 %v5230_v61, 16  ;;  %v5233_v2 = vld [vmem:[%s6708_s9 + $0xc4] sm:$0xf] }
 0x14f   : > { %4309 = vmatmul.mubr.bf16.gmra.mrb[100].mxu0 %v5248_v5  ;;  %v2530_v16 = vrot.slane %v2529_v6, 4  ;;  %v1772_v17 = vrot.slane %v1770_v7, 4  ;;  %v1775_v18 = vrot.slane %v1773_v8, 5  ;;  %v1789_v19 = vshll.u32 %v5231_v3, 16 }
 0x150   : > { %4316 = vmatprep.mubr.bf16.mxu0 %v5329_v57  ;;  %v2540_v21 = vrot.slane %v2539_v9, 4  ;;  %v1781_v22 = vrot.slane %v1779_v12, 5  ;;  %v1785_v23 = vrot.slane %v1783_v13, 4  ;;  %v5314_v56 = vrot.slane %v5296_v14, 9  ;;  %v5234_v14 = vld [vmem:[%s6708_s9 + $0xc8] sm:$0x1] }
 0x151   : > { %v2535_v30 = vsel %vm6726_vm2, %v2530_v16, %v2534_v0  ;;  %v1776_v31 = vor.u32 %v1775_v18, %v1772_v17  ;;  %v1791_v33 = vrot.slane %v1789_v19, 5  ;;  %v2100_v57 = vrot.slane %v5297_v20, 5 }
 0x152   : > { %v2103_v61 = vrot.slane %v5298_v27, 5  ;;  %v2547_v62 = vshrl.u32 %v5400_v40, 16  ;;  %v2566_v13 = vshll.u32 %v5402_v58, 16  ;;  %v1803_v27 = vshll.u32 %v5233_v2, 16 }
 0x153   : > { %v1777_v53 = vrot.slane %v1776_v31, 4  ;;  %v2102_v0 = vrot.slane %v2100_v57, 4  ;;  %v5403_v31 = vld [vmem:[%s6708_s9 + $0x78] sm:$0xf] }
 0x154   : > { %v7195_v43 = vpop.f32.mrb[0].mxu0  ;;  %v7200_v54 = vpop.f32.mrb[0].mxu1  ;;  %v2549_v5 = vrot.slane %v2547_v62, 4 }
 0x155   : > { %v7205_v60 = vpop.f32.mrb[1].mxu0  ;;  %v7213_v50 = vpop.f32.mrb[1].mxu1 }
 0x156   : > { %v7222_v28 = vpop.f32.mrb[2].mxu0  ;;  %v7226_v34 = vpop.f32.mrb[2].mxu1  ;;  %v7289_v24 = vadd.f32 %v7205_v60, %v7195_v43  ;;  %v7298_v39 = vadd.f32 %v7213_v50, %v7200_v54  ;;  %v2545_v43 = vsel %vm6726_vm2, %v2540_v21, %v2544_v10  ;;  %v1786_v60 = vor.u32 %v1785_v23, %v1781_v22  ;;  %v5401_v50 = vld [vmem:[%s6708_s9 + $0x70] sm:$0xf] }
 0x157   : > { %v7228_v35 = vpop.f32.mrb[3].mxu0  ;;  %v7231_v42 = vpop.f32.mrb[3].mxu1  ;;  %v5433_v52 = vcombine.low %v2535_v30, %v2545_v43  ;;  %v2556_v1 = vshll.u32 %v5401_v50, 16  ;;  %v2560_v7 = vshrl.u32 %v5401_v50, 16  ;;  %v2104_v10 = vsel %vm6795_vm5, %v2102_v0, %v2103_v61  ;;  %v5404_v61 = vld [vmem:[%s6708_s9 + $0x7c] sm:$0xf] }
 0x158   : > { %8228 = vst [vmem:[#allocation15_spill] sm:$0xff] %v7298_v39  ;;  %v7310_v47 = vadd.f32 %v7228_v35, %v7222_v28  ;;  %v7314_v54 = vadd.f32 %v7231_v42, %v7226_v34  ;;  %v1787_v59 = vrot.slane %v1786_v60, 4  ;;  %v2550_v28 = vshll.u32 %v5400_v40, 16  ;;  %v5232_v35 = vld [vmem:[%s6708_s9 + $0xc0] sm:$0xf] }
 0x159   : > { %4413 = vmatprep.mubr.bf16.mxu1 %v5433_v52  ;;  %v1782_v34 = vsel %vm6726_vm2, %v1777_v53, %v1781_v22  ;;  %v2101_v42 = vsel %vm6795_vm5, %v5314_v56, %v2100_v57  ;;  %v2558_v12 = vrot.slane %v2556_v1, 5  ;;  %v2562_v18 = vrot.slane %v2560_v7, 4  ;;  %v6336_v7 = vld [vmem:[%s6708_s9 + $0x6c] sm:$0xff]  }
 0x15a   : > { %8229 = vst [vmem:[#allocation16_spill] sm:$0xff] %v7314_v54  ;;  %v1792_v3 = vsel %vm6726_vm2, %v1787_v59, %v1791_v33  ;;  %4414 = vmatmul.mubr.bf16.gmra.mrb[104].mxu1 %v6334_v45  ;;  %v2552_v6 = vrot.slane %v2550_v28, 5  ;;  %v5330_v16 = vcombine.low %v2101_v42, %v2104_v10  ;;  %v1794_v19 = vshrl.u32 %v5232_v35, 16  ;;  %v5445_v10 = vld [vmem:[%s6708_s9 + $0x20] sm:$0x1] }
 0x15b   : > { %v5249_v9 = vcombine.low %v1782_v34, %v1792_v3  ;;  %v2568_v22 = vrot.slane %v2566_v13, 5  ;;  %v1797_v23 = vshll.u32 %v5232_v35, 16  ;;  %v1807_v30 = vshrl.u32 %v5233_v2, 16  ;;  %v5405_v2 = vld [vmem:[%s6708_s9 + $0x80] sm:$0x1] }
 0x15c   : > { %v7236_v49 = vpop.f32.mrb[4].mxu0  ;;  %v7244_v63 = vpop.f32.mrb[4].mxu1  ;;  %v2553_v17 = vor.u32 %v2552_v6, %v2549_v5  ;;  %v2563_v60 = vor.u32 %v2562_v18, %v2558_v12  ;;  %v1796_v45 = vrot.slane %v1794_v19, 4  ;;  %v1813_v50 = vshll.u32 %v5234_v14, 16  ;;  %v5443_v3 = vld [vmem:[%s6708_s9 + $0x18] sm:$0xe] }
 0x15d   : > { %v7249_v11 = vpop.f32.mrb[5].mxu0  ;;  %v7254_v25 = vpop.f32.mrb[5].mxu1  ;;  %4317 = vmatmul.mubr.bf16.gmra.mrb[104].mxu0 %v5249_v9  ;;  %v1799_v56 = vrot.slane %v1797_v23, 5  ;;  %v1805_v57 = vrot.slane %v1803_v27, 5  ;;  %v1809_v58 = vrot.slane %v1807_v30, 4  ;;  %v2580_v9 = vshll.u32 %v5404_v61, 16 }
 0x15e   : > { %v7256_v26 = vpop.f32.mrb[6].mxu0  ;;  %v7263_v36 = vpop.f32.mrb[6].mxu1  ;;  %4324 = vmatprep.mubr.bf16.mxu0 %v5330_v16  ;;  %v2554_v43 = vrot.slane %v2553_v17, 4  ;;  %v7350_v59 = vadd.f32 %v7249_v11, %v7236_v49  ;;  %v2564_v35 = vrot.slane %v2563_v60, 4  ;;  %v1815_v34 = vrot.slane %v1813_v50, 5 }
 0x15f   : > { %v7265_v38 = vpop.f32.mrb[7].mxu0  ;;  %v7268_v46 = vpop.f32.mrb[7].mxu1  ;;  %v7359_v42 = vadd.f32 %v7254_v25, %v7244_v63  ;;  %v1800_v0 = vor.u32 %v1799_v56, %v1796_v45  ;;  %v1810_v1 = vor.u32 %v1809_v58, %v1805_v57  ;;  %v5444_v5 = vld [vmem:[%s6708_s9 + $0x1c] sm:$0xf]  ;;  %v2571_v63 = vshrl.u32 %v5403_v31, 16 }
 0x160   : > { %v2559_v28 = vsel %vm6726_vm2, %v2554_v43, %v2558_v12  ;;  %v7363_v49 = vadd.f32 %v7265_v38, %v7256_v26  ;;  %v7367_v11 = vadd.f32 %v7268_v46, %v7263_v36  ;;  %v2569_v6 = vsel %vm6726_vm2, %v2564_v35, %v2568_v22  ;;  %v5446_v12 = vld [vmem:[%s6708_s9 + $0x24] sm:$0xe]  ;;  %v5447_v18 = vld [vmem:[%s6708_s9 + $0x28] sm:$0xf]  ;;  %v5448_v30 = vld [vmem:[%s6708_s9 + $0x2c] sm:$0x1] }
 0x161   : > { %8230 = vst [vmem:[#allocation17_spill] sm:$0xff] %v7359_v42  ;;  %v2574_v25 = vshll.u32 %v5403_v31, 16  ;;  %v5434_v26 = vcombine.low %v2559_v28, %v2569_v6  ;;  %v1801_v38 = vrot.slane %v1800_v0, 4  ;;  %v1811_v13 = vrot.slane %v1810_v1, 4  ;;  %v5406_v35 = vld [vmem:[%s6708_s9 + $0x84] sm:$0xf] }
 0x162   : > { %8231 = vst [vmem:[#allocation18_spill] sm:$0xff] %v7367_v11  ;;  %v2584_v14 = vshrl.u32 %v5404_v61, 16  ;;  %v2573_v36 = vrot.slane %v2571_v63, 4  ;;  %v2582_v16 = vrot.slane %v2580_v9, 5  ;;  %v2590_v17 = vshll.u32 %v5405_v2, 16 }
 0x163   : > { %v2576_v46 = vrot.slane %v2574_v25, 5  ;;  %4421 = vmatprep.mubr.bf16.mxu1 %v5434_v26  ;;  %v1806_v19 = vsel %vm6726_vm2, %v1801_v38, %v1805_v57  ;;  %v1816_v22 = vsel %vm6726_vm2, %v1811_v13, %v1815_v34  ;;  %v5491_v27 = vrot.slane %v5443_v3, 9  ;;  %v6337_v25 = vld [vmem:[%s6708_s9 + $0x78] sm:$0xff]   ;;  %v5407_v26 = vld [vmem:[%s6708_s9 + $0x88] sm:$0xf] }
 0x164   : > { %v7273_v55 = vpop.f32.mrb[8].mxu0  ;;  %v7284_v15 = vpop.f32.mrb[8].mxu1  ;;  %v2586_v23 = vrot.slane %v2584_v14, 4  ;;  %v5250_v31 = vcombine.low %v1806_v19, %v1816_v22  ;;  %4422 = vmatmul.mubr.bf16.gmra.mrb[108].mxu1 %v6336_v7  ;;  %v2592_v60 = vrot.slane %v2590_v17, 5  ;;  %v2940_v45 = vrot.slane %v5444_v5, 5 }
 0x165   : > { %v7281_v4 = vpop.f32.mrb[9].mxu0  ;;  %v7292_v29 = vpop.f32.mrb[9].mxu1  ;;  %v2577_v43 = vor.u32 %v2576_v46, %v2573_v36  ;;  %v2943_v61 = vrot.slane %v5445_v10, 5  ;;  %v5492_v57 = vrot.slane %v5446_v12, 9  ;;  %v2947_v28 = vrot.slane %v5447_v18, 5 }
 0x166   : > { %v7301_v41 = vpop.f32.mrb[10].mxu0  ;;  %v7303_v44 = vpop.f32.mrb[10].mxu1  ;;  %v2587_v58 = vor.u32 %v2586_v23, %v2582_v16  ;;  %4325 = vmatmul.mubr.bf16.gmra.mrb[108].mxu0 %v5250_v31  ;;  %v2941_v2 = vsel %vm6795_vm5, %v5491_v27, %v2940_v45  ;;  %v2942_v3 = vrot.slane %v2940_v45, 4  ;;  %v2950_v5 = vrot.slane %v5448_v30, 5  ;;  %v5449_v17 = vld [vmem:[%s6708_s9 + $0x30] sm:$0xe] }
 0x167   : > { %v7317_v48 = vpop.f32.mrb[11].mxu0  ;;  %v7319_v51 = vpop.f32.mrb[11].mxu1  ;;  %v2578_v1 = vrot.slane %v2577_v43, 4  ;;  %v2948_v9 = vsel %vm6795_vm5, %v5492_v57, %v2947_v28  ;;  %v2949_v10 = vrot.slane %v2947_v28, 4  ;;  %v7403_v12 = vadd.f32 %v7281_v4, %v7273_v55  ;;  %v5408_v4 = vld [vmem:[%s6708_s9 + $0x8c] sm:$0x1] }
 0x168   : > { %v2588_v63 = vrot.slane %v2587_v58, 4  ;;  %v2944_v36 = vsel %vm6795_vm5, %v2942_v3, %v2943_v61  ;;  %v7416_v46 = vadd.f32 %v7292_v29, %v7284_v15  ;;  %v7420_v55 = vadd.f32 %v7317_v48, %v7301_v41  ;;  %v5450_v18 = vld [vmem:[%s6708_s9 + $0x34] sm:$0xf]  ;;  %v5451_v15 = vld [vmem:[%s6708_s9 + $0x38] sm:$0x1] }
 0x169   : > { %v2583_v14 = vsel %vm6726_vm2, %v2578_v1, %v2582_v16  ;;  %v5507_v16 = vcombine.low %v2941_v2, %v2944_v36  ;;  %v2951_v22 = vsel %vm6795_vm5, %v2949_v10, %v2950_v5  ;;  %v7431_v23 = vadd.f32 %v7319_v51, %v7303_v44  ;;  %v5452_v30 = vld [vmem:[%s6708_s9 + $0x3c] sm:$0xe]  ;;  %v5453_v58 = vld [vmem:[%s6708_s9 + $0x40] sm:$0xf]  ;;  %v5454_v28 = vld [vmem:[%s6708_s9 + $0x44] sm:$0x1] }
 0x16a   : > { %8232 = vst [vmem:[#allocation19_spill] sm:$0xff] %v7416_v46  ;;  %v2593_v19 = vsel %vm6726_vm2, %v2588_v63, %v2592_v60  ;;  %v5508_v41 = vcombine.low %v2948_v9, %v2951_v22  ;;  %v2595_v48 = vshrl.u32 %v5406_v35, 16  ;;  %v2598_v27 = vshll.u32 %v5406_v35, 16  ;;  %v5409_v5 = vld [vmem:[%s6708_s9 + $0x90] sm:$0xf] }
 0x16b   : > { %8233 = vst [vmem:[#allocation20_spill] sm:$0xff] %v7431_v23  ;;  %v5435_v29 = vcombine.low %v2583_v14, %v2593_v19  ;;  %6091 = vmatprep.mubr.bf16.mxu0 %v5507_v16  ;;  %v2604_v31 = vshll.u32 %v5407_v26, 16  ;;  %v2608_v43 = vshrl.u32 %v5407_v26, 16  ;;  %v2614_v60 = vshll.u32 %v5408_v4, 16  ;;  %v5410_v36 = vld [vmem:[%s6708_s9 + $0x94] sm:$0xf] }
 0x16c   : > { %v7330_v8 = vpop.f32.mrb[12].mxu0  ;;  %v7335_v20 = vpop.f32.mrb[12].mxu1  ;;  %v5493_v45 = vrot.slane %v5449_v17, 9  ;;  %v2597_v61 = vrot.slane %v2595_v48, 4  ;;  %v2600_v57 = vrot.slane %v2598_v27, 5  ;;  %v2954_v44 = vrot.slane %v5450_v18, 5 }
 0x16d   : > { %v7337_v21 = vpop.f32.mrb[13].mxu0  ;;  %v7340_v33 = vpop.f32.mrb[13].mxu1  ;;  %4429 = vmatprep.mubr.bf16.mxu1 %v5435_v29  ;;  %v2957_v51 = vrot.slane %v5451_v15, 5  ;;  %v2606_v1 = vrot.slane %v2604_v31, 5  ;;  %v2610_v2 = vrot.slane %v2608_v43, 4  ;;  %v2616_v3 = vrot.slane %v2614_v60, 5 }
 0x16e   : > { %v7342_v40 = vpop.f32.mrb[14].mxu0  ;;  %v7344_v52 = vpop.f32.mrb[14].mxu1  ;;  %4430 = vmatmul.mubr.bf16.gmra.mrb[112].mxu1 %v6337_v25  ;;  %v5494_v35 = vrot.slane %v5452_v30, 9  ;;  %6092 = vmatmul.mubr.bf16.vlgmr.msra.gmra.mrb[112].mxu0 %v5508_v41  ;;  %v2601_v9 = vor.u32 %v2600_v57, %v2597_v61  ;;  %v2955_v10 = vsel %vm6795_vm5, %v5493_v45, %v2954_v44  ;;  %v2956_v26 = vrot.slane %v2954_v44, 4  ;;  %v5411_v22 = vld [vmem:[%s6708_s9 + $0x98] sm:$0x1] }
 0x16f   : > { %v7346_v53 = vpop.f32.mrb[15].mxu0  ;;  %v7353_v62 = vpop.f32.mrb[15].mxu1  ;;  %v2961_v14 = vrot.slane %v5453_v58, 5  ;;  %v2611_v17 = vor.u32 %v2610_v2, %v2606_v1  ;;  %v2964_v18 = vrot.slane %v5454_v28, 5  ;;  %v7449_v19 = vadd.f32 %v7337_v21, %v7330_v8  ;;  %v5455_v21 = vld [vmem:[%s6708_s9 + $0x48] sm:$0xe] }
 0x170   : > { %v7453_v16 = vadd.f32 %v7340_v33, %v7335_v20  ;;  %v2602_v41 = vrot.slane %v2601_v9, 4  ;;  %v2958_v48 = vsel %vm6795_vm5, %v2956_v26, %v2957_v51  ;;  %v6338_v43 = vld [vmem:[%s6708_s9 + $0x84] sm:$0xff]   ;;  %v7472_v60 = vadd.f32 %v7346_v53, %v7342_v40  ;;  %v5456_v58 = vld [vmem:[%s6708_s9 + $0x4c] sm:$0xf]  ;;  %v5457_v61 = vld [vmem:[%s6708_s9 + $0x50] sm:$0x1] }
 0x171   : > { %v2962_v27 = vsel %vm6795_vm5, %v5494_v35, %v2961_v14  ;;  %v2963_v8 = vrot.slane %v2961_v14, 4  ;;  %v2612_v33 = vrot.slane %v2611_v17, 4  ;;  %v5509_v31 = vcombine.low %v2955_v10, %v2958_v48  ;;  %v5458_v35 = vld [vmem:[%s6708_s9 + $0x54] sm:$0xe]  ;;  %v5459_v9 = vld [vmem:[%s6708_s9 + $0x58] sm:$0xf] }
 0x172   : > { %8234 = vst [vmem:[#allocation21_spill] sm:$0xff] %v7453_v16  ;;  %v7476_v45 = vadd.f32 %v7353_v62, %v7344_v52  ;;  %v2607_v44 = vsel %vm6726_vm2, %v2602_v41, %v2606_v1  ;;  %v2619_v28 = vshrl.u32 %v5409_v5, 16  ;;  %v2622_v2 = vshll.u32 %v5409_v5, 16  ;;  %v5460_v48 = vld [vmem:[%s6708_s9 + $0x5c] sm:$0x1] }
 0x173   : > { %v2965_v51 = vsel %vm6795_vm5, %v2963_v8, %v2964_v18  ;;  %v2617_v40 = vsel %vm6726_vm2, %v2612_v33, %v2616_v3  ;;  %6095 = vmatprep.mubr.bf16.mxu0 %v5509_v31  ;;  %v2628_v52 = vshll.u32 %v5410_v36, 16  ;;  %v2632_v62 = vshrl.u32 %v5410_v36, 16  ;;  %v5477_v46 = vld [vmem:[%s6708_s9 + $0xa0] sm:$0xf] }
 0x174   : > { %v7383_v50 = vpop.f32.mrb[16].mxu0  ;;  %v7385_v56 = vpop.f32.mrb[16].mxu1  ;;  %8235 = vst [vmem:[#allocation22_spill] sm:$0xff] %v7476_v45  ;;  %v5510_v53 = vcombine.low %v2962_v27, %v2965_v51  ;;  %v5436_v10 = vcombine.low %v2607_v44, %v2617_v40  ;;  %v2621_v26 = vrot.slane %v2619_v28, 4  ;;  %v2624_v14 = vrot.slane %v2622_v2, 5 }
 0x175   : > { %v7388_v34 = vpop.f32.mrb[17].mxu0  ;;  %v7390_v0 = vpop.f32.mrb[17].mxu1  ;;  %v2638_v17 = vshll.u32 %v5411_v22, 16  ;;  %v2630_v1 = vrot.slane %v2628_v52, 5  ;;  %v2634_v41 = vrot.slane %v2632_v62, 4  ;;  %v5495_v45 = vrot.slane %v5455_v21, 9 }
 0x176   : > { %v7394_v6 = vpop.f32.mrb[18].mxu0  ;;  %v7396_v7 = vpop.f32.mrb[18].mxu1  ;;  %v2968_v18 = vrot.slane %v5456_v58, 5  ;;  %4437 = vmatprep.mubr.bf16.mxu1 %v5436_v10  ;;  %6096 = vmatmul.mubr.bf16.gmra.mrb[116].mxu0 %v5510_v53  ;;  %v2625_v3 = vor.u32 %v2624_v14, %v2621_v26  ;;  %v2971_v8 = vrot.slane %v5457_v61, 5  ;;  %v5496_v36 = vrot.slane %v5458_v35, 9 }
 0x177   : > { %v7406_v38 = vpop.f32.mrb[19].mxu0  ;;  %v7408_v13 = vpop.f32.mrb[19].mxu1  ;;  %v2640_v27 = vrot.slane %v2638_v17, 5  ;;  %4438 = vmatmul.mubr.bf16.gmra.mrb[116].mxu1 %v6338_v43  ;;  %v2635_v22 = vor.u32 %v2634_v41, %v2630_v1  ;;  %v2975_v58 = vrot.slane %v5459_v9, 5  ;;  %v5412_v51 = vld [vmem:[%s6708_s9 + $0x9c] sm:$0xf]  ;;  %v7506_v53 = vadd.f32 %v7388_v34, %v7383_v50 }
 0x178   : > { %v2969_v21 = vsel %vm6795_vm5, %v5495_v45, %v2968_v18  ;;  %v2970_v44 = vrot.slane %v2968_v18, 4  ;;  %v2626_v61 = vrot.slane %v2625_v3, 4  ;;  %v2978_v40 = vrot.slane %v5460_v48, 5  ;;  %v5413_v45 = vld [vmem:[%s6708_s9 + $0xa0] sm:$0xf] }
 0x179   : > { %v5733_v43 = vadd.f32 %v7390_v0, %v7385_v56  ;;  %v2636_v35 = vrot.slane %v2635_v22, 4  ;;  %v2976_v10 = vsel %vm6795_vm5, %v5496_v36, %v2975_v58  ;;  %v2977_v50 = vrot.slane %v2975_v58, 4  ;;  %v5414_v34 = vld [vmem:[%s6708_s9 + $0xa4] sm:$0x1]  ;;  %v5461_v48 = vld [vmem:[%s6708_s9 + $0x60] sm:$0xe] }
 0x17a   : > { %v2972_v9 = vsel %vm6795_vm5, %v2970_v44, %v2971_v8  ;;  %v2631_v56 = vsel %vm6726_vm2, %v2626_v61, %v2630_v1  ;;  %v7529_v17 = vadd.f32 %v7406_v38, %v7394_v6  ;;  %v5462_v41 = vld [vmem:[%s6708_s9 + $0x64] sm:$0xf]  ;;  %v5463_v18 = vld [vmem:[%s6708_s9 + $0x68] sm:$0x1]  ;;  %v6339_v8 = vld [vmem:[%s6708_s9 + $0x90] sm:$0xff]   ;;  %v2643_v36 = vshrl.u32 %v5412_v51, 16 }
 0x17b   : > { %v5511_v0 = vcombine.low %v2969_v21, %v2972_v9  ;;  %v7525_v14 = vadd.f32 %v5733_v43, %v7289_v24  ;;  %v2641_v3 = vsel %vm6726_vm2, %v2636_v35, %v2640_v27  ;;  %v2979_v1 = vsel %vm6795_vm5, %v2977_v50, %v2978_v40  ;;  %v5464_v44 = vld [vmem:[%s6708_s9 + $0x6c] sm:$0xe]  ;;  %v5465_v58 = vld [vmem:[%s6708_s9 + $0x70] sm:$0xf]  ;;  %v5466_v9 = vld [vmem:[%s6708_s9 + $0x74] sm:$0x1] }
 0x17c   : > { %v7438_v63 = vpop.f32.mrb[20].mxu1  ;;  %v7443_v4 = vpop.f32.mrb[20].mxu0  ;;  %v5736_v24 = vadd.f32 %v7408_v13, %v7396_v7  ;;  %v5437_v22 = vcombine.low %v2631_v56, %v2641_v3  ;;  %v5512_v21 = vcombine.low %v2976_v10, %v2979_v1  ;;  %v2646_v6 = vshll.u32 %v5412_v51, 16 }
 0x17d   : > { %v7445_v25 = vpop.f32.mrb[21].mxu1  ;;  %v7456_v15 = vpop.f32.mrb[21].mxu0  ;;  %6099 = vmatprep.mubr.bf16.mxu0 %v5511_v0  ;;  %v2652_v38 = vshll.u32 %v5413_v45, 16  ;;  %v2645_v27 = vrot.slane %v2643_v36, 4  ;;  %v2656_v43 = vshrl.u32 %v5413_v45, 16  ;;  %v2662_v35 = vshll.u32 %v5414_v34, 16 }
 0x17e   : > { %v7458_v29 = vpop.f32.mrb[22].mxu1  ;;  %v7465_v30 = vpop.f32.mrb[22].mxu0  ;;  %v7544_v61 = vadd.f32 %v5736_v24, %v7310_v47  ;;  %4445 = vmatprep.mubr.bf16.mxu1 %v5437_v22  ;;  %6100 = vmatmul.mubr.bf16.gmra.mrb[120].mxu0 %v5512_v21  ;;  %v2648_v7 = vrot.slane %v2646_v6, 5  ;;  %v5497_v40 = vrot.slane %v5461_v48, 9  ;;  %v2982_v50 = vrot.slane %v5462_v41, 5 }
 0x17f   : > { %v7467_v20 = vpop.f32.mrb[23].mxu1  ;;  %v7480_v57 = vpop.f32.mrb[23].mxu0  ;;  %v2654_v13 = vrot.slane %v2652_v38, 5  ;;  %4446 = vmatmul.mubr.bf16.gmra.mrb[120].mxu1 %v6339_v8  ;;  %v2658_v56 = vrot.slane %v2656_v43, 4  ;;  %v2664_v47 = vrot.slane %v2662_v35, 5  ;;  %v2985_v45 = vrot.slane %v5463_v18, 5 }
 0x180   : > { %8236 = vst [vmem:[#allocation23_spill] sm:$0xff] %v7544_v61  ;;  %v5498_v34 = vrot.slane %v5464_v44, 9  ;;  %v2649_v1 = vor.u32 %v2648_v7, %v2645_v27  ;;  %v2983_v48 = vsel %vm6795_vm5, %v5497_v40, %v2982_v50  ;;  %v2984_v41 = vrot.slane %v2982_v50, 4  ;;  %v5415_v38 = vld [vmem:[%s6708_s9 + $0xa8] sm:$0xf] }
 0x181   : > { %v2989_v24 = vrot.slane %v5465_v58, 5  ;;  %v2659_v22 = vor.u32 %v2658_v56, %v2654_v13  ;;  %v2992_v21 = vrot.slane %v5466_v9, 5  ;;  %v7565_v18 = vadd.f32 %v7456_v15, %v7443_v4  ;;  %v5416_v44 = vld [vmem:[%s6708_s9 + $0xac] sm:$0xf]  ;;  %v5417_v7 = vld [vmem:[%s6708_s9 + $0xb0] sm:$0x1] }
 0x182   : > { %v5739_v6 = vadd.f32 %v7445_v25, %v7438_v63  ;;  %v2650_v58 = vrot.slane %v2649_v1, 4  ;;  %v2986_v43 = vsel %vm6795_vm5, %v2984_v41, %v2985_v45  ;;  %v5467_v4 = vld [vmem:[%s6708_s9 + $0x78] sm:$0xe]  ;;  %v7584_v25 = vadd.f32 %v7480_v57, %v7465_v30  ;;  %v5468_v50 = vld [vmem:[%s6708_s9 + $0x7c] sm:$0xf] }
 0x183   : > { %v2990_v35 = vsel %vm6795_vm5, %v5498_v34, %v2989_v24  ;;  %v2991_v9 = vrot.slane %v2989_v24, 4  ;;  %v2660_v15 = vrot.slane %v2659_v22, 4  ;;  %v5513_v40 = vcombine.low %v2983_v48, %v2986_v43  ;;  %v6340_v45 = vld [vmem:[%s6708_s9 + $0x9c] sm:$0xff]   ;;  %v5470_v22 = vld [vmem:[%s6708_s9 + $0x84] sm:$0xe] }
 0x184   : > { %v7491_v5 = vpop.f32.mrb[24].mxu1  ;;  %v7493_v33 = vpop.f32.mrb[24].mxu0  ;;  %v7580_v63 = vadd.f32 %v5739_v6, %v7350_v59  ;;  %v2655_v56 = vsel %vm6726_vm2, %v2650_v58, %v2654_v13  ;;  %v5742_v1 = vadd.f32 %v7467_v20, %v7458_v29  ;;  %v2667_v48 = vshrl.u32 %v5415_v38, 16  ;;  %v5469_v41 = vld [vmem:[%s6708_s9 + $0x80] sm:$0x1] }
 0x185   : > { %v7495_v31 = vpop.f32.mrb[25].mxu1  ;;  %v7500_v28 = vpop.f32.mrb[25].mxu0  ;;  %v2993_v34 = vsel %vm6795_vm5, %v2991_v9, %v2992_v21  ;;  %v2665_v59 = vsel %vm6726_vm2, %v2660_v15, %v2664_v47  ;;  %6103 = vmatprep.mubr.bf16.mxu0 %v5513_v40  ;;  %v2670_v57 = vshll.u32 %v5415_v38, 16  ;;  %v2676_v24 = vshll.u32 %v5416_v44, 16  ;;  %v5471_v6 = vld [vmem:[%s6708_s9 + $0x88] sm:$0xf] }
 0x186   : > { %v7502_v2 = vpop.f32.mrb[26].mxu1  ;;  %v7511_v52 = vpop.f32.mrb[26].mxu0  ;;  %8237 = vst [vmem:[#allocation24_spill] sm:$0xff] %v7580_v63  ;;  %v5514_v30 = vcombine.low %v2990_v35, %v2993_v34  ;;  %v5438_v13 = vcombine.low %v2655_v56, %v2665_v59  ;;  %v7600_v58 = vadd.f32 %v5742_v1, %v7363_v49  ;;  %v2669_v43 = vrot.slane %v2667_v48, 4  ;;  %v5472_v9 = vld [vmem:[%s6708_s9 + $0x8c] sm:$0x1] }
 0x187   : > { %v7513_v62 = vpop.f32.mrb[27].mxu1  ;;  %v7520_v26 = vpop.f32.mrb[27].mxu0  ;;  %v2680_v21 = vshrl.u32 %v5416_v44, 16  ;;  %v2672_v20 = vrot.slane %v2670_v57, 5  ;;  %v2678_v47 = vrot.slane %v2676_v24, 5  ;;  %v2686_v15 = vshll.u32 %v5417_v7, 16 }
 0x188   : > { %8238 = vst [vmem:[#allocation25_spill] sm:$0xff] %v7600_v58  ;;  %6104 = vmatmul.mubr.bf16.gmra.mrb[124].mxu0 %v5514_v30  ;;  %v5499_v35 = vrot.slane %v5467_v4, 9  ;;  %4453 = vmatprep.mubr.bf16.mxu1 %v5438_v13  ;;  %v2996_v49 = vrot.slane %v5468_v50, 5  ;;  %v2999_v34 = vrot.slane %v5469_v41, 5  ;;  %v5500_v44 = vrot.slane %v5470_v22, 9 }
 0x189   : > { %v2682_v56 = vrot.slane %v2680_v21, 4  ;;  %4454 = vmatmul.mubr.bf16.gmra.mrb[124].mxu1 %v6340_v45  ;;  %v2673_v59 = vor.u32 %v2672_v20, %v2669_v43  ;;  %v2688_v7 = vrot.slane %v2686_v15, 5  ;;  %v3003_v4 = vrot.slane %v5471_v6, 5  ;;  %v5418_v45 = vld [vmem:[%s6708_s9 + $0xb4] sm:$0xf] }
 0x18a   : > { %v3006_v30 = vrot.slane %v5472_v9, 5  ;;  %v2997_v41 = vsel %vm6795_vm5, %v5499_v35, %v2996_v49  ;;  %v2998_v22 = vrot.slane %v2996_v49, 4  ;;  %v7623_v13 = vadd.f32 %v7500_v28, %v7493_v33  ;;  %v5419_v43 = vld [vmem:[%s6708_s9 + $0xb8] sm:$0xf]  ;;  %v5420_v15 = vld [vmem:[%s6708_s9 + $0xbc] sm:$0x1] }
 0x18b   : > { %v2683_v50 = vor.u32 %v2682_v56, %v2678_v47  ;;  %v2674_v21 = vrot.slane %v2673_v59, 4  ;;  %v3004_v6 = vsel %vm6795_vm5, %v5500_v44, %v3003_v4  ;;  %v3005_v9 = vrot.slane %v3003_v4, 4  ;;  %v5473_v35 = vld [vmem:[%s6708_s9 + $0x90] sm:$0xe]  ;;  %v5474_v44 = vld [vmem:[%s6708_s9 + $0x94] sm:$0xf] }
 0x18c   : > { %v7547_v16 = vpop.f32.mrb[28].mxu1  ;;  %v7549_v10 = vpop.f32.mrb[28].mxu0  ;;  %v5745_v20 = vadd.f32 %v7495_v31, %v7491_v5  ;;  %v3000_v33 = vsel %vm6795_vm5, %v2998_v22, %v2999_v34  ;;  %v7637_v28 = vadd.f32 %v7520_v26, %v7511_v52  ;;  %v5748_v49 = vadd.f32 %v7513_v62, %v7502_v2  ;;  %v5475_v34 = vld [vmem:[%s6708_s9 + $0x98] sm:$0x1]  ;;  %v6341_v26 = vld [vmem:[%s6708_s9 + $0xa8] sm:$0xff]  }
 0x18d   : > { %v7551_v51 = vpop.f32.mrb[29].mxu1  ;;  %v7553_v0 = vpop.f32.mrb[29].mxu0  ;;  %v2684_v56 = vrot.slane %v2683_v50, 4  ;;  %v2679_v59 = vsel %vm6726_vm2, %v2674_v21, %v2678_v47  ;;  %v5515_v5 = vcombine.low %v2997_v41, %v3000_v33  ;;  %v3007_v31 = vsel %vm6795_vm5, %v3005_v9, %v3006_v30  ;;  %v5476_v50 = vld [vmem:[%s6708_s9 + $0x9c] sm:$0xe] }
 0x18e   : > { %v7555_v3 = vpop.f32.mrb[30].mxu1  ;;  %v7559_v36 = vpop.f32.mrb[30].mxu0  ;;  %v7647_v4 = vadd.f32 %v5745_v20, %v7403_v12  ;;  %v5516_v22 = vcombine.low %v3004_v6, %v3007_v31  ;;  %v7655_v2 = vadd.f32 %v5748_v49, %v7420_v55  ;;  %v2691_v62 = vshrl.u32 %v5418_v45, 16  ;;  %v7659_v47 = vld [vmem:[%s6708_s9 + $0xa4] sm:$0x1] }
 0x18f   : > { %v7561_v8 = vpop.f32.mrb[31].mxu1  ;;  %v7571_v27 = vpop.f32.mrb[31].mxu0  ;;  %v2689_v52 = vsel %vm6726_vm2, %v2684_v56, %v2688_v7  ;;  %6107 = vmatprep.mubr.bf16.mxu0 %v5515_v5  ;;  %v2694_v21 = vshll.u32 %v5418_v45, 16  ;;  %v2700_v9 = vshll.u32 %v5419_v43, 16  ;;  %v2704_v20 = vshrl.u32 %v5419_v43, 16 }
 0x190   : > { %8239 = vst [vmem:[#allocation26_spill] sm:$0xff] %v7647_v4  ;;  %8240 = vst [vmem:[#allocation27_spill] sm:$0xff] %v7655_v2  ;;  %v5439_v12 = vcombine.low %v2679_v59, %v2689_v52  ;;  %6108 = vmatmul.mubr.bf16.gmra.mrb[128].mxu0 %v5516_v22  ;;  %v2693_v55 = vrot.slane %v2691_v62, 4  ;;  %v2710_v6 = vshll.u32 %v5420_v15, 16  ;;  %v5501_v56 = vrot.slane %v5473_v35, 9 }
 0x191   : > { %v3010_v49 = vrot.slane %v5474_v44, 5  ;;  %v2696_v59 = vrot.slane %v2694_v21, 5  ;;  %v2702_v5 = vrot.slane %v2700_v9, 5  ;;  %v2706_v45 = vrot.slane %v2704_v20, 4  ;;  %v5421_v9 = vld [vmem:[%s6708_s9 + $0xc0] sm:$0xf] }
 0x192   : > { %4461 = vmatprep.mubr.bf16.mxu1 %v5439_v12  ;;  %v3013_v52 = vrot.slane %v5475_v34, 5  ;;  %v2712_v22 = vrot.slane %v2710_v6, 5  ;;  %v5502_v44 = vrot.slane %v5476_v50, 9  ;;  %v3017_v21 = vrot.slane %v5477_v46, 5  ;;  %v5484_v4 = vld [vmem:[%s6708_s9 + $0xbc] sm:$0x1] }
 0x193   : > { %4462 = vmatmul.mubr.bf16.gmra.mrb[128].mxu1 %v6341_v26  ;;  %v3011_v15 = vsel %vm6795_vm5, %v5501_v56, %v3010_v49  ;;  %v3012_v35 = vrot.slane %v3010_v49, 4  ;;  %v2697_v62 = vor.u32 %v2696_v59, %v2693_v55  ;;  %v2707_v12 = vor.u32 %v2706_v45, %v2702_v5  ;;  %v5422_v55 = vld [vmem:[%s6708_s9 + $0xc4] sm:$0xf]  ;;  %v6342_v49 = vld [vmem:[%s6708_s9 + $0xb4] sm:$0xff]   ;;  %v5423_v45 = vld [vmem:[%s6708_s9 + $0xc8] sm:$0x1] }
 0x194   : > { %v7603_v23 = vpop.f32.mrb[32].mxu0  ;;  %v7605_v29 = vpop.f32.mrb[32].mxu1  ;;  %v3020_v34 = vrot.slane %v7659_v47, 5  ;;  %v7685_v26 = vadd.f32 %v7553_v0, %v7549_v10  ;;  %v5751_v6 = vadd.f32 %v7551_v51, %v7547_v16  ;;  %v7691_v50 = vadd.f32 %v7571_v27, %v7559_v36  ;;  %v5479_v10 = vld [vmem:[%s6708_s9 + $0xa8] sm:$0xe] }
 0x195   : > { %v7607_v38 = vpop.f32.mrb[33].mxu0  ;;  %v7609_v40 = vpop.f32.mrb[33].mxu1  ;;  %v3014_v20 = vsel %vm6795_vm5, %v3012_v35, %v3013_v52  ;;  %v2698_v46 = vrot.slane %v2697_v62, 4  ;;  %v2708_v56 = vrot.slane %v2707_v12, 4  ;;  %v3018_v59 = vsel %vm6795_vm5, %v5502_v44, %v3017_v21  ;;  %v5480_v0 = vld [vmem:[%s6708_s9 + $0xac] sm:$0xf] }
 0x196   : > { %v7611_v1 = vpop.f32.mrb[34].mxu0  ;;  %v7613_v48 = vpop.f32.mrb[34].mxu1  ;;  %v5517_v47 = vcombine.low %v3011_v15, %v3014_v20  ;;  %v3019_v16 = vrot.slane %v3017_v21, 4  ;;  %v7703_v51 = vadd.f32 %v5751_v6, %v7449_v19  ;;  %v5754_v36 = vadd.f32 %v7561_v8, %v7555_v3  ;;  %v5481_v15 = vld [vmem:[%s6708_s9 + $0xb0] sm:$0x1] }
 0x197   : > { %v7615_v57 = vpop.f32.mrb[35].mxu0  ;;  %v7617_v24 = vpop.f32.mrb[35].mxu1  ;;  %v2715_v27 = vshrl.u32 %v5421_v9, 16  ;;  %v2703_v44 = vsel %vm6726_vm2, %v2698_v46, %v2702_v5  ;;  %v2713_v12 = vsel %vm6726_vm2, %v2708_v56, %v2712_v22  ;;  %v2718_v21 = vshll.u32 %v5421_v9, 16  ;;  %v5482_v20 = vld [vmem:[%s6708_s9 + $0xb4] sm:$0xe] }
 0x198   : > { %8241 = vst [vmem:[#allocation28_spill] sm:$0xff] %v7703_v51  ;;  %6111 = vmatprep.mubr.bf16.mxu0 %v5517_v47  ;;  %v2724_v19 = vshll.u32 %v5422_v55, 16  ;;  %v5440_v8 = vcombine.low %v2703_v44, %v2713_v12  ;;  %v3021_v54 = vsel %vm6795_vm5, %v3019_v16, %v3020_v34  ;;  %v7724_v39 = vadd.f32 %v5754_v36, %v7472_v60  ;;  %v5483_v46 = vld [vmem:[%s6708_s9 + $0xb8] sm:$0xf] }
 0x199   : > { %v2717_v5 = vrot.slane %v2715_v27, 4  ;;  %v5518_v9 = vcombine.low %v3018_v59, %v3021_v54  ;;  %v2720_v56 = vrot.slane %v2718_v21, 5  ;;  %v2728_v2 = vshrl.u32 %v5422_v55, 16 }
 0x19a   : > { %8242 = vst [vmem:[#allocation29_spill] sm:$0xff] %v7724_v39  ;;  %v2726_v47 = vrot.slane %v2724_v19, 5  ;;  %4469 = vmatprep.mubr.bf16.mxu1 %v5440_v8  ;;  %v2734_v44 = vshll.u32 %v5423_v45, 16  ;;  %v5503_v12 = vrot.slane %v5479_v10, 9  ;;  %v3024_v34 = vrot.slane %v5480_v0, 5 }
 0x19b   : > { %v3027_v60 = vrot.slane %v5481_v15, 5  ;;  %4470 = vmatmul.mubr.bf16.gmra.mrb[132].mxu1 %v6342_v49  ;;  %6112 = vmatmul.mubr.bf16.gmra.mrb[132].mxu0 %v5518_v9  ;;  %v2721_v16 = vor.u32 %v2720_v56, %v2717_v5  ;;  %v2730_v36 = vrot.slane %v2728_v2, 4  ;;  %v5504_v27 = vrot.slane %v5482_v20, 9  ;;  %v5424_v0 = vld [vmem:[%s6708_s9 + $0xcc] sm:$0xf] }
 0x19c   : > { %v7661_v41 = vpop.f32.mrb[36].mxu0  ;;  %v7663_v30 = vpop.f32.mrb[36].mxu1  ;;  %v3031_v54 = vrot.slane %v5483_v46, 5  ;;  %v2736_v59 = vrot.slane %v2734_v44, 5  ;;  %v3025_v55 = vsel %vm6795_vm5, %v5503_v12, %v3024_v34  ;;  %v3026_v21 = vrot.slane %v3024_v34, 4 }
 0x19d   : > { %v7665_v33 = vpop.f32.mrb[37].mxu0  ;;  %v7667_v7 = vpop.f32.mrb[37].mxu1  ;;  %v3034_v19 = vrot.slane %v5484_v4, 5  ;;  %v2722_v45 = vrot.slane %v2721_v16, 4  ;;  %v2731_v10 = vor.u32 %v2730_v36, %v2726_v47  ;;  %v7743_v20 = vadd.f32 %v7607_v38, %v7603_v23  ;;  %v5425_v5 = vld [vmem:[%s6708_s9 + $0xd0] sm:$0xf] }
 0x19e   : > { %v7669_v31 = vpop.f32.mrb[38].mxu0  ;;  %v7671_v11 = vpop.f32.mrb[38].mxu1  ;;  %v3032_v49 = vsel %vm6795_vm5, %v5504_v27, %v3031_v54  ;;  %v3033_v2 = vrot.slane %v3031_v54, 4  ;;  %v3028_v15 = vsel %vm6795_vm5, %v3026_v21, %v3027_v60  ;;  %v5757_v4 = vadd.f32 %v7609_v40, %v7605_v29  ;;  %v5426_v46 = vld [vmem:[%s6708_s9 + $0xd4] sm:$0x1] }
 0x19f   : > { %v7673_v43 = vpop.f32.mrb[39].mxu0  ;;  %v7675_v42 = vpop.f32.mrb[39].mxu1  ;;  %v7749_v8 = vadd.f32 %v7615_v57, %v7611_v1  ;;  %v5485_v9 = vld [vmem:[%s6708_s9 + $0xc0] sm:$0xe]  ;;  %v2727_v56 = vsel %vm6726_vm2, %v2722_v45, %v2726_v47  ;;  %v2732_v44 = vrot.slane %v2731_v10, 4  ;;  %v5519_v12 = vcombine.low %v3025_v55, %v3028_v15 }
 0x1a0   : > { %v3035_v23 = vsel %vm6795_vm5, %v3033_v2, %v3034_v19  ;;  %v5486_v38 = vld [vmem:[%s6708_s9 + $0xc4] sm:$0xf]  ;;  %v5487_v34 = vld [vmem:[%s6708_s9 + $0xc8] sm:$0x1]  ;;  %v5488_v29 = vld [vmem:[%s6708_s9 + $0xcc] sm:$0xe]  ;;  %v7764_v57 = vadd.f32 %v5757_v4, %v7506_v53  ;;  %v5760_v60 = vadd.f32 %v7617_v24, %v7613_v48 }
 0x1a1   : > { %v5520_v1 = vcombine.low %v3032_v49, %v3035_v23  ;;  %v2739_v16 = vshrl.u32 %v5424_v0, 16  ;;  %v5489_v47 = vld [vmem:[%s6708_s9 + $0xd0] sm:$0xf]  ;;  %v2737_v54 = vsel %vm6726_vm2, %v2732_v44, %v2736_v59  ;;  %6115 = vmatprep.mubr.bf16.mxu0 %v5519_v12  ;;  %v6343_v55 = vld [vmem:[%s6708_s9 + $0xc0] sm:$0xff]   ;;  %v2742_v21 = vshll.u32 %v5424_v0, 16 }
 0x1a2   : > { %8243 = vst [vmem:[#allocation30_spill] sm:$0xff] %v7764_v57  ;;  %v2748_v19 = vshll.u32 %v5425_v5, 16  ;;  %v2752_v45 = vshrl.u32 %v5425_v5, 16  ;;  %v5441_v49 = vcombine.low %v2727_v56, %v2737_v54  ;;  %v7777_v48 = vadd.f32 %v5760_v60, %v7529_v17  ;;  %v5490_v15 = vld [vmem:[%s6708_s9 + $0xd4] sm:$0x1] }
 0x1a3   : > { %v2741_v24 = vrot.slane %v2739_v16, 4  ;;  %v2758_v2 = vshll.u32 %v5426_v46, 16  ;;  %6116 = vmatmul.mubr.bf16.gmra.mrb[136].mxu0 %v5520_v1  ;;  %v2744_v57 = vrot.slane %v2742_v21, 5  ;;  %v5505_v44 = vrot.slane %v5485_v9, 9 }
 0x1a4   : > { %v7700_v52 = vpop.f32.mrb[40].mxu1  ;;  %v7708_v35 = vpop.f32.mrb[40].mxu0  ;;  %v2750_v39 = vrot.slane %v2748_v19, 5  ;;  %v2754_v59 = vrot.slane %v2752_v45, 4  ;;  %4477 = vmatprep.mubr.bf16.mxu1 %v5441_v49  ;;  %v3038_v5 = vrot.slane %v5486_v38, 5  ;;  %v3041_v63 = vrot.slane %v5487_v34, 5 }
 0x1a5   : > { %v7710_v62 = vpop.f32.mrb[41].mxu1  ;;  %v7717_v6 = vpop.f32.mrb[41].mxu0  ;;  %v2760_v0 = vrot.slane %v2758_v2, 5  ;;  %v5506_v61 = vrot.slane %v5488_v29, 9  ;;  %4478 = vmatmul.mubr.bf16.gmra.mrb[136].mxu1 %v6343_v55  ;;  %v2745_v56 = vor.u32 %v2744_v57, %v2741_v24  ;;  %v3045_v60 = vrot.slane %v5489_v47, 5  ;;  %v6344_v45 = vld [vmem:[%s6708_s9 + $0xcc] sm:$0xff]  }
 0x1a6   : > { %v7719_v3 = vpop.f32.mrb[42].mxu1  ;;  %v7727_v51 = vpop.f32.mrb[42].mxu0  ;;  %v2755_v17 = vor.u32 %v2754_v59, %v2750_v39  ;;  %v3048_v16 = vrot.slane %v5490_v15, 5  ;;  %v3039_v46 = vsel %vm6795_vm5, %v5505_v44, %v3038_v5  ;;  %v3040_v54 = vrot.slane %v3038_v5, 4 }
 0x1a7   : > { %v7729_v22 = vpop.f32.mrb[43].mxu1  ;;  %v7732_v58 = vpop.f32.mrb[43].mxu0  ;;  %v5675_v1 = vadd.f32 %v7665_v33, %v7661_v41  ;;  %v5763_v9 = vadd.f32 %v7667_v7, %v7663_v30  ;;  %v2746_v21 = vrot.slane %v2745_v56, 4  ;;  %v3046_v34 = vsel %vm6795_vm5, %v5506_v61, %v3045_v60 }
 0x1a8   : > { %v2756_v38 = vrot.slane %v2755_v17, 4  ;;  %v3047_v29 = vrot.slane %v3045_v60, 4  ;;  %v3042_v47 = vsel %vm6795_vm5, %v3040_v54, %v3041_v63  ;;  %v5678_v19 = vadd.f32 %v7673_v43, %v7669_v31  ;;  %v8245_v54 = vld [vmem:[#allocation24_spill] sm:$0xff] }
 0x1a9   : > { %v7791_v55 = vadd.f32 %v5763_v9, %v7565_v18  ;;  %v5766_v41 = vadd.f32 %v7675_v42, %v7671_v11  ;;  %v2751_v33 = vsel %vm6726_vm2, %v2746_v21, %v2750_v39  ;;  %v5521_v7 = vcombine.low %v3039_v46, %v3042_v47 }
 0x1aa   : > { %v2761_v61 = vsel %vm6726_vm2, %v2756_v38, %v2760_v0  ;;  %v3049_v63 = vsel %vm6795_vm5, %v3047_v29, %v3048_v16  ;;  %v5681_v42 = vadd.f32 %v7717_v6, %v7708_v35  ;;  %v5769_v37 = vadd.f32 %v7710_v62, %v7700_v52 }
 0x1ab   : > { %v5442_v49 = vcombine.low %v2751_v33, %v2761_v61  ;;  %v5522_v24 = vcombine.low %v3046_v34, %v3049_v63  ;;  %v7805_v31 = vadd.f32 %v5766_v41, %v7584_v25  ;;  %6119 = vmatprep.mubr.bf16.mxu0 %v5521_v7  ;;  %v5684_v39 = vadd.f32 %v7732_v58, %v7727_v51 }
 0x1ac   : > { %v7761_v40 = vpop.f32.mrb[44].mxu1  ;;  %v7769_v36 = vpop.f32.mrb[44].mxu0  ;;  %v5772_v32 = vadd.f32 %v7729_v22, %v7719_v3  ;;  %v7819_v52 = vadd.f32 %v5769_v37, %v7623_v13 }
 0x1ad   : > { %v7771_v27 = vpop.f32.mrb[45].mxu1  ;;  %v5686_v53 = vpop.f32.mrb[45].mxu0  ;;  %4485 = vmatprep.mubr.bf16.mxu1 %v5442_v49  ;;  %6120 = vmatmul.mubr.bf16.gmra.mrb[140].mxu0 %v5522_v24 }
 0x1ae   : > { %v5776_v10 = vpop.f32.mrb[46].mxu1  ;;  %v5688_v4 = vpop.f32.mrb[46].mxu0  ;;  %v5687_v2 = vadd.f32 %v5686_v53, %v7769_v36  ;;  %v5775_v25 = vadd.f32 %v7771_v27, %v7761_v40  ;;  %4486 = vmatmul.mubr.bf16.gmra.mrb[140].mxu1 %v6344_v45  ;;  %v7822_v58 = vadd.f32 %v5772_v32, %v7637_v28 }
 0x1af   : > { %v5777_v23 = vpop.f32.mrb[47].mxu1  ;;  %v5689_v12 = vpop.f32.mrb[47].mxu0 }
 0x1b0   : > { %v5690_v35 = vadd.f32 %v5689_v12, %v5688_v4  ;;  %v5778_v6 = vadd.f32 %v5777_v23, %v5776_v10  ;;  %v7825_v22 = vadd.f32 %v5775_v25, %v7685_v26  ;;  %v8244_v4 = vld [vmem:[#allocation23_spill] sm:$0xff] }
 0x1b1   : > { %v8248_v25 = vld [vmem:[#allocation27_spill] sm:$0xff] }
 0x1b2   : > { %v7828_v36 = vadd.f32 %v5778_v6, %v7691_v50 }
 0x1b4   : > { %v5779_v57 = vpop.f32.mrb[48].mxu1  ;;  %v5843_v11 = vpop.f32.mrb[48].mxu0 }
 0x1b5   : > { %v5780_v30 = vpop.f32.mrb[49].mxu1  ;;  %v5844_v15 = vpop.f32.mrb[49].mxu0 }
 0x1b6   : > { %v5782_v18 = vpop.f32.mrb[50].mxu1  ;;  %v5846_v59 = vpop.f32.mrb[50].mxu0  ;;  %v5781_v51 = vadd.f32 %v5780_v30, %v5779_v57  ;;  %v5845_v62 = vadd.f32 %v5844_v15, %v5843_v11  ;;  %v8246_v57 = vld [vmem:[#allocation25_spill] sm:$0xff]  ;;  %v8247_v11 = vld [vmem:[#allocation26_spill] sm:$0xff] }
 0x1b7   : > { %v5783_v43 = vpop.f32.mrb[51].mxu1  ;;  %v5847_v3 = vpop.f32.mrb[51].mxu0 }
 0x1b8   : > { %v5784_v40 = vadd.f32 %v5783_v43, %v5782_v18  ;;  %v5848_v27 = vadd.f32 %v5847_v3, %v5846_v59  ;;  %v7831_v53 = vadd.f32 %v5781_v51, %v7743_v20  ;;  %v7834_v13 = vadd.f32 %v5845_v62, %v7525_v14 }
 0x1ba   : > { %v7837_v28 = vadd.f32 %v5784_v40, %v7749_v8  ;;  %v7840_v23 = vadd.f32 %v5848_v27, %v8244_v4 }
 0x1bc   : > { %v5785_v10 = vpop.f32.mrb[52].mxu1  ;;  %v5849_v56 = vpop.f32.mrb[52].mxu0 }
 0x1bd   : > { %v5786_v26 = vpop.f32.mrb[53].mxu1  ;;  %v5850_v17 = vpop.f32.mrb[53].mxu0 }
 0x1be   : > { %v5787_v44 = vadd.f32 %v5786_v26, %v5785_v10  ;;  %v5788_v12 = vpop.f32.mrb[54].mxu1  ;;  %v5851_v14 = vadd.f32 %v5850_v17, %v5849_v56  ;;  %v5852_v60 = vpop.f32.mrb[54].mxu0 }
 0x1bf   : > { %v5789_v50 = vpop.f32.mrb[55].mxu1  ;;  %v5853_v46 = vpop.f32.mrb[55].mxu0 }
 0x1c0   : > { %v7842_v0 = vadd.f32 %v5787_v44, %v5675_v1  ;;  %v5790_v5 = vadd.f32 %v5789_v50, %v5788_v12  ;;  %v7847_v9 = vadd.f32 %v5851_v14, %v8245_v54  ;;  %v5854_v21 = vadd.f32 %v5853_v46, %v5852_v60  ;;  %v8249_v44 = vld [vmem:[#allocation28_spill] sm:$0xff] }
 0x1c1   : > { %v8252_v60 = vld [vmem:[#allocation16_spill] sm:$0xff] }
 0x1c2   : > { %v7844_v20 = vadd.f32 %v5790_v5, %v5678_v19  ;;  %v7850_v1 = vadd.f32 %v5854_v21, %v8246_v57  ;;  %v8250_v5 = vld [vmem:[#allocation15_spill] sm:$0xff] }
 0x1c4   : > { %v5791_v16 = vpop.f32.mrb[56].mxu1  ;;  %v5855_v30 = vpop.f32.mrb[56].mxu0 }
 0x1c5   : > { %v5792_v8 = vpop.f32.mrb[57].mxu1  ;;  %v5856_v33 = vpop.f32.mrb[57].mxu0 }
 0x1c6   : > { %v5793_v38 = vadd.f32 %v5792_v8, %v5791_v16  ;;  %v5794_v34 = vpop.f32.mrb[58].mxu1  ;;  %v5857_v7 = vadd.f32 %v5856_v33, %v5855_v30  ;;  %v5858_v45 = vpop.f32.mrb[58].mxu0  ;;  %v8253_v30 = vld [vmem:[#allocation30_spill] sm:$0xff] }
 0x1c7   : > { %v5795_v29 = vpop.f32.mrb[59].mxu1  ;;  %v5859_v18 = vpop.f32.mrb[59].mxu0 }
 0x1c8   : > { %v7852_v47 = vadd.f32 %v5793_v38, %v5681_v42  ;;  %v5796_v19 = vadd.f32 %v5795_v29, %v5794_v34  ;;  %v7857_v43 = vadd.f32 %v5857_v7, %v8247_v11  ;;  %v5860_v37 = vadd.f32 %v5859_v18, %v5858_v45  ;;  %v8254_v45 = vld [vmem:[#allocation17_spill] sm:$0xff] }
 0x1ca   : > { %v7854_v41 = vadd.f32 %v5796_v19, %v5684_v39  ;;  %v7862_v39 = vadd.f32 %v5860_v37, %v8248_v25 }
 0x1cc   : > { %v5797_v61 = vpop.f32.mrb[60].mxu1  ;;  %v5861_v59 = vpop.f32.mrb[60].mxu0 }
 0x1cd   : > { %v5798_v63 = vpop.f32.mrb[61].mxu1  ;;  %v5862_v51 = vpop.f32.mrb[61].mxu0 }
 0x1ce   : > { %v5799_v49 = vadd.f32 %v5798_v63, %v5797_v61  ;;  %v5800_v24 = vpop.f32.mrb[62].mxu1  ;;  %v5863_v3 = vadd.f32 %v5862_v51, %v5861_v59  ;;  %v5864_v40 = vpop.f32.mrb[62].mxu0 }
 0x1cf   : > { %v5801_v32 = vpop.f32.mrb[63].mxu1  ;;  %v5865_v10 = vpop.f32.mrb[63].mxu0 }
 0x1d0   : > { %v7859_v15 = vadd.f32 %v5799_v49, %v5687_v2  ;;  %v5802_v42 = vadd.f32 %v5801_v32, %v5800_v24  ;;  %v7867_v12 = vadd.f32 %v5863_v3, %v8249_v44  ;;  %v5866_v2 = vadd.f32 %v5865_v10, %v5864_v40  ;;  %v8255_v24 = vld [vmem:[#allocation18_spill] sm:$0xff] }
 0x1d2   : > { %v7864_v6 = vadd.f32 %v5802_v42, %v5690_v35  ;;  %v8251_v35 = vld [vmem:[#allocation29_spill] sm:$0xff] }
 0x1d3   : > { %v7873_v14 = vadd.f32 %v5866_v2, %v8251_v35 }
 0x1d4   : > { %v5803_v62 = vpop.f32.mrb[64].mxu1  ;;  %v5867_v46 = vpop.f32.mrb[64].mxu0 }
 0x1d5   : > { %v5804_v27 = vpop.f32.mrb[65].mxu1  ;;  %v5868_v8 = vpop.f32.mrb[65].mxu0 }
 0x1d6   : > { %v5805_v4 = vadd.f32 %v5804_v27, %v5803_v62  ;;  %v5806_v26 = vpop.f32.mrb[66].mxu1  ;;  %v5869_v21 = vadd.f32 %v5868_v8, %v5867_v46  ;;  %v5870_v38 = vpop.f32.mrb[66].mxu0 }
 0x1d7   : > { %v5807_v50 = vpop.f32.mrb[67].mxu1  ;;  %v5871_v29 = vpop.f32.mrb[67].mxu0 }
 0x1d8   : > { %v7870_v56 = vadd.f32 %v5805_v4, %v8250_v5  ;;  %v5808_v17 = vadd.f32 %v5807_v50, %v5806_v26  ;;  %v7879_v33 = vadd.f32 %v5869_v21, %v8253_v30  ;;  %v5872_v61 = vadd.f32 %v5871_v29, %v5870_v38  ;;  %v8256_v26 = vld [vmem:[#allocation19_spill] sm:$0xff]  ;;  %v8257_v50 = vld [vmem:[#allocation20_spill] sm:$0xff] }
 0x1da   : > { %v7876_v16 = vadd.f32 %v5808_v17, %v8252_v60  ;;  %v7885_v49 = vadd.f32 %v5872_v61, %v7777_v48 }
 0x1dc   : > { %v5809_v54 = vpop.f32.mrb[68].mxu1  ;;  %v5873_v37 = vpop.f32.mrb[68].mxu0 }
 0x1dd   : > { %v5810_v34 = vpop.f32.mrb[69].mxu1  ;;  %v5874_v42 = vpop.f32.mrb[69].mxu0 }
 0x1de   : > { %v5811_v57 = vadd.f32 %v5810_v34, %v5809_v54  ;;  %v5812_v19 = vpop.f32.mrb[70].mxu1  ;;  %v5875_v59 = vadd.f32 %v5874_v42, %v5873_v37  ;;  %v5876_v51 = vpop.f32.mrb[70].mxu0 }
 0x1df   : > { %v5813_v7 = vpop.f32.mrb[71].mxu1  ;;  %v5877_v40 = vpop.f32.mrb[71].mxu0 }
 0x1e0   : > { %v7882_v63 = vadd.f32 %v5811_v57, %v8254_v45  ;;  %v5814_v18 = vadd.f32 %v5813_v7, %v5812_v19  ;;  %v7891_v10 = vadd.f32 %v5875_v59, %v7791_v55  ;;  %v5878_v4 = vadd.f32 %v5877_v40, %v5876_v51  ;;  %v8258_v19 = vld [vmem:[#allocation21_spill] sm:$0xff]  ;;  %v8259_v7 = vld [vmem:[#allocation22_spill] sm:$0xff] }
 0x1e2   : > { %v7888_v11 = vadd.f32 %v5814_v18, %v8255_v24  ;;  %v7897_v2 = vadd.f32 %v5878_v4, %v7805_v31 }
 0x1e4   : > { %v5815_v32 = vpop.f32.mrb[72].mxu1  ;;  %v5879_v17 = vpop.f32.mrb[72].mxu0 }
 0x1e5   : > { %v5816_v25 = vpop.f32.mrb[73].mxu1  ;;  %v5880_v35 = vpop.f32.mrb[73].mxu0 }
 0x1e6   : > { %v5817_v62 = vadd.f32 %v5816_v25, %v5815_v32  ;;  %v5818_v3 = vpop.f32.mrb[74].mxu1  ;;  %v5881_v46 = vadd.f32 %v5880_v35, %v5879_v17  ;;  %v5882_v8 = vpop.f32.mrb[74].mxu0 }
 0x1e7   : > { %v5819_v27 = vpop.f32.mrb[75].mxu1  ;;  %v5883_v21 = vpop.f32.mrb[75].mxu0 }
 0x1e8   : > { %v7894_v48 = vadd.f32 %v5817_v62, %v8256_v26  ;;  %v5820_v44 = vadd.f32 %v5819_v27, %v5818_v3  ;;  %v7903_v34 = vadd.f32 %v5881_v46, %v7819_v52  ;;  %v5884_v29 = vadd.f32 %v5883_v21, %v5882_v8 }
 0x1ea   : > { %v7900_v5 = vadd.f32 %v5820_v44, %v8257_v50  ;;  %v7909_v61 = vadd.f32 %v5884_v29, %v7822_v58 }
 0x1ec   : > { %v5821_v60 = vpop.f32.mrb[76].mxu1  ;;  %v5885_v18 = vpop.f32.mrb[76].mxu0 }
 0x1ed   : > { %v5822_v54 = vpop.f32.mrb[77].mxu1  ;;  %v5886_v24 = vpop.f32.mrb[77].mxu0 }
 0x1ee   : > { %v5823_v55 = vadd.f32 %v5822_v54, %v5821_v60  ;;  %v5824_v38 = vpop.f32.mrb[78].mxu1  ;;  %v5887_v37 = vadd.f32 %v5886_v24, %v5885_v18  ;;  %v5888_v32 = vpop.f32.mrb[78].mxu0 }
 0x1ef   : > { %v5825_v57 = vpop.f32.mrb[79].mxu1  ;;  %v5889_v42 = vpop.f32.mrb[79].mxu0 }
 0x1f0   : > { %v7906_v31 = vadd.f32 %v5823_v55, %v8258_v19  ;;  %v5826_v30 = vadd.f32 %v5825_v57, %v5824_v38  ;;  %v7915_v52 = vadd.f32 %v5887_v37, %v7825_v22  ;;  %v5890_v25 = vadd.f32 %v5889_v42, %v5888_v32 }
 0x1f2   : > { %v7912_v45 = vadd.f32 %v5826_v30, %v8259_v7  ;;  %v7918_v59 = vadd.f32 %v5890_v25, %v7828_v36 }
 0x1f4   : > { %v5955_v51 = vpop.f32.mrb[80].mxu1  ;;  %v5891_v27 = vpop.f32.mrb[80].mxu0 }
 0x1f5   : > { %v5956_v62 = vpop.f32.mrb[81].mxu1  ;;  %v5892_v44 = vpop.f32.mrb[81].mxu0 }
 0x1f6   : > { %v5957_v3 = vadd.f32 %v5956_v62, %v5955_v51  ;;  %v5958_v58 = vpop.f32.mrb[82].mxu1  ;;  %v5893_v50 = vadd.f32 %v5892_v44, %v5891_v27  ;;  %v5894_v17 = vpop.f32.mrb[82].mxu0 }
 0x1f7   : > { %v5959_v40 = vpop.f32.mrb[83].mxu1  ;;  %v5895_v35 = vpop.f32.mrb[83].mxu0 }
 0x1f8   : > { %v5960_v4 = vadd.f32 %v5959_v40, %v5958_v58  ;;  %v7921_v26 = vadd.f32 %v5957_v3, %v7834_v13  ;;  %v7927_v36 = vadd.f32 %v5893_v50, %v7831_v53  ;;  %v5896_v60 = vadd.f32 %v5895_v35, %v5894_v17 }
 0x1fa   : > { %v7924_v22 = vadd.f32 %v5960_v4, %v7840_v23  ;;  %v7930_v46 = vadd.f32 %v5896_v60, %v7837_v28 }
 0x1fc   : > { %v5961_v8 = vpop.f32.mrb[84].mxu1  ;;  %v5897_v38 = vpop.f32.mrb[84].mxu0 }
 0x1fd   : > { %v5962_v54 = vpop.f32.mrb[85].mxu1  ;;  %v5898_v23 = vpop.f32.mrb[85].mxu0 }
 0x1fe   : > { %v5963_v21 = vadd.f32 %v5962_v54, %v5961_v8  ;;  %v5964_v55 = vpop.f32.mrb[86].mxu1  ;;  %v5899_v19 = vadd.f32 %v5898_v23, %v5897_v38  ;;  %v5900_v30 = vpop.f32.mrb[86].mxu0 }
 0x1ff   : > { %v5965_v13 = vpop.f32.mrb[87].mxu1  ;;  %v5901_v7 = vpop.f32.mrb[87].mxu0 }
 0x200   : > { %v5966_v29 = vadd.f32 %v5965_v13, %v5964_v55  ;;  %v7933_v57 = vadd.f32 %v5963_v21, %v7847_v9  ;;  %v7939_v28 = vadd.f32 %v5899_v19, %v7842_v0  ;;  %v5902_v18 = vadd.f32 %v5901_v7, %v5900_v30 }
 0x202   : > { %v7936_v53 = vadd.f32 %v5966_v29, %v7850_v1  ;;  %v7942_v24 = vadd.f32 %v5902_v18, %v7844_v20 }
 0x204   : > { %v5967_v37 = vpop.f32.mrb[88].mxu1  ;;  %v5903_v51 = vpop.f32.mrb[88].mxu0 }
 0x205   : > { %v5968_v32 = vpop.f32.mrb[89].mxu1  ;;  %v5904_v1 = vpop.f32.mrb[89].mxu0 }
 0x206   : > { %v5969_v42 = vadd.f32 %v5968_v32, %v5967_v37  ;;  %v5970_v25 = vpop.f32.mrb[90].mxu1  ;;  %v5905_v58 = vadd.f32 %v5904_v1, %v5903_v51  ;;  %v5906_v40 = vpop.f32.mrb[90].mxu0 }
 0x207   : > { %v5971_v9 = vpop.f32.mrb[91].mxu1  ;;  %v5907_v27 = vpop.f32.mrb[91].mxu0 }
 0x208   : > { %v5972_v62 = vadd.f32 %v5971_v9, %v5970_v25  ;;  %v7945_v3 = vadd.f32 %v5969_v42, %v7857_v43  ;;  %v7951_v20 = vadd.f32 %v5905_v58, %v7852_v47  ;;  %v5908_v4 = vadd.f32 %v5907_v27, %v5906_v40 }
 0x209   : > { %v6527_v47 = vmov 0.0  }
 0x20a   : > { %v7948_v0 = vadd.f32 %v5972_v62, %v7862_v39  ;;  %v7954_v44 = vadd.f32 %v5908_v4, %v7854_v41  ;;  %289 = vst [vmem:[%s7960_s22] sm:$0x3] %v6527_v47 }
 0x20c   : > { %v5973_v50 = vpop.f32.mrb[92].mxu1 }
 0x20d   : > { %v5974_v17 = vpop.f32.mrb[93].mxu1 }
 0x20e   : > { %v5975_v35 = vadd.f32 %v5974_v17, %v5973_v50  ;;  %v5976_v60 = vpop.f32.mrb[94].mxu1  ;;  %v5909_v8 = vpop.f32.mrb[92].mxu0 }
 0x20f   : > { %v5977_v43 = vpop.f32.mrb[95].mxu1  ;;  %v5910_v39 = vpop.f32.mrb[93].mxu0 }
 0x210   : > { %v5978_v54 = vadd.f32 %v5977_v43, %v5976_v60  ;;  %v7958_v21 = vadd.f32 %v5975_v35, %v7867_v12  ;;  %v5911_v55 = vadd.f32 %v5910_v39, %v5909_v8  ;;  %v5912_v41 = vpop.f32.mrb[94].mxu0 }
 0x211   : > { %v5913_v38 = vpop.f32.mrb[95].mxu0 }
 0x212   : > { %v7964_v13 = vadd.f32 %v5978_v54, %v7873_v14  ;;  %v7967_v29 = vadd.f32 %v5911_v55, %v7859_v15  ;;  %v5914_v23 = vadd.f32 %v5913_v38, %v5912_v41 }
 0x214   : > { %v7970_v19 = vadd.f32 %v5914_v23, %v7864_v6 }
 0x215   : > { %v5979_v12 = vpop.f32.mrb[96].mxu1 }
 0x216   : > { %v5980_v30 = vpop.f32.mrb[97].mxu1 }
 0x217   : > { %v5981_v7 = vadd.f32 %v5980_v30, %v5979_v12  ;;  %v5982_v18 = vpop.f32.mrb[98].mxu1 }
 0x218   : > { %v5915_v37 = vpop.f32.mrb[96].mxu0  ;;  %v5983_v32 = vpop.f32.mrb[99].mxu1 }
 0x219   : > { %v5916_v42 = vpop.f32.mrb[97].mxu0  ;;  %v5984_v25 = vadd.f32 %v5983_v32, %v5982_v18  ;;  %v7973_v9 = vadd.f32 %v5981_v7, %v7879_v33 }
 0x21a   : > { %v5917_v14 = vadd.f32 %v5916_v42, %v5915_v37  ;;  %v5918_v51 = vpop.f32.mrb[98].mxu0 }
 0x21b   : > { %v5919_v62 = vpop.f32.mrb[99].mxu0  ;;  %v7976_v15 = vadd.f32 %v5984_v25, %v7885_v49 }
 0x21c   : > { %v7979_v6 = vadd.f32 %v5917_v14, %v7870_v56  ;;  %v5920_v1 = vadd.f32 %v5919_v62, %v5918_v51 }
 0x21e   : > { %v7982_v58 = vadd.f32 %v5920_v1, %v7876_v16 }
 0x21f   : > { %v5985_v40 = vpop.f32.mrb[100].mxu1 }
 0x220   : > { %v5986_v27 = vpop.f32.mrb[101].mxu1 }
 0x221   : > { %v5987_v4 = vadd.f32 %v5986_v27, %v5985_v40  ;;  %v5988_v50 = vpop.f32.mrb[102].mxu1 }
 0x222   : > { %v5921_v17 = vpop.f32.mrb[100].mxu0  ;;  %v5989_v33 = vpop.f32.mrb[103].mxu1 }
 0x223   : > { %v5922_v35 = vpop.f32.mrb[101].mxu0  ;;  %v5990_v60 = vadd.f32 %v5989_v33, %v5988_v50  ;;  %v7985_v43 = vadd.f32 %v5987_v4, %v7891_v10 }
 0x224   : > { %v5923_v49 = vadd.f32 %v5922_v35, %v5921_v17  ;;  %v5924_v8 = vpop.f32.mrb[102].mxu0 }
 0x225   : > { %v5925_v54 = vpop.f32.mrb[103].mxu0  ;;  %v7988_v56 = vadd.f32 %v5990_v60, %v7897_v2 }
 0x226   : > { %v7991_v16 = vadd.f32 %v5923_v49, %v7882_v63  ;;  %v5926_v47 = vadd.f32 %v5925_v54, %v5924_v8 }
 0x228   : > { %v7994_v39 = vadd.f32 %v5926_v47, %v7888_v11 }
 0x22d   : > { %v5991_v55 = vpop.f32.mrb[104].mxu1 }
 0x22e   : > { %v5992_v41 = vpop.f32.mrb[105].mxu1 }
 0x22f   : > { %v5993_v38 = vadd.f32 %v5992_v41, %v5991_v55  ;;  %v5994_v23 = vpop.f32.mrb[106].mxu1 }
 0x230   : > { %v5927_v12 = vpop.f32.mrb[104].mxu0  ;;  %v5995_v10 = vpop.f32.mrb[107].mxu1 }
 0x231   : > { %v5928_v30 = vpop.f32.mrb[105].mxu0  ;;  %v5996_v7 = vadd.f32 %v5995_v10, %v5994_v23  ;;  %v7997_v18 = vadd.f32 %v5993_v38, %v7903_v34 }
 0x232   : > { %v5929_v2 = vadd.f32 %v5928_v30, %v5927_v12  ;;  %v5930_v37 = vpop.f32.mrb[106].mxu0 }
 0x233   : > { %v5931_v32 = vpop.f32.mrb[107].mxu0  ;;  %v8000_v63 = vadd.f32 %v5996_v7, %v7909_v61 }
 0x234   : > { %v8003_v11 = vadd.f32 %v5929_v2, %v7894_v48  ;;  %v5932_v42 = vadd.f32 %v5931_v32, %v5930_v37 }
 0x236   : > { %v8006_v25 = vadd.f32 %v5932_v42, %v7900_v5 }
 0x237   : > { %v5997_v14 = vpop.f32.mrb[108].mxu1 }
 0x238   : > { %v5998_v51 = vpop.f32.mrb[109].mxu1 }
 0x239   : > { %v5933_v62 = vpop.f32.mrb[108].mxu0  ;;  %v5999_v1 = vadd.f32 %v5998_v51, %v5997_v14  ;;  %v6000_v34 = vpop.f32.mrb[110].mxu1 }
 0x23a   : > { %v5934_v40 = vpop.f32.mrb[109].mxu0  ;;  %v6001_v27 = vpop.f32.mrb[111].mxu1 }
 0x23b   : > { %v5935_v4 = vadd.f32 %v5934_v40, %v5933_v62  ;;  %v5936_v50 = vpop.f32.mrb[110].mxu0  ;;  %v6002_v17 = vadd.f32 %v6001_v27, %v6000_v34  ;;  %v8009_v61 = vadd.f32 %v5999_v1, %v7915_v52 }
 0x23c   : > { %v5937_v48 = vpop.f32.mrb[111].mxu0 }
 0x23d   : > { %v8012_v33 = vadd.f32 %v5935_v4, %v7906_v31  ;;  %v5938_v5 = vadd.f32 %v5937_v48, %v5936_v50  ;;  %v8015_v35 = vadd.f32 %v6002_v17, %v7918_v59 }
 0x23f   : > { %v8018_v60 = vadd.f32 %v5938_v5, %v7912_v45 }
 0x241   : > { %v6003_v49 = vpop.f32.mrb[112].mxu1  ;;  %v6093_v8 = vpop.f32.mrb[112].mxu0 }
 0x242   : > { %v6004_v54 = vpop.f32.mrb[113].mxu1  ;;  %v4537_v47 = vadd.f32 %v6093_v8, %v7933_v57  ;;  %v4528_v52 = vpop.f32.mrb[113].mxu0 }
 0x243   : > { %v6005_v55 = vadd.f32 %v6004_v54, %v6003_v49  ;;  %v6006_v41 = vpop.f32.mrb[114].mxu1  ;;  %v4529_v38 = vadd.f32 %v4528_v52, %v7921_v26  ;;  %v6094_v31 = vpop.f32.mrb[114].mxu0 }
 0x244   : > { %v6007_v23 = vpop.f32.mrb[115].mxu1  ;;  %v4540_v12 = vadd.f32 %v6094_v31, %v7936_v53  ;;  %v4531_v10 = vpop.f32.mrb[115].mxu0  ;;  %4721 = vst [vmem:[%s8028_s10 + $0x10] sm:$0xff] %v4537_v47  ;;  %v4828_v42 = vmul.f32 %v4537_v47, %v4537_v47 }
 0x245   : > { %v6008_v59 = vadd.f32 %v6007_v23, %v6006_v41  ;;  %v8025_v45 = vadd.f32 %v6005_v55, %v7927_v36  ;;  %v4532_v30 = vadd.f32 %v4531_v10, %v7924_v22  ;;  %4719 = vst [vmem:[%s8028_s10] sm:$0xff] %v4529_v38  ;;  %v4826_v53 = vmul.f32 %v4529_v38, %v4529_v38 }
 0x246   : > { %4722 = vst [vmem:[%s8028_s10 + $0x18] sm:$0xff] %v4540_v12  ;;  %v4829_v34 = vmul.f32 %v4540_v12, %v4540_v12 }
 0x247   : > { %v8032_v26 = vadd.f32 %v6008_v59, %v7930_v46  ;;  %v4752_v57 = vadd.f32 %v4532_v30, %v4529_v38  ;;  %4720 = vst [vmem:[%s8028_s10 + $0x8] sm:$0xff] %v4532_v30  ;;  %v4827_v36 = vmul.f32 %v4532_v30, %v4532_v30 }
 0x249   : > { %v4753_v7 = vadd.f32 %v4752_v57, %v4537_v47  ;;  %v6097_v2 = vpop.f32.mrb[116].mxu0  ;;  %v4858_v14 = vadd.f32 %v4827_v36, %v4826_v53 }
 0x24a   : > { %v6009_v37 = vpop.f32.mrb[116].mxu1  ;;  %v4553_v22 = vadd.f32 %v6097_v2, %v7958_v21  ;;  %v4544_v32 = vpop.f32.mrb[117].mxu0 }
 0x24b   : > { %v6010_v51 = vpop.f32.mrb[117].mxu1  ;;  %v4545_v46 = vadd.f32 %v4544_v32, %v7945_v3  ;;  %v4754_v62 = vadd.f32 %v4753_v7, %v4540_v12  ;;  %v6098_v1 = vpop.f32.mrb[118].mxu0  ;;  %v4859_v17 = vadd.f32 %v4858_v14, %v4828_v42 }
 0x24c   : > { %v6011_v40 = vadd.f32 %v6010_v51, %v6009_v37  ;;  %v6012_v27 = vpop.f32.mrb[118].mxu1  ;;  %v4556_v4 = vadd.f32 %v6098_v1, %v7964_v13  ;;  %v4547_v50 = vpop.f32.mrb[119].mxu0  ;;  %4725 = vst [vmem:[%s8028_s10 + $0x30] sm:$0xff] %v4553_v22 }
 0x24d   : > { %v4755_v21 = vadd.f32 %v4754_v62, %v4545_v46  ;;  %v6013_v48 = vpop.f32.mrb[119].mxu1  ;;  %v4548_v5 = vadd.f32 %v4547_v50, %v7948_v0  ;;  %4723 = vst [vmem:[%s8028_s10 + $0x20] sm:$0xff] %v4545_v46  ;;  %v4830_v3 = vmul.f32 %v4545_v46, %v4545_v46  ;;  %v4860_v54 = vadd.f32 %v4859_v17, %v4829_v34 }
 0x24e   : > { %v6014_v49 = vadd.f32 %v6013_v48, %v6012_v27  ;;  %v8043_v8 = vadd.f32 %v6011_v40, %v7939_v28  ;;  %4726 = vst [vmem:[%s8028_s10 + $0x38] sm:$0xff] %v4556_v4  ;;  %v4832_v28 = vmul.f32 %v4553_v22, %v4553_v22 }
 0x24f   : > { %v4756_v47 = vadd.f32 %v4755_v21, %v4548_v5  ;;  %v4861_v13 = vadd.f32 %v4860_v54, %v4830_v3  ;;  %4724 = vst [vmem:[%s8028_s10 + $0x28] sm:$0xff] %v4548_v5  ;;  %v4831_v41 = vmul.f32 %v4548_v5, %v4548_v5 }
 0x250   : > { %v8048_v55 = vadd.f32 %v6014_v49, %v7942_v24  ;;  %v4833_v24 = vmul.f32 %v4556_v4, %v4556_v4 }
 0x251   : > { %v4757_v52 = vadd.f32 %v4756_v47, %v4553_v22  ;;  %v6101_v38 = vpop.f32.mrb[120].mxu0  ;;  %v4862_v12 = vadd.f32 %v4861_v13, %v4831_v41 }
 0x252   : > { %v6015_v31 = vpop.f32.mrb[120].mxu1  ;;  %v4569_v0 = vadd.f32 %v6101_v38, %v7985_v43  ;;  %v4560_v23 = vpop.f32.mrb[121].mxu0 }
 0x253   : > { %v6016_v59 = vpop.f32.mrb[121].mxu1  ;;  %v4561_v10 = vadd.f32 %v4560_v23, %v7973_v9  ;;  %v4758_v30 = vadd.f32 %v4757_v52, %v4556_v4  ;;  %v6102_v57 = vpop.f32.mrb[122].mxu0  ;;  %v4863_v37 = vadd.f32 %v4862_v12, %v4832_v28 }
 0x254   : > { %v6017_v53 = vadd.f32 %v6016_v59, %v6015_v31  ;;  %v6018_v7 = vpop.f32.mrb[122].mxu1  ;;  %v4572_v36 = vadd.f32 %v6102_v57, %v7988_v56  ;;  %v4563_v2 = vpop.f32.mrb[123].mxu0  ;;  %4729 = vst [vmem:[%s8028_s10 + $0x50] sm:$0xff] %v4569_v0  ;;  %v4836_v27 = vmul.f32 %v4569_v0, %v4569_v0 }
 0x255   : > { %v4759_v43 = vadd.f32 %v4758_v30, %v4561_v10  ;;  %v6019_v32 = vpop.f32.mrb[123].mxu1  ;;  %v4564_v22 = vadd.f32 %v4563_v2, %v7976_v15  ;;  %4727 = vst [vmem:[%s8028_s10 + $0x40] sm:$0xff] %v4561_v10  ;;  %v4834_v9 = vmul.f32 %v4561_v10, %v4561_v10  ;;  %v4864_v51 = vadd.f32 %v4863_v37, %v4833_v24 }
 0x256   : > { %v6020_v42 = vadd.f32 %v6019_v32, %v6018_v7  ;;  %v8057_v14 = vadd.f32 %v6017_v53, %v7951_v20  ;;  %4730 = vst [vmem:[%s8028_s10 + $0x58] sm:$0xff] %v4572_v36  ;;  %v4837_v5 = vmul.f32 %v4572_v36, %v4572_v36 }
 0x257   : > { %v4760_v46 = vadd.f32 %v4759_v43, %v4564_v22  ;;  %v4865_v56 = vadd.f32 %v4864_v51, %v4834_v9  ;;  %4728 = vst [vmem:[%s8028_s10 + $0x48] sm:$0xff] %v4564_v22  ;;  %v4835_v34 = vmul.f32 %v4564_v22, %v4564_v22 }
 0x258   : > { %v8062_v62 = vadd.f32 %v6020_v42, %v7954_v44 }
 0x259   : > { %v4761_v1 = vadd.f32 %v4760_v46, %v4569_v0  ;;  %v4866_v15 = vadd.f32 %v4865_v56, %v4835_v34 }
 0x25b   : > { %v6105_v40 = vpop.f32.mrb[124].mxu0  ;;  %v4762_v50 = vadd.f32 %v4761_v1, %v4572_v36  ;;  %v4867_v44 = vadd.f32 %v4866_v15, %v4836_v27 }
 0x25c   : > { %v4585_v4 = vadd.f32 %v6105_v40, %v8009_v61  ;;  %v4576_v20 = vpop.f32.mrb[125].mxu0  ;;  %v6021_v17 = vpop.f32.mrb[124].mxu1 }
 0x25d   : > { %v4577_v21 = vadd.f32 %v4576_v20, %v7997_v18  ;;  %v6106_v48 = vpop.f32.mrb[126].mxu0  ;;  %v6022_v49 = vpop.f32.mrb[125].mxu1  ;;  %v4868_v41 = vadd.f32 %v4867_v44, %v4837_v5 }
 0x25e   : > { %v4588_v3 = vadd.f32 %v6106_v48, %v8015_v35  ;;  %v4579_v54 = vpop.f32.mrb[127].mxu0  ;;  %v6023_v47 = vadd.f32 %v6022_v49, %v6021_v17  ;;  %v6024_v52 = vpop.f32.mrb[126].mxu1  ;;  %4733 = vst [vmem:[%s8028_s10 + $0x70] sm:$0xff] %v4585_v4  ;;  %v4840_v30 = vmul.f32 %v4585_v4, %v4585_v4 }
 0x25f   : > { %v4763_v13 = vadd.f32 %v4762_v50, %v4577_v21  ;;  %v4580_v61 = vadd.f32 %v4579_v54, %v8000_v63  ;;  %v6025_v38 = vpop.f32.mrb[127].mxu1  ;;  %4731 = vst [vmem:[%s8028_s10 + $0x60] sm:$0xff] %v4577_v21  ;;  %v4838_v31 = vmul.f32 %v4577_v21, %v4577_v21 }
 0x260   : > { %v6026_v18 = vadd.f32 %v6025_v38, %v6024_v52  ;;  %4734 = vst [vmem:[%s8028_s10 + $0x78] sm:$0xff] %v4588_v3  ;;  %v4456_v23 = vadd.f32 %v6023_v47, %v7967_v29  ;;  %v4841_v29 = vmul.f32 %v4588_v3, %v4588_v3 }
 0x261   : > { %v4764_v0 = vadd.f32 %v4763_v13, %v4580_v61  ;;  %v4869_v28 = vadd.f32 %v4868_v41, %v4838_v31  ;;  %4732 = vst [vmem:[%s8028_s10 + $0x68] sm:$0xff] %v4580_v61  ;;  %v4839_v12 = vmul.f32 %v4580_v61, %v4580_v61 }
 0x262   : > { %v4459_v59 = vadd.f32 %v6026_v18, %v7970_v19 }
 0x263   : > { %v4765_v35 = vadd.f32 %v4764_v0, %v4585_v4  ;;  %v6109_v10 = vpop.f32.mrb[128].mxu0  ;;  %v4870_v57 = vadd.f32 %v4869_v28, %v4839_v12 }
 0x264   : > { %v4601_v63 = vadd.f32 %v6109_v10, %v8043_v8  ;;  %v4592_v24 = vpop.f32.mrb[129].mxu0 }
 0x265   : > { %v4766_v53 = vadd.f32 %v4765_v35, %v4588_v3  ;;  %v4593_v36 = vadd.f32 %v4592_v24, %v8025_v45  ;;  %v6110_v2 = vpop.f32.mrb[130].mxu0  ;;  %v4871_v37 = vadd.f32 %v4870_v57, %v4840_v30 }
 0x266   : > { %v6027_v7 = vpop.f32.mrb[128].mxu1  ;;  %v4604_v32 = vadd.f32 %v6110_v2, %v8048_v55  ;;  %v4595_v19 = vpop.f32.mrb[131].mxu0  ;;  %4737 = vst [vmem:[%s8028_s10 + $0x90] sm:$0xff] %v4601_v63  ;;  %v4844_v4 = vmul.f32 %v4601_v63, %v4601_v63 }
 0x267   : > { %v6028_v43 = vpop.f32.mrb[129].mxu1  ;;  %v4767_v42 = vadd.f32 %v4766_v53, %v4593_v36  ;;  %v4596_v8 = vadd.f32 %v4595_v19, %v8032_v26  ;;  %v4872_v51 = vadd.f32 %v4871_v37, %v4841_v29  ;;  %4735 = vst [vmem:[%s8028_s10 + $0x80] sm:$0xff] %v4593_v36  ;;  %v4842_v56 = vmul.f32 %v4593_v36, %v4593_v36 }
 0x268   : > { %v6029_v22 = vadd.f32 %v6028_v43, %v6027_v7  ;;  %v6030_v9 = vpop.f32.mrb[130].mxu1  ;;  %4738 = vst [vmem:[%s8028_s10 + $0x98] sm:$0xff] %v4604_v32  ;;  %v4845_v21 = vmul.f32 %v4604_v32, %v4604_v32 }
 0x269   : > { %v6031_v46 = vpop.f32.mrb[131].mxu1  ;;  %v4768_v1 = vadd.f32 %v4767_v42, %v4596_v8  ;;  %v4873_v40 = vadd.f32 %v4872_v51, %v4842_v56  ;;  %4736 = vst [vmem:[%s8028_s10 + $0x88] sm:$0xff] %v4596_v8  ;;  %v4843_v27 = vmul.f32 %v4596_v8, %v4596_v8 }
 0x26a   : > { %v6032_v45 = vadd.f32 %v6031_v46, %v6030_v9  ;;  %v4464_v34 = vadd.f32 %v6029_v22, %v7979_v6 }
 0x26b   : > { %v4769_v55 = vadd.f32 %v4768_v1, %v4601_v63  ;;  %v4874_v20 = vadd.f32 %v4873_v40, %v4843_v27 }
 0x26c   : > { %v4467_v15 = vadd.f32 %v6032_v45, %v7982_v58 }
 0x26d   : > { %v4770_v50 = vadd.f32 %v4769_v55, %v4604_v32  ;;  %v4875_v48 = vadd.f32 %v4874_v20, %v4844_v4 }
 0x26e   : > { %v6033_v26 = vpop.f32.mrb[132].mxu1  ;;  %v6113_v17 = vpop.f32.mrb[132].mxu0 }
 0x26f   : > { %v4617_v5 = vadd.f32 %v6113_v17, %v4456_v23  ;;  %v6034_v44 = vpop.f32.mrb[133].mxu1  ;;  %v4608_v49 = vpop.f32.mrb[133].mxu0  ;;  %v4876_v58 = vadd.f32 %v4875_v48, %v4845_v21 }
 0x270   : > { %v6035_v3 = vadd.f32 %v6034_v44, %v6033_v26  ;;  %v4609_v6 = vadd.f32 %v4608_v49, %v8057_v14  ;;  %v6036_v54 = vpop.f32.mrb[134].mxu1  ;;  %v6114_v47 = vpop.f32.mrb[134].mxu0 }
 0x271   : > { %v4620_v13 = vadd.f32 %v6114_v47, %v4459_v59  ;;  %v6037_v52 = vpop.f32.mrb[135].mxu1  ;;  %v4611_v61 = vpop.f32.mrb[135].mxu0  ;;  %4741 = vst [vmem:[%s8028_s10 + $0xb0] sm:$0xff] %v4617_v5  ;;  %v4848_v53 = vmul.f32 %v4617_v5, %v4617_v5 }
 0x272   : > { %v4771_v41 = vadd.f32 %v4770_v50, %v4609_v6  ;;  %v6038_v38 = vadd.f32 %v6037_v52, %v6036_v54  ;;  %v4612_v31 = vadd.f32 %v4611_v61, %v8062_v62  ;;  %v4472_v18 = vadd.f32 %v6035_v3, %v7991_v16  ;;  %4739 = vst [vmem:[%s8028_s10 + $0xa0] sm:$0xff] %v4609_v6 }
 0x273   : > { %v4846_v0 = vmul.f32 %v4609_v6, %v4609_v6  ;;  %4742 = vst [vmem:[%s8028_s10 + $0xb8] sm:$0xff] %v4620_v13 }
 0x274   : > { %v4772_v23 = vadd.f32 %v4771_v41, %v4612_v31  ;;  %v4475_v14 = vadd.f32 %v6038_v38, %v7994_v39  ;;  %4740 = vst [vmem:[%s8028_s10 + $0xa8] sm:$0xff] %v4612_v31  ;;  %v4847_v12 = vmul.f32 %v4612_v31, %v4612_v31 }
 0x275   : > { %v4877_v28 = vadd.f32 %v4876_v58, %v4846_v0 }
 0x276   : > { %v4773_v35 = vadd.f32 %v4772_v23, %v4617_v5  ;;  %v6117_v59 = vpop.f32.mrb[136].mxu0 }
 0x277   : > { %v4633_v10 = vadd.f32 %v6117_v59, %v4472_v18  ;;  %v4624_v30 = vpop.f32.mrb[137].mxu0  ;;  %v4878_v16 = vadd.f32 %v4877_v28, %v4847_v12 }
 0x278   : > { %v6039_v57 = vpop.f32.mrb[136].mxu1  ;;  %v4625_v62 = vadd.f32 %v4624_v30, %v4464_v34  ;;  %v4774_v63 = vadd.f32 %v4773_v35, %v4620_v13  ;;  %v6118_v24 = vpop.f32.mrb[138].mxu0 }
 0x279   : > { %v6040_v7 = vpop.f32.mrb[137].mxu1  ;;  %v4636_v39 = vadd.f32 %v6118_v24, %v4475_v14  ;;  %v4627_v36 = vpop.f32.mrb[139].mxu0  ;;  %4745 = vst [vmem:[%s8028_s10 + $0xd0] sm:$0xff] %v4633_v10  ;;  %v4879_v19 = vadd.f32 %v4878_v16, %v4848_v53 }
 0x27a   : > { %v6041_v2 = vadd.f32 %v6040_v7, %v6039_v57  ;;  %v4775_v29 = vadd.f32 %v4774_v63, %v4625_v62  ;;  %v6042_v37 = vpop.f32.mrb[138].mxu1  ;;  %v4628_v43 = vadd.f32 %v4627_v36, %v4467_v15  ;;  %4743 = vst [vmem:[%s8028_s10 + $0xc0] sm:$0xff] %v4625_v62  ;;  %v4817_v8 = vld [vmem:[%s8028_s10 + $0xb8] sm:$0xff] }
 0x27b   : > { %v6043_v32 = vpop.f32.mrb[139].mxu1  ;;  %4746 = vst [vmem:[%s8028_s10 + $0xd8] sm:$0xff] %v4636_v39  ;;  %v4849_v40 = vmul.f32 %v4817_v8, %v4817_v8 }
 0x27c   : > { %v6044_v22 = vadd.f32 %v6043_v32, %v6042_v37  ;;  %v4776_v42 = vadd.f32 %v4775_v29, %v4628_v43  ;;  %v4480_v9 = vadd.f32 %v6041_v2, %v8003_v11  ;;  %4744 = vst [vmem:[%s8028_s10 + $0xc8] sm:$0xff] %v4628_v43 }
 0x27d   : > { %v4880_v49 = vadd.f32 %v4879_v19, %v4849_v40 }
 0x27e   : > { %v4777_v51 = vadd.f32 %v4776_v42, %v4633_v10  ;;  %v4483_v46 = vadd.f32 %v6044_v22, %v8006_v25 }
 0x280   : > { %v6121_v56 = vpop.f32.mrb[140].mxu0  ;;  %v4778_v34 = vadd.f32 %v4777_v51, %v4636_v39  ;;  %v4820_v5 = vld [vmem:[%s8028_s10 + $0xd0] sm:$0xff] }
 0x281   : > { %v6045_v45 = vpop.f32.mrb[140].mxu1  ;;  %v4640_v1 = vpop.f32.mrb[141].mxu0  ;;  %v4818_v25 = vld [vmem:[%s8028_s10 + $0xc0] sm:$0xff]  ;;  %v4852_v52 = vmul.f32 %v4820_v5, %v4820_v5 }
 0x282   : > { %v6046_v55 = vpop.f32.mrb[141].mxu1  ;;  %v4641_v27 = vadd.f32 %v4640_v1, %v4480_v9  ;;  %v6122_v15 = vpop.f32.mrb[142].mxu0  ;;  %v4850_v44 = vmul.f32 %v4818_v25, %v4818_v25 }
 0x283   : > { %v6047_v4 = vadd.f32 %v6046_v55, %v6045_v45  ;;  %v6048_v11 = vpop.f32.mrb[142].mxu1  ;;  %v4643_v20 = vpop.f32.mrb[143].mxu0  ;;  %v4819_v6 = vld [vmem:[%s8028_s10 + $0xc8] sm:$0xff] }
 0x284   : > { %v4779_v50 = vadd.f32 %v4778_v34, %v4641_v27  ;;  %v6049_v26 = vpop.f32.mrb[143].mxu1  ;;  %v4644_v17 = vadd.f32 %v4643_v20, %v4483_v46  ;;  %4747 = vst [vmem:[%s8028_s10 + $0xe0] sm:$0xff] %v4641_v27  ;;  %v4851_v58 = vmul.f32 %v4819_v6, %v4819_v6  ;;  %v4881_v13 = vadd.f32 %v4880_v49, %v4850_v44 }
 0x285   : > { %v4488_v21 = vadd.f32 %v6047_v4, %v8012_v33  ;;  %v6050_v48 = vadd.f32 %v6049_v26, %v6048_v11  ;;  %v4821_v33 = vld [vmem:[%s8028_s10 + $0xd8] sm:$0xff] }
 0x286   : > { %v4780_v3 = vadd.f32 %v4779_v50, %v4644_v17  ;;  %4748 = vst [vmem:[%s8028_s10 + $0xe8] sm:$0xff] %v4644_v17  ;;  %v4882_v38 = vadd.f32 %v4881_v13, %v4851_v58  ;;  %v4853_v31 = vmul.f32 %v4821_v33, %v4821_v33 }
 0x287   : > { %v4649_v54 = vadd.f32 %v6121_v56, %v4488_v21  ;;  %v4491_v47 = vadd.f32 %v6050_v48, %v8018_v60 }
 0x288   : > { %v4883_v18 = vadd.f32 %v4882_v38, %v4852_v52 }
 0x289   : > { %v4652_v61 = vadd.f32 %v6122_v15, %v4491_v47  ;;  %v4781_v41 = vadd.f32 %v4780_v3, %v4649_v54  ;;  %4749 = vst [vmem:[%s8028_s10 + $0xf0] sm:$0xff] %v4649_v54 }
 0x28a   : > { %v4884_v14 = vadd.f32 %v4883_v18, %v4853_v31 }
 0x28b   : > { %v4782_v60 = vadd.f32 %v4781_v41, %v4652_v61  ;;  %4750 = vst [vmem:[%s8028_s10 + $0xf8] sm:$0xff] %v4652_v61  ;;  %v4822_v23 = vld [vmem:[%s8028_s10 + $0xe0] sm:$0xff] }
 0x28d   : > { %v4783_v0 = vrot.slane %v4782_v60, 4 }
 0x28e   : > { %6416 = shalt.err (!%p6413_p5)
}
 0x28f   : > { %s6417_s6 = scalar_lea.hbm %s8113_s19, 4096  ;;  %s6421_s24 = scalar_lea.hbm %s8206_s2, 8192 }
 0x290   : > { %p6418_p9 = scmp.ne.s32.totalorder %s8113_s19, %s6417_s6  ;;  %p6422_p3 = scmp.lt.u32.totalorder %s8113_s19, %s8206_s2 }
 0x291   : > { %p6423_p7 = scmp.lt.u32.totalorder %s6421_s24, %s6417_s6  ;;  %p6425_p4 = scmp.lt.u32.totalorder %s6417_s6, %s8113_s19 }
 0x292   : > { %p6419_p1 = pnand %p6418_p9, %p6647_p10 }
 0x293   : > { %p6424_p11 = por %p6423_p7, %p6422_p3 }
 0x294   : > { %p6420_p2 = pneg %p6419_p1 }
 0x295   : > { %p6426_p6 = por %p6425_p4, %p6424_p11 }
 0x297   : > { %p6427_p8 = pnand %p6426_p6, %p6420_p2 }
 0x299   : > { %6430 = shalt.err (!%p6427_p8)
}
 0x29a   : > { %s6529_s18 = smov 128   ;;  %s6530_s21 = smov 8   ;;  %v4854_v28 = vmul.f32 %v4822_v23, %v4822_v23  ;;  %v4784_v35 = vadd.f32 %v4783_v0, %v4782_v60  ;;  %v4823_v12 = vld [vmem:[%s8028_s10 + $0xe8] sm:$0xff]  ;;  %v4824_v57 = vld [vmem:[%s8028_s10 + $0xf0] sm:$0xff]  ;;  %v4825_v16 = vld [vmem:[%s8028_s10 + $0xf8] sm:$0xff] }
 0x29b   : > { %6148 = dma.vmem_to_hbm [thread:$0]  (%p6647_p10), %s8115_s7, 4096, %s8113_s19, %s4897_s30, %s6529_s18, %s6529_s18, %s6530_s21   ;;  %v4855_v59 = vmul.f32 %v4823_v12, %v4823_v12  ;;  %v4856_v24 = vmul.f32 %v4824_v57, %v4824_v57  ;;  %v4857_v7 = vmul.f32 %v4825_v16, %v4825_v16 }
 0x29c   : > { %v4885_v10 = vadd.f32 %v4884_v14, %v4854_v28  ;;  %v4785_v30 = vrot.slane %v4784_v35, 2  ;;  %v4751_v36 = vld [vmem:[%s7960_s22] sm:$0x1]  ;;  %s5599_s7 = sshll.u32 %s6513_s15, 5  ;;  %s4933_s19 = sshll.u32 %s7960_s22, 4  ;;  %s8156_s19 = int_to_ptr.vmem [resolvable:$true] %s4933_s19 }
 0x29d   : > { %s8154_s27 = scalar_lea.hbm %s8207_s3, %s5599_s7  ;;  %s4902_s4 = scalar_lea.sflag [#allocation10], %s6704_s25 }
 0x29e   : > { %v4886_v62 = vadd.f32 %v4885_v10, %v4855_v59  ;;  %v4786_v63 = vadd.f32 %v4785_v30, %v4784_v35  ;;  %s6431_s26 = scalar_lea.vmem %s8156_s19, 32  ;;  %s6531_s15 = smov [#allocation9]  }
 0x29f   : > { %p6432_p12 = scmp.ne.s32.totalorder %s8156_s19, %s6431_s26  ;;  %s6435_s6 = sshll.u32 %s6531_s15, 4  ;;  %s6436_s6 = int_to_ptr.vmem [resolvable:$false] %s6435_s6 }
 0x2a0   : > { %v4787_v53 = vrot.slane %v4786_v63, 1  ;;  %v4887_v39 = vadd.f32 %v4886_v62, %v4856_v24  ;;  %s6437_s9 = scalar_lea.vmem %s6436_s6, 64  ;;  %p6438_p5 = scmp.lt.s32.totalorder %s8156_s19, %s6436_s6 }
 0x2a1   : > { %p6433_p13 = pnand %p6432_p12, %p6647_p10  ;;  %p6439_p9 = scmp.lt.s32.totalorder %s6437_s9, %s6431_s26 }
 0x2a2   : > { %v4788_v2 = vadd.f32 %v4787_v53, %v4786_v63  ;;  %v4888_v29 = vadd.f32 %v4887_v39, %v4857_v7 }
 0x2a3   : > { %p6434_p0 = pneg %p6433_p13  ;;  %p6440_p1 = por %p6439_p9, %p6438_p5 }
 0x2a4   : > { %v4789_v37 = vadd.f32 %v4788_v2, %v4751_v36  ;;  %v4889_v43 = vrot.slane %v4888_v29, 4 }
 0x2a5   : > { %p6441_p2 = pnand %p6440_p1, %p6434_p0 }
 0x2a6   : > { %4790 = vst [vmem:[%s7960_s22] sm:$0x1] %v4789_v37  ;;  %v4890_v32 = vadd.f32 %v4889_v43, %v4888_v29 }
 0x2a8   : > { %v4891_v19 = vrot.slane %v4890_v32, 2 }
 0x2aa   : > { %v4892_v22 = vadd.f32 %v4891_v19, %v4890_v32 }
 0x2ac   : > { %v4893_v42 = vrot.slane %v4892_v22, 1 }
 0x2ae   : > { %v4894_v9 = vadd.f32 %v4893_v42, %v4892_v22 }
 0x2b0   : > { %4895 = vst [vmem:[%s7960_s22 + $0x1] sm:$0x1] %v4894_v9 }
 0x2b1   : > { %6444 = shalt.err (!%p6441_p2)
}
 0x2b2   : > { %s6445_s25 = scalar_lea.hbm %s8154_s27, 32  ;;  %s6449_s24 = scalar_lea.hbm %s8207_s3, 64 }
 0x2b3   : > { %p6446_p3 = scmp.ne.s32.totalorder %s8154_s27, %s6445_s25  ;;  %p6450_p4 = scmp.lt.u32.totalorder %s8154_s27, %s8207_s3 }
 0x2b4   : > { %p6451_p6 = scmp.lt.u32.totalorder %s6449_s24, %s6445_s25  ;;  %p6453_p12 = scmp.lt.u32.totalorder %s6445_s25, %s8154_s27 }
 0x2b5   : > { %p6447_p7 = pnand %p6446_p3, %p6647_p10 }
 0x2b6   : > { %p6452_p8 = por %p6451_p6, %p6450_p4 }
 0x2b7   : > { %p6448_p11 = pneg %p6447_p7 }
 0x2b8   : > { %p6454_p13 = por %p6453_p12, %p6452_p8 }
 0x2ba   : > { %p6455_p0 = pnand %p6454_p13, %p6448_p11 }
 0x2bc   : > { %6458 = shalt.err (!%p6455_p0)
}
 0x2bd   : > { %6149 = dma.vmem_to_hbm [thread:$0]  (%p6647_p10), %s8156_s19, 32, %s8154_s27, %s4902_s4  }
 0x2be PF: > { %s4945_s18 = sand.u32 1, %s6501_s12   ;;  %p8260_p5 = scmp.ne.s32.totalorder %s8215_s23, 0 }
 0x2bf   : > { %p8261_p9 = scmp.ge.s32.totalorder %s6521_s17, 2  ;;  %s4946_s21 = scalar_lea.sflag [#allocation5], %s4945_s18 }
 0x2c1   : > { %p6161_p1 = pnand %p8261_p9, %p8260_p5 }
 0x2c3   : > { %6492 = dma.done.wait (!%p6161_p1), %s4946_s21, 4096  }
 0x2c4   : > { %6494 = vsyncadd (!%p6161_p1), %s4946_s21, 4294963200  ;;  %s4955_s7 = scalar_lea.sflag [#allocation10], %s4945_s18 }
 0x2c5   : > { %6496 = dma.done.wait (!%p6161_p1), %s4955_s7, 32  }
 0x2c6   : > { %6498 = vsyncadd (!%p6161_p1), %s4955_s7, 4294967264  ;;  %s24_s17 = sadd.s32 1, %s6521_s17   ;;  %s8262_s12 = smov %s6505_s13 }
 0x2c7   : > { %p21_p2 = scmp.ge.s32.totalorder %s24_s17, 4   ;;  %s8263_s13 = smov %s6509_s14 }
 0x2c8   : > { %s8264_s14 = smov %s6656_s5  ;;  %s8265_s15 = smov %s6517_s16 }
 0x2c9   : > { %s8266_s16 = smov %s8268_s28  ;;  %23 = sbr.rel (!%p21_p2) target bundleno = 9 (0x9), region = 105 }
 0x2d0   :  { %4960 = vsyncpa [#allocation4], 1 }
 0x2d1   :  { %4962 = vsyncpa [#allocation4 + $0x1], 1 }
 0x2d2   :  { %4963 = vsyncpa [#allocation7], 1 }
 0x2d3   :  { %4964 = vsyncpa [#allocation5], 1 }
 0x2d4   :  { %4966 = vsyncpa [#allocation5 + $0x1], 1 }
 0x2d5   :  { %4967 = vsyncpa [#allocation10], 1 }
 0x2d6   :  { %4969 = vsyncpa [#allocation10 + $0x1], 1 }

</bundles_post_ra>
